<compile_context>
chip_gen: v5e
topology: v5e:2x2
jax: 0.10.0
libtpu: 0.0.40
codegen_flags: <defaults>
</compile_context>

<pallas_src>
import math

import jax
import jax.numpy as jnp
from jax import lax
from jax.experimental import pallas as pl
from jax.experimental.pallas import tpu as pltpu  # noqa: F401  (kept for TPU-specific params if scaled up)

# ---------------- configuration (small, consistent with the module) ----------
VOCAB = 100
HIDDEN = 64           # bert.config.hidden_size
NUM_HEADS = 2
HEAD_DIM = HIDDEN // NUM_HEADS
FFN = 4 * HIDDEN
NUM_BERT_LAYERS = 2
SEQ = 8
BATCH = 2
NUM_CLASSES = 4
CLS_NUM_LAYERS = 4    # ViTBERTClassifier default num_layers=4 -> 64->32->16->8->4
LN_EPS = 1e-12
MASK_BIAS = -1e9

PARAMS_PER_LAYER = 12  # wqkv,bqkv,wo,bo,ln1g,ln1b,w1,b1,w2,b2,ln2g,ln2b


# ---------------- in-kernel math helpers -------------------------------------
def _gelu(x):
    # exact erf GELU, matching PyTorch nn.GELU() default
    return 0.5 * x * (1.0 + lax.erf(x / math.sqrt(2.0)))


def _layernorm(x, gamma, beta):
    mu = jnp.mean(x, axis=-1, keepdims=True)
    var = jnp.mean((x - mu) ** 2, axis=-1, keepdims=True)
    return (x - mu) * lax.rsqrt(var + LN_EPS) * gamma + beta


def _softmax_last(x, approx):
    x = x - jnp.max(x, axis=-1, keepdims=True)
    e = jnp.exp(x)
    return e * pl.reciprocal(jnp.sum(e, axis=-1, keepdims=True), approx=approx)


def _dot_bf16(a, b):
    # MXU matmul with bf16 operands, f32 accumulation
    return jnp.dot(a.astype(jnp.bfloat16), b.astype(jnp.bfloat16),
                   preferred_element_type=jnp.float32)


def _dot_nt_bf16(a, b):
    # a @ b.T with bf16 operands, f32 accumulation (no explicit transpose)
    return lax.dot_general(a.astype(jnp.bfloat16), b.astype(jnp.bfloat16),
                           (((1,), (1,)), ((), ())),
                           preferred_element_type=jnp.float32)


# ---------------- the single fused forward kernel ----------------------------
def fused_forward_kernel(emb_ref, mask_ref, *refs):
    out_ref = refs[-1]
    params = refs[:-1]

    # ---- embedding LayerNorm --------------------------------------------------
    x = _layernorm(emb_ref[...].astype(jnp.float32),
                   params[0][...], params[1][...])          # (B*S, H)
    idx = 2

    mask = mask_ref[...].astype(jnp.float32)                # (B, S)
    scale = 1.0 / math.sqrt(HEAD_DIM)

    # ---- encoder layers -------------------------------------------------------
    for _layer in range(NUM_BERT_LAYERS):
        (wqkv, bqkv, wo, bo, ln1g, ln1b,
         w1, b1, w2, b2, ln2g, ln2b) = [params[idx + i][...]
                                        for i in range(PARAMS_PER_LAYER)]
        idx += PARAMS_PER_LAYER

        # fused QKV projection: one (B*S, H) x (H, 3H) MXU push
        qkv = _dot_bf16(x, wqkv) + bqkv                     # (B*S, 3H)
        q = qkv[:, 0:HIDDEN]
        k = qkv[:, HIDDEN:2 * HIDDEN]
        v = qkv[:, 2 * HIDDEN:3 * HIDDEN]

        # attention: unrolled over (batch, head) only for the tiny (S,S) step
        ctx_rows = []
        for b in range(BATCH):
            rows = slice(b * SEQ, (b + 1) * SEQ)
            bias_b = (1.0 - mask[b:b + 1, :]) * MASK_BIAS   # (1, S), bcast over queries
            head_ctx = []
            for h in range(NUM_HEADS):
                cols = slice(h * HEAD_DIM, (h + 1) * HEAD_DIM)
                qh = q[rows, cols]
                kh = k[rows, cols]
                vh = v[rows, cols]
                s = _dot_nt_bf16(qh, kh) * scale + bias_b   # (S, S)
                p = _softmax_last(s, approx=True)
                head_ctx.append(_dot_bf16(p, vh))           # (S, HEAD_DIM)
            ctx_rows.append(jnp.concatenate(head_ctx, axis=-1))   # (S, H)
        ctx = jnp.concatenate(ctx_rows, axis=0)             # (B*S, H)

        # single output projection over the whole batch
        attn_out = _dot_bf16(ctx, wo) + bo
        x = _layernorm(x + attn_out, ln1g, ln1b)

        h1 = _gelu(_dot_bf16(x, w1) + b1)
        ffn_out = _dot_bf16(h1, w2) + b2
        x = _layernorm(x + ffn_out, ln2g, ln2b)

    # ---- pooler + DynamicClassifier (CLS rows stay resident in VMEM) ----------
    wp, bp = params[idx][...], params[idx + 1][...]
    idx += 2
    cls = jnp.concatenate([x[b * SEQ:b * SEQ + 1, :] for b in range(BATCH)],
                          axis=0)                           # (B, H)
    h = jnp.tanh(_dot_bf16(cls, wp) + bp)

    n_hidden = (len(params) - idx - 2) // 2
    for i in range(n_hidden):
        w = params[idx + 2 * i][...]
        b_ = params[idx + 2 * i + 1][...]
        h = _gelu(_dot_bf16(h, w) + b_)
    wf = params[idx + 2 * n_hidden][...]
    bf = params[idx + 2 * n_hidden + 1][...]
    logits = _dot_bf16(h, wf) + bf
    # exact reciprocal for the final softmax so class probs sum to 1 tightly
    out_ref[...] = _softmax_last(logits, approx=False)      # nn.Softmax(dim=1)


# ---------------- parameters ---------------------------------------------------
def init_params(key):
    counter = [0]

    def nk():
        counter[0] += 1
        return jax.random.fold_in(key, counter[0])

    def dense(din, dout):
        w = 0.02 * jax.random.normal(nk(), (din, dout), jnp.float32)
        b = jnp.zeros((1, dout), jnp.float32)
        return w, b

    p = {
        "word_emb": 0.02 * jax.random.normal(nk(), (VOCAB, HIDDEN), jnp.float32),
        "pos_emb": 0.02 * jax.random.normal(nk(), (SEQ, HIDDEN), jnp.float32),
        "type_emb": 0.02 * jax.random.normal(nk(), (2, HIDDEN), jnp.float32),
        "emb_ln_g": jnp.ones((1, HIDDEN), jnp.float32),
        "emb_ln_b": jnp.zeros((1, HIDDEN), jnp.float32),
    }

    layers = []
    for _ in range(NUM_BERT_LAYERS):
        wqkv, bqkv = dense(HIDDEN, 3 * HIDDEN)   # fused Q/K/V projection
        wo, bo = dense(HIDDEN, HIDDEN)
        w1, b1 = dense(HIDDEN, FFN)
        w2, b2 = dense(FFN, HIDDEN)
        ones = jnp.ones((1, HIDDEN), jnp.float32)
        zeros = jnp.zeros((1, HIDDEN), jnp.float32)
        layers.append((wqkv, bqkv, wo, bo, ones, zeros,
                       w1, b1, w2, b2, ones, zeros))
    p["layers"] = layers

    p["pooler"] = dense(HIDDEN, HIDDEN)

    cls_params = []
    d = HIDDEN
    for _ in range(CLS_NUM_LAYERS):
        w, b = dense(d, d // 2)
        cls_params += [w, b]
        d = d // 2
    wf, bf = dense(d, NUM_CLASSES)
    cls_params += [wf, bf]
    p["classifier"] = tuple(cls_params)
    return p


def _flat_params(params):
    flat = [params["emb_ln_g"], params["emb_ln_b"]]
    for lp in params["layers"]:
        flat.extend(lp)
    flat.extend(params["pooler"])
    flat.extend(params["classifier"])
    return flat


# ---------------- forward pass (== ViTBERTClassifier.forward) ----------------
@jax.jit
def vit_bert_classifier_forward(input_ids, attention_mask, params):
    B, S = input_ids.shape
    # embedding gathers are glue and stay in JAX (XLA fuses them for free)
    emb = (params["word_emb"][input_ids]
           + params["pos_emb"][jnp.arange(S)][None, :, :]
           + params["type_emb"][0][None, None, :])
    emb_flat = emb.reshape(B * S, HIDDEN)
    mask = attention_mask.astype(jnp.float32)

    # one pallas_call for the whole forward: everything resident in VMEM
    return pl.pallas_call(
        fused_forward_kernel,
        out_shape=jax.ShapeDtypeStruct((B, NUM_CLASSES), jnp.float32),
    )(emb_flat, mask, *_flat_params(params))


# ---------------- demo ---------------------------------------------------------
if __name__ == "__main__":
    key = jax.random.PRNGKey(0)
    k_params, k_ids = jax.random.split(key)

    params = init_params(k_params)
    input_ids = jax.random.randint(k_ids, (BATCH, SEQ), 0, VOCAB, dtype=jnp.int32)
    attention_mask = jnp.ones((BATCH, SEQ), jnp.int32).at[1, -2:].set(0)

    probs = vit_bert_classifier_forward(input_ids, attention_mask, params)
    probs = jax.block_until_ready(probs)

    assert probs.shape == (BATCH, NUM_CLASSES)
    assert bool(jnp.all(jnp.abs(jnp.sum(probs, axis=1) - 1.0) < 1e-4))
    print("KERNEL_OK")
</pallas_src>

<mosaic_0001>
module attributes {stable_mosaic.version = 11 : i64} {
  func.func @fused_forward_kernel(%arg0: memref<16x64xf32, #tpu.memory_space<vmem>>, %arg1: memref<2x8xf32, #tpu.memory_space<vmem>>, %arg2: memref<1x64xf32, #tpu.memory_space<vmem>>, %arg3: memref<1x64xf32, #tpu.memory_space<vmem>>, %arg4: memref<64x192xf32, #tpu.memory_space<vmem>>, %arg5: memref<1x192xf32, #tpu.memory_space<vmem>>, %arg6: memref<64x64xf32, #tpu.memory_space<vmem>>, %arg7: memref<1x64xf32, #tpu.memory_space<vmem>>, %arg8: memref<1x64xf32, #tpu.memory_space<vmem>>, %arg9: memref<1x64xf32, #tpu.memory_space<vmem>>, %arg10: memref<64x256xf32, #tpu.memory_space<vmem>>, %arg11: memref<1x256xf32, #tpu.memory_space<vmem>>, %arg12: memref<256x64xf32, #tpu.memory_space<vmem>>, %arg13: memref<1x64xf32, #tpu.memory_space<vmem>>, %arg14: memref<1x64xf32, #tpu.memory_space<vmem>>, %arg15: memref<1x64xf32, #tpu.memory_space<vmem>>, %arg16: memref<64x192xf32, #tpu.memory_space<vmem>>, %arg17: memref<1x192xf32, #tpu.memory_space<vmem>>, %arg18: memref<64x64xf32, #tpu.memory_space<vmem>>, %arg19: memref<1x64xf32, #tpu.memory_space<vmem>>, %arg20: memref<1x64xf32, #tpu.memory_space<vmem>>, %arg21: memref<1x64xf32, #tpu.memory_space<vmem>>, %arg22: memref<64x256xf32, #tpu.memory_space<vmem>>, %arg23: memref<1x256xf32, #tpu.memory_space<vmem>>, %arg24: memref<256x64xf32, #tpu.memory_space<vmem>>, %arg25: memref<1x64xf32, #tpu.memory_space<vmem>>, %arg26: memref<1x64xf32, #tpu.memory_space<vmem>>, %arg27: memref<1x64xf32, #tpu.memory_space<vmem>>, %arg28: memref<64x64xf32, #tpu.memory_space<vmem>>, %arg29: memref<1x64xf32, #tpu.memory_space<vmem>>, %arg30: memref<64x32xf32, #tpu.memory_space<vmem>>, %arg31: memref<1x32xf32, #tpu.memory_space<vmem>>, %arg32: memref<32x16xf32, #tpu.memory_space<vmem>>, %arg33: memref<1x16xf32, #tpu.memory_space<vmem>>, %arg34: memref<16x8xf32, #tpu.memory_space<vmem>>, %arg35: memref<1x8xf32, #tpu.memory_space<vmem>>, %arg36: memref<8x4xf32, #tpu.memory_space<vmem>>, %arg37: memref<1x4xf32, #tpu.memory_space<vmem>>, %arg38: memref<4x4xf32, #tpu.memory_space<vmem>>, %arg39: memref<1x4xf32, #tpu.memory_space<vmem>>, %arg40: memref<2x4xf32, #tpu.memory_space<vmem>>) attributes {dimension_semantics = [], scalar_prefetch = 0 : i64, scratch_operands = 0 : i64, tpu.core_type = #tpu.core_type<tc>} {
    %c0 = arith.constant 0 : index
    %c0_0 = arith.constant 0 : index
    %0 = vector.load %arg0[%c0, %c0_0] : memref<16x64xf32, #tpu.memory_space<vmem>>, vector<16x64xf32>
    %c0_1 = arith.constant 0 : index
    %c0_2 = arith.constant 0 : index
    %1 = vector.load %arg2[%c0_1, %c0_2] : memref<1x64xf32, #tpu.memory_space<vmem>>, vector<1x64xf32>
    %c0_3 = arith.constant 0 : index
    %c0_4 = arith.constant 0 : index
    %2 = vector.load %arg3[%c0_3, %c0_4] : memref<1x64xf32, #tpu.memory_space<vmem>>, vector<1x64xf32>
    %cst = arith.constant dense<0.000000e+00> : vector<16xf32>
    %3 = vector.multi_reduction <add>, %0, %cst [1] : vector<16x64xf32> to vector<16xf32>
    %4 = vector.shape_cast %3 : vector<16xf32> to vector<16x1xf32>
    %cst_5 = arith.constant 6.400000e+01 : f32
    %5 = vector.broadcast %cst_5 : f32 to vector<16x1xf32>
    %6 = arith.divf %4, %5 : vector<16x1xf32>
    %7 = vector.broadcast %6 : vector<16x1xf32> to vector<16x64xf32>
    %8 = arith.subf %0, %7 : vector<16x64xf32>
    %9 = arith.mulf %8, %8 : vector<16x64xf32>
    %cst_6 = arith.constant dense<0.000000e+00> : vector<16xf32>
    %10 = vector.multi_reduction <add>, %9, %cst_6 [1] : vector<16x64xf32> to vector<16xf32>
    %11 = vector.shape_cast %10 : vector<16xf32> to vector<16x1xf32>
    %cst_7 = arith.constant 6.400000e+01 : f32
    %12 = vector.broadcast %cst_7 : f32 to vector<16x1xf32>
    %13 = arith.divf %11, %12 : vector<16x1xf32>
    %14 = vector.broadcast %6 : vector<16x1xf32> to vector<16x64xf32>
    %15 = arith.subf %0, %14 : vector<16x64xf32>
    %cst_8 = arith.constant 9.99999996E-13 : f32
    %16 = vector.broadcast %cst_8 : f32 to vector<16x1xf32>
    %17 = arith.addf %13, %16 : vector<16x1xf32>
    %18 = math.rsqrt %17 : vector<16x1xf32>
    %19 = vector.broadcast %18 : vector<16x1xf32> to vector<16x64xf32>
    %20 = arith.mulf %15, %19 : vector<16x64xf32>
    %21 = vector.broadcast %1 : vector<1x64xf32> to vector<16x64xf32>
    %22 = arith.mulf %20, %21 : vector<16x64xf32>
    %23 = vector.broadcast %2 : vector<1x64xf32> to vector<16x64xf32>
    %24 = arith.addf %22, %23 : vector<16x64xf32>
    %c0_9 = arith.constant 0 : index
    %c0_10 = arith.constant 0 : index
    %25 = vector.load %arg1[%c0_9, %c0_10] : memref<2x8xf32, #tpu.memory_space<vmem>>, vector<2x8xf32>
    %c0_11 = arith.constant 0 : index
    %c0_12 = arith.constant 0 : index
    %26 = vector.load %arg4[%c0_11, %c0_12] : memref<64x192xf32, #tpu.memory_space<vmem>>, vector<64x192xf32>
    %c0_13 = arith.constant 0 : index
    %c0_14 = arith.constant 0 : index
    %27 = vector.load %arg5[%c0_13, %c0_14] : memref<1x192xf32, #tpu.memory_space<vmem>>, vector<1x192xf32>
    %c0_15 = arith.constant 0 : index
    %c0_16 = arith.constant 0 : index
    %28 = vector.load %arg6[%c0_15, %c0_16] : memref<64x64xf32, #tpu.memory_space<vmem>>, vector<64x64xf32>
    %c0_17 = arith.constant 0 : index
    %c0_18 = arith.constant 0 : index
    %29 = vector.load %arg7[%c0_17, %c0_18] : memref<1x64xf32, #tpu.memory_space<vmem>>, vector<1x64xf32>
    %c0_19 = arith.constant 0 : index
    %c0_20 = arith.constant 0 : index
    %30 = vector.load %arg8[%c0_19, %c0_20] : memref<1x64xf32, #tpu.memory_space<vmem>>, vector<1x64xf32>
    %c0_21 = arith.constant 0 : index
    %c0_22 = arith.constant 0 : index
    %31 = vector.load %arg9[%c0_21, %c0_22] : memref<1x64xf32, #tpu.memory_space<vmem>>, vector<1x64xf32>
    %c0_23 = arith.constant 0 : index
    %c0_24 = arith.constant 0 : index
    %32 = vector.load %arg10[%c0_23, %c0_24] : memref<64x256xf32, #tpu.memory_space<vmem>>, vector<64x256xf32>
    %c0_25 = arith.constant 0 : index
    %c0_26 = arith.constant 0 : index
    %33 = vector.load %arg11[%c0_25, %c0_26] : memref<1x256xf32, #tpu.memory_space<vmem>>, vector<1x256xf32>
    %c0_27 = arith.constant 0 : index
    %c0_28 = arith.constant 0 : index
    %34 = vector.load %arg12[%c0_27, %c0_28] : memref<256x64xf32, #tpu.memory_space<vmem>>, vector<256x64xf32>
    %c0_29 = arith.constant 0 : index
    %c0_30 = arith.constant 0 : index
    %35 = vector.load %arg13[%c0_29, %c0_30] : memref<1x64xf32, #tpu.memory_space<vmem>>, vector<1x64xf32>
    %c0_31 = arith.constant 0 : index
    %c0_32 = arith.constant 0 : index
    %36 = vector.load %arg14[%c0_31, %c0_32] : memref<1x64xf32, #tpu.memory_space<vmem>>, vector<1x64xf32>
    %c0_33 = arith.constant 0 : index
    %c0_34 = arith.constant 0 : index
    %37 = vector.load %arg15[%c0_33, %c0_34] : memref<1x64xf32, #tpu.memory_space<vmem>>, vector<1x64xf32>
    %38 = arith.truncf %24 : vector<16x64xf32> to vector<16x64xbf16>
    %39 = arith.truncf %26 : vector<64x192xf32> to vector<64x192xbf16>
    %cst_35 = arith.constant dense<0.000000e+00> : vector<16x192xf32>
    %40 = tpu.matmul %38, %39, %cst_35 {dimension_numbers = #tpu.dot_dimension_numbers<[1], [0], [0], [1], [0, 0, 1, 1], [], []>} : vector<16x64xbf16>, vector<64x192xbf16>, vector<16x192xf32> -> vector<16x192xf32>
    %41 = vector.broadcast %27 : vector<1x192xf32> to vector<16x192xf32>
    %42 = arith.addf %40, %41 : vector<16x192xf32>
    %43 = vector.extract_strided_slice %42 {offsets = [0, 0], sizes = [16, 64], strides = [1, 1]} : vector<16x192xf32> to vector<16x64xf32>
    %44 = vector.extract_strided_slice %42 {offsets = [0, 64], sizes = [16, 64], strides = [1, 1]} : vector<16x192xf32> to vector<16x64xf32>
    %45 = vector.extract_strided_slice %42 {offsets = [0, 128], sizes = [16, 64], strides = [1, 1]} : vector<16x192xf32> to vector<16x64xf32>
    %46 = vector.extract_strided_slice %25 {offsets = [0, 0], sizes = [1, 8], strides = [1, 1]} : vector<2x8xf32> to vector<1x8xf32>
    %cst_36 = arith.constant 1.000000e+00 : f32
    %47 = vector.broadcast %cst_36 : f32 to vector<1x8xf32>
    %48 = arith.subf %47, %46 : vector<1x8xf32>
    %cst_37 = arith.constant -1.000000e+09 : f32
    %49 = vector.broadcast %cst_37 : f32 to vector<1x8xf32>
    %50 = arith.mulf %48, %49 : vector<1x8xf32>
    %51 = vector.extract_strided_slice %43 {offsets = [0, 0], sizes = [8, 32], strides = [1, 1]} : vector<16x64xf32> to vector<8x32xf32>
    %52 = vector.extract_strided_slice %44 {offsets = [0, 0], sizes = [8, 32], strides = [1, 1]} : vector<16x64xf32> to vector<8x32xf32>
    %53 = vector.extract_strided_slice %45 {offsets = [0, 0], sizes = [8, 32], strides = [1, 1]} : vector<16x64xf32> to vector<8x32xf32>
    %54 = arith.truncf %51 : vector<8x32xf32> to vector<8x32xbf16>
    %55 = arith.truncf %52 : vector<8x32xf32> to vector<8x32xbf16>
    %cst_38 = arith.constant dense<0.000000e+00> : vector<8x8xf32>
    %56 = tpu.matmul %54, %55, %cst_38 {dimension_numbers = #tpu.dot_dimension_numbers<[1], [1], [0], [0], [0, 0, 1, 0], [], []>} : vector<8x32xbf16>, vector<8x32xbf16>, vector<8x8xf32> -> vector<8x8xf32>
    %cst_39 = arith.constant 0.176776692 : f32
    %57 = vector.broadcast %cst_39 : f32 to vector<8x8xf32>
    %58 = arith.mulf %56, %57 : vector<8x8xf32>
    %59 = vector.broadcast %50 : vector<1x8xf32> to vector<8x8xf32>
    %60 = arith.addf %58, %59 : vector<8x8xf32>
    %cst_40 = arith.constant dense<0xFF800000> : vector<8xf32>
    %61 = vector.multi_reduction <maximumf>, %60, %cst_40 [1] : vector<8x8xf32> to vector<8xf32>
    %62 = vector.shape_cast %61 : vector<8xf32> to vector<8x1xf32>
    %63 = vector.broadcast %62 : vector<8x1xf32> to vector<8x8xf32>
    %64 = arith.subf %60, %63 : vector<8x8xf32>
    %65 = math.exp %64 : vector<8x8xf32>
    %cst_41 = arith.constant dense<0.000000e+00> : vector<8xf32>
    %66 = vector.multi_reduction <add>, %65, %cst_41 [1] : vector<8x8xf32> to vector<8xf32>
    %67 = vector.shape_cast %66 : vector<8xf32> to vector<8x1xf32>
    %68 = tpu.reciprocal %67 {approx = true} : vector<8x1xf32> -> vector<8x1xf32>
    %69 = vector.broadcast %68 : vector<8x1xf32> to vector<8x8xf32>
    %70 = arith.mulf %65, %69 : vector<8x8xf32>
    %71 = arith.truncf %70 : vector<8x8xf32> to vector<8x8xbf16>
    %72 = arith.truncf %53 : vector<8x32xf32> to vector<8x32xbf16>
    %cst_42 = arith.constant dense<0.000000e+00> : vector<8x32xf32>
    %73 = tpu.matmul %71, %72, %cst_42 {dimension_numbers = #tpu.dot_dimension_numbers<[1], [0], [0], [1], [0, 0, 1, 1], [], []>} : vector<8x8xbf16>, vector<8x32xbf16>, vector<8x32xf32> -> vector<8x32xf32>
    %74 = vector.extract_strided_slice %43 {offsets = [0, 32], sizes = [8, 32], strides = [1, 1]} : vector<16x64xf32> to vector<8x32xf32>
    %75 = vector.extract_strided_slice %44 {offsets = [0, 32], sizes = [8, 32], strides = [1, 1]} : vector<16x64xf32> to vector<8x32xf32>
    %76 = vector.extract_strided_slice %45 {offsets = [0, 32], sizes = [8, 32], strides = [1, 1]} : vector<16x64xf32> to vector<8x32xf32>
    %77 = arith.truncf %74 : vector<8x32xf32> to vector<8x32xbf16>
    %78 = arith.truncf %75 : vector<8x32xf32> to vector<8x32xbf16>
    %cst_43 = arith.constant dense<0.000000e+00> : vector<8x8xf32>
    %79 = tpu.matmul %77, %78, %cst_43 {dimension_numbers = #tpu.dot_dimension_numbers<[1], [1], [0], [0], [0, 0, 1, 0], [], []>} : vector<8x32xbf16>, vector<8x32xbf16>, vector<8x8xf32> -> vector<8x8xf32>
    %cst_44 = arith.constant 0.176776692 : f32
    %80 = vector.broadcast %cst_44 : f32 to vector<8x8xf32>
    %81 = arith.mulf %79, %80 : vector<8x8xf32>
    %82 = vector.broadcast %50 : vector<1x8xf32> to vector<8x8xf32>
    %83 = arith.addf %81, %82 : vector<8x8xf32>
    %cst_45 = arith.constant dense<0xFF800000> : vector<8xf32>
    %84 = vector.multi_reduction <maximumf>, %83, %cst_45 [1] : vector<8x8xf32> to vector<8xf32>
    %85 = vector.shape_cast %84 : vector<8xf32> to vector<8x1xf32>
    %86 = vector.broadcast %85 : vector<8x1xf32> to vector<8x8xf32>
    %87 = arith.subf %83, %86 : vector<8x8xf32>
    %88 = math.exp %87 : vector<8x8xf32>
    %cst_46 = arith.constant dense<0.000000e+00> : vector<8xf32>
    %89 = vector.multi_reduction <add>, %88, %cst_46 [1] : vector<8x8xf32> to vector<8xf32>
    %90 = vector.shape_cast %89 : vector<8xf32> to vector<8x1xf32>
    %91 = tpu.reciprocal %90 {approx = true} : vector<8x1xf32> -> vector<8x1xf32>
    %92 = vector.broadcast %91 : vector<8x1xf32> to vector<8x8xf32>
    %93 = arith.mulf %88, %92 : vector<8x8xf32>
    %94 = arith.truncf %93 : vector<8x8xf32> to vector<8x8xbf16>
    %95 = arith.truncf %76 : vector<8x32xf32> to vector<8x32xbf16>
    %cst_47 = arith.constant dense<0.000000e+00> : vector<8x32xf32>
    %96 = tpu.matmul %94, %95, %cst_47 {dimension_numbers = #tpu.dot_dimension_numbers<[1], [0], [0], [1], [0, 0, 1, 1], [], []>} : vector<8x8xbf16>, vector<8x32xbf16>, vector<8x32xf32> -> vector<8x32xf32>
    %97 = tpu.concatenate %73, %96 in 1 : vector<8x32xf32>, vector<8x32xf32> -> vector<8x64xf32>
    %98 = vector.extract_strided_slice %25 {offsets = [1, 0], sizes = [1, 8], strides = [1, 1]} : vector<2x8xf32> to vector<1x8xf32>
    %cst_48 = arith.constant 1.000000e+00 : f32
    %99 = vector.broadcast %cst_48 : f32 to vector<1x8xf32>
    %100 = arith.subf %99, %98 : vector<1x8xf32>
    %cst_49 = arith.constant -1.000000e+09 : f32
    %101 = vector.broadcast %cst_49 : f32 to vector<1x8xf32>
    %102 = arith.mulf %100, %101 : vector<1x8xf32>
    %103 = vector.extract_strided_slice %43 {offsets = [8, 0], sizes = [8, 32], strides = [1, 1]} : vector<16x64xf32> to vector<8x32xf32>
    %104 = vector.extract_strided_slice %44 {offsets = [8, 0], sizes = [8, 32], strides = [1, 1]} : vector<16x64xf32> to vector<8x32xf32>
    %105 = vector.extract_strided_slice %45 {offsets = [8, 0], sizes = [8, 32], strides = [1, 1]} : vector<16x64xf32> to vector<8x32xf32>
    %106 = arith.truncf %103 : vector<8x32xf32> to vector<8x32xbf16>
    %107 = arith.truncf %104 : vector<8x32xf32> to vector<8x32xbf16>
    %cst_50 = arith.constant dense<0.000000e+00> : vector<8x8xf32>
    %108 = tpu.matmul %106, %107, %cst_50 {dimension_numbers = #tpu.dot_dimension_numbers<[1], [1], [0], [0], [0, 0, 1, 0], [], []>} : vector<8x32xbf16>, vector<8x32xbf16>, vector<8x8xf32> -> vector<8x8xf32>
    %cst_51 = arith.constant 0.176776692 : f32
    %109 = vector.broadcast %cst_51 : f32 to vector<8x8xf32>
    %110 = arith.mulf %108, %109 : vector<8x8xf32>
    %111 = vector.broadcast %102 : vector<1x8xf32> to vector<8x8xf32>
    %112 = arith.addf %110, %111 : vector<8x8xf32>
    %cst_52 = arith.constant dense<0xFF800000> : vector<8xf32>
    %113 = vector.multi_reduction <maximumf>, %112, %cst_52 [1] : vector<8x8xf32> to vector<8xf32>
    %114 = vector.shape_cast %113 : vector<8xf32> to vector<8x1xf32>
    %115 = vector.broadcast %114 : vector<8x1xf32> to vector<8x8xf32>
    %116 = arith.subf %112, %115 : vector<8x8xf32>
    %117 = math.exp %116 : vector<8x8xf32>
    %cst_53 = arith.constant dense<0.000000e+00> : vector<8xf32>
    %118 = vector.multi_reduction <add>, %117, %cst_53 [1] : vector<8x8xf32> to vector<8xf32>
    %119 = vector.shape_cast %118 : vector<8xf32> to vector<8x1xf32>
    %120 = tpu.reciprocal %119 {approx = true} : vector<8x1xf32> -> vector<8x1xf32>
    %121 = vector.broadcast %120 : vector<8x1xf32> to vector<8x8xf32>
    %122 = arith.mulf %117, %121 : vector<8x8xf32>
    %123 = arith.truncf %122 : vector<8x8xf32> to vector<8x8xbf16>
    %124 = arith.truncf %105 : vector<8x32xf32> to vector<8x32xbf16>
    %cst_54 = arith.constant dense<0.000000e+00> : vector<8x32xf32>
    %125 = tpu.matmul %123, %124, %cst_54 {dimension_numbers = #tpu.dot_dimension_numbers<[1], [0], [0], [1], [0, 0, 1, 1], [], []>} : vector<8x8xbf16>, vector<8x32xbf16>, vector<8x32xf32> -> vector<8x32xf32>
    %126 = vector.extract_strided_slice %43 {offsets = [8, 32], sizes = [8, 32], strides = [1, 1]} : vector<16x64xf32> to vector<8x32xf32>
    %127 = vector.extract_strided_slice %44 {offsets = [8, 32], sizes = [8, 32], strides = [1, 1]} : vector<16x64xf32> to vector<8x32xf32>
    %128 = vector.extract_strided_slice %45 {offsets = [8, 32], sizes = [8, 32], strides = [1, 1]} : vector<16x64xf32> to vector<8x32xf32>
    %129 = arith.truncf %126 : vector<8x32xf32> to vector<8x32xbf16>
    %130 = arith.truncf %127 : vector<8x32xf32> to vector<8x32xbf16>
    %cst_55 = arith.constant dense<0.000000e+00> : vector<8x8xf32>
    %131 = tpu.matmul %129, %130, %cst_55 {dimension_numbers = #tpu.dot_dimension_numbers<[1], [1], [0], [0], [0, 0, 1, 0], [], []>} : vector<8x32xbf16>, vector<8x32xbf16>, vector<8x8xf32> -> vector<8x8xf32>
    %cst_56 = arith.constant 0.176776692 : f32
    %132 = vector.broadcast %cst_56 : f32 to vector<8x8xf32>
    %133 = arith.mulf %131, %132 : vector<8x8xf32>
    %134 = vector.broadcast %102 : vector<1x8xf32> to vector<8x8xf32>
    %135 = arith.addf %133, %134 : vector<8x8xf32>
    %cst_57 = arith.constant dense<0xFF800000> : vector<8xf32>
    %136 = vector.multi_reduction <maximumf>, %135, %cst_57 [1] : vector<8x8xf32> to vector<8xf32>
    %137 = vector.shape_cast %136 : vector<8xf32> to vector<8x1xf32>
    %138 = vector.broadcast %137 : vector<8x1xf32> to vector<8x8xf32>
    %139 = arith.subf %135, %138 : vector<8x8xf32>
    %140 = math.exp %139 : vector<8x8xf32>
    %cst_58 = arith.constant dense<0.000000e+00> : vector<8xf32>
    %141 = vector.multi_reduction <add>, %140, %cst_58 [1] : vector<8x8xf32> to vector<8xf32>
    %142 = vector.shape_cast %141 : vector<8xf32> to vector<8x1xf32>
    %143 = tpu.reciprocal %142 {approx = true} : vector<8x1xf32> -> vector<8x1xf32>
    %144 = vector.broadcast %143 : vector<8x1xf32> to vector<8x8xf32>
    %145 = arith.mulf %140, %144 : vector<8x8xf32>
    %146 = arith.truncf %145 : vector<8x8xf32> to vector<8x8xbf16>
    %147 = arith.truncf %128 : vector<8x32xf32> to vector<8x32xbf16>
    %cst_59 = arith.constant dense<0.000000e+00> : vector<8x32xf32>
    %148 = tpu.matmul %146, %147, %cst_59 {dimension_numbers = #tpu.dot_dimension_numbers<[1], [0], [0], [1], [0, 0, 1, 1], [], []>} : vector<8x8xbf16>, vector<8x32xbf16>, vector<8x32xf32> -> vector<8x32xf32>
    %149 = tpu.concatenate %125, %148 in 1 : vector<8x32xf32>, vector<8x32xf32> -> vector<8x64xf32>
    %150 = tpu.concatenate %97, %149 in 0 : vector<8x64xf32>, vector<8x64xf32> -> vector<16x64xf32>
    %151 = arith.truncf %150 : vector<16x64xf32> to vector<16x64xbf16>
    %152 = arith.truncf %28 : vector<64x64xf32> to vector<64x64xbf16>
    %cst_60 = arith.constant dense<0.000000e+00> : vector<16x64xf32>
    %153 = tpu.matmul %151, %152, %cst_60 {dimension_numbers = #tpu.dot_dimension_numbers<[1], [0], [0], [1], [0, 0, 1, 1], [], []>} : vector<16x64xbf16>, vector<64x64xbf16>, vector<16x64xf32> -> vector<16x64xf32>
    %154 = vector.broadcast %29 : vector<1x64xf32> to vector<16x64xf32>
    %155 = arith.addf %153, %154 : vector<16x64xf32>
    %156 = arith.addf %24, %155 : vector<16x64xf32>
    %cst_61 = arith.constant dense<0.000000e+00> : vector<16xf32>
    %157 = vector.multi_reduction <add>, %156, %cst_61 [1] : vector<16x64xf32> to vector<16xf32>
    %158 = vector.shape_cast %157 : vector<16xf32> to vector<16x1xf32>
    %cst_62 = arith.constant 6.400000e+01 : f32
    %159 = vector.broadcast %cst_62 : f32 to vector<16x1xf32>
    %160 = arith.divf %158, %159 : vector<16x1xf32>
    %161 = vector.broadcast %160 : vector<16x1xf32> to vector<16x64xf32>
    %162 = arith.subf %156, %161 : vector<16x64xf32>
    %163 = arith.mulf %162, %162 : vector<16x64xf32>
    %cst_63 = arith.constant dense<0.000000e+00> : vector<16xf32>
    %164 = vector.multi_reduction <add>, %163, %cst_63 [1] : vector<16x64xf32> to vector<16xf32>
    %165 = vector.shape_cast %164 : vector<16xf32> to vector<16x1xf32>
    %cst_64 = arith.constant 6.400000e+01 : f32
    %166 = vector.broadcast %cst_64 : f32 to vector<16x1xf32>
    %167 = arith.divf %165, %166 : vector<16x1xf32>
    %168 = vector.broadcast %160 : vector<16x1xf32> to vector<16x64xf32>
    %169 = arith.subf %156, %168 : vector<16x64xf32>
    %cst_65 = arith.constant 9.99999996E-13 : f32
    %170 = vector.broadcast %cst_65 : f32 to vector<16x1xf32>
    %171 = arith.addf %167, %170 : vector<16x1xf32>
    %172 = math.rsqrt %171 : vector<16x1xf32>
    %173 = vector.broadcast %172 : vector<16x1xf32> to vector<16x64xf32>
    %174 = arith.mulf %169, %173 : vector<16x64xf32>
    %175 = vector.broadcast %30 : vector<1x64xf32> to vector<16x64xf32>
    %176 = arith.mulf %174, %175 : vector<16x64xf32>
    %177 = vector.broadcast %31 : vector<1x64xf32> to vector<16x64xf32>
    %178 = arith.addf %176, %177 : vector<16x64xf32>
    %179 = arith.truncf %178 : vector<16x64xf32> to vector<16x64xbf16>
    %180 = arith.truncf %32 : vector<64x256xf32> to vector<64x256xbf16>
    %cst_66 = arith.constant dense<0.000000e+00> : vector<16x256xf32>
    %181 = tpu.matmul %179, %180, %cst_66 {dimension_numbers = #tpu.dot_dimension_numbers<[1], [0], [0], [1], [0, 0, 1, 1], [], []>} : vector<16x64xbf16>, vector<64x256xbf16>, vector<16x256xf32> -> vector<16x256xf32>
    %182 = vector.broadcast %33 : vector<1x256xf32> to vector<16x256xf32>
    %183 = arith.addf %181, %182 : vector<16x256xf32>
    %cst_67 = arith.constant 5.000000e-01 : f32
    %184 = vector.broadcast %cst_67 : f32 to vector<16x256xf32>
    %185 = arith.mulf %184, %183 : vector<16x256xf32>
    %cst_68 = arith.constant 1.41421354 : f32
    %186 = vector.broadcast %cst_68 : f32 to vector<16x256xf32>
    %187 = arith.divf %183, %186 : vector<16x256xf32>
    %188 = math.erf %187 : vector<16x256xf32>
    %cst_69 = arith.constant 1.000000e+00 : f32
    %189 = vector.broadcast %cst_69 : f32 to vector<16x256xf32>
    %190 = arith.addf %189, %188 : vector<16x256xf32>
    %191 = arith.mulf %185, %190 : vector<16x256xf32>
    %192 = arith.truncf %191 : vector<16x256xf32> to vector<16x256xbf16>
    %193 = arith.truncf %34 : vector<256x64xf32> to vector<256x64xbf16>
    %cst_70 = arith.constant dense<0.000000e+00> : vector<16x64xf32>
    %194 = tpu.matmul %192, %193, %cst_70 {dimension_numbers = #tpu.dot_dimension_numbers<[1], [0], [0], [1], [0, 0, 1, 1], [], []>} : vector<16x256xbf16>, vector<256x64xbf16>, vector<16x64xf32> -> vector<16x64xf32>
    %195 = vector.broadcast %35 : vector<1x64xf32> to vector<16x64xf32>
    %196 = arith.addf %194, %195 : vector<16x64xf32>
    %197 = arith.addf %178, %196 : vector<16x64xf32>
    %cst_71 = arith.constant dense<0.000000e+00> : vector<16xf32>
    %198 = vector.multi_reduction <add>, %197, %cst_71 [1] : vector<16x64xf32> to vector<16xf32>
    %199 = vector.shape_cast %198 : vector<16xf32> to vector<16x1xf32>
    %cst_72 = arith.constant 6.400000e+01 : f32
    %200 = vector.broadcast %cst_72 : f32 to vector<16x1xf32>
    %201 = arith.divf %199, %200 : vector<16x1xf32>
    %202 = vector.broadcast %201 : vector<16x1xf32> to vector<16x64xf32>
    %203 = arith.subf %197, %202 : vector<16x64xf32>
    %204 = arith.mulf %203, %203 : vector<16x64xf32>
    %cst_73 = arith.constant dense<0.000000e+00> : vector<16xf32>
    %205 = vector.multi_reduction <add>, %204, %cst_73 [1] : vector<16x64xf32> to vector<16xf32>
    %206 = vector.shape_cast %205 : vector<16xf32> to vector<16x1xf32>
    %cst_74 = arith.constant 6.400000e+01 : f32
    %207 = vector.broadcast %cst_74 : f32 to vector<16x1xf32>
    %208 = arith.divf %206, %207 : vector<16x1xf32>
    %209 = vector.broadcast %201 : vector<16x1xf32> to vector<16x64xf32>
    %210 = arith.subf %197, %209 : vector<16x64xf32>
    %cst_75 = arith.constant 9.99999996E-13 : f32
    %211 = vector.broadcast %cst_75 : f32 to vector<16x1xf32>
    %212 = arith.addf %208, %211 : vector<16x1xf32>
    %213 = math.rsqrt %212 : vector<16x1xf32>
    %214 = vector.broadcast %213 : vector<16x1xf32> to vector<16x64xf32>
    %215 = arith.mulf %210, %214 : vector<16x64xf32>
    %216 = vector.broadcast %36 : vector<1x64xf32> to vector<16x64xf32>
    %217 = arith.mulf %215, %216 : vector<16x64xf32>
    %218 = vector.broadcast %37 : vector<1x64xf32> to vector<16x64xf32>
    %219 = arith.addf %217, %218 : vector<16x64xf32>
    %c0_76 = arith.constant 0 : index
    %c0_77 = arith.constant 0 : index
    %220 = vector.load %arg16[%c0_76, %c0_77] : memref<64x192xf32, #tpu.memory_space<vmem>>, vector<64x192xf32>
    %c0_78 = arith.constant 0 : index
    %c0_79 = arith.constant 0 : index
    %221 = vector.load %arg17[%c0_78, %c0_79] : memref<1x192xf32, #tpu.memory_space<vmem>>, vector<1x192xf32>
    %c0_80 = arith.constant 0 : index
    %c0_81 = arith.constant 0 : index
    %222 = vector.load %arg18[%c0_80, %c0_81] : memref<64x64xf32, #tpu.memory_space<vmem>>, vector<64x64xf32>
    %c0_82 = arith.constant 0 : index
    %c0_83 = arith.constant 0 : index
    %223 = vector.load %arg19[%c0_82, %c0_83] : memref<1x64xf32, #tpu.memory_space<vmem>>, vector<1x64xf32>
    %c0_84 = arith.constant 0 : index
    %c0_85 = arith.constant 0 : index
    %224 = vector.load %arg20[%c0_84, %c0_85] : memref<1x64xf32, #tpu.memory_space<vmem>>, vector<1x64xf32>
    %c0_86 = arith.constant 0 : index
    %c0_87 = arith.constant 0 : index
    %225 = vector.load %arg21[%c0_86, %c0_87] : memref<1x64xf32, #tpu.memory_space<vmem>>, vector<1x64xf32>
    %c0_88 = arith.constant 0 : index
    %c0_89 = arith.constant 0 : index
    %226 = vector.load %arg22[%c0_88, %c0_89] : memref<64x256xf32, #tpu.memory_space<vmem>>, vector<64x256xf32>
    %c0_90 = arith.constant 0 : index
    %c0_91 = arith.constant 0 : index
    %227 = vector.load %arg23[%c0_90, %c0_91] : memref<1x256xf32, #tpu.memory_space<vmem>>, vector<1x256xf32>
    %c0_92 = arith.constant 0 : index
    %c0_93 = arith.constant 0 : index
    %228 = vector.load %arg24[%c0_92, %c0_93] : memref<256x64xf32, #tpu.memory_space<vmem>>, vector<256x64xf32>
    %c0_94 = arith.constant 0 : index
    %c0_95 = arith.constant 0 : index
    %229 = vector.load %arg25[%c0_94, %c0_95] : memref<1x64xf32, #tpu.memory_space<vmem>>, vector<1x64xf32>
    %c0_96 = arith.constant 0 : index
    %c0_97 = arith.constant 0 : index
    %230 = vector.load %arg26[%c0_96, %c0_97] : memref<1x64xf32, #tpu.memory_space<vmem>>, vector<1x64xf32>
    %c0_98 = arith.constant 0 : index
    %c0_99 = arith.constant 0 : index
    %231 = vector.load %arg27[%c0_98, %c0_99] : memref<1x64xf32, #tpu.memory_space<vmem>>, vector<1x64xf32>
    %232 = arith.truncf %219 : vector<16x64xf32> to vector<16x64xbf16>
    %233 = arith.truncf %220 : vector<64x192xf32> to vector<64x192xbf16>
    %cst_100 = arith.constant dense<0.000000e+00> : vector<16x192xf32>
    %234 = tpu.matmul %232, %233, %cst_100 {dimension_numbers = #tpu.dot_dimension_numbers<[1], [0], [0], [1], [0, 0, 1, 1], [], []>} : vector<16x64xbf16>, vector<64x192xbf16>, vector<16x192xf32> -> vector<16x192xf32>
    %235 = vector.broadcast %221 : vector<1x192xf32> to vector<16x192xf32>
    %236 = arith.addf %234, %235 : vector<16x192xf32>
    %237 = vector.extract_strided_slice %236 {offsets = [0, 0], sizes = [16, 64], strides = [1, 1]} : vector<16x192xf32> to vector<16x64xf32>
    %238 = vector.extract_strided_slice %236 {offsets = [0, 64], sizes = [16, 64], strides = [1, 1]} : vector<16x192xf32> to vector<16x64xf32>
    %239 = vector.extract_strided_slice %236 {offsets = [0, 128], sizes = [16, 64], strides = [1, 1]} : vector<16x192xf32> to vector<16x64xf32>
    %240 = vector.extract_strided_slice %25 {offsets = [0, 0], sizes = [1, 8], strides = [1, 1]} : vector<2x8xf32> to vector<1x8xf32>
    %cst_101 = arith.constant 1.000000e+00 : f32
    %241 = vector.broadcast %cst_101 : f32 to vector<1x8xf32>
    %242 = arith.subf %241, %240 : vector<1x8xf32>
    %cst_102 = arith.constant -1.000000e+09 : f32
    %243 = vector.broadcast %cst_102 : f32 to vector<1x8xf32>
    %244 = arith.mulf %242, %243 : vector<1x8xf32>
    %245 = vector.extract_strided_slice %237 {offsets = [0, 0], sizes = [8, 32], strides = [1, 1]} : vector<16x64xf32> to vector<8x32xf32>
    %246 = vector.extract_strided_slice %238 {offsets = [0, 0], sizes = [8, 32], strides = [1, 1]} : vector<16x64xf32> to vector<8x32xf32>
    %247 = vector.extract_strided_slice %239 {offsets = [0, 0], sizes = [8, 32], strides = [1, 1]} : vector<16x64xf32> to vector<8x32xf32>
    %248 = arith.truncf %245 : vector<8x32xf32> to vector<8x32xbf16>
    %249 = arith.truncf %246 : vector<8x32xf32> to vector<8x32xbf16>
    %cst_103 = arith.constant dense<0.000000e+00> : vector<8x8xf32>
    %250 = tpu.matmul %248, %249, %cst_103 {dimension_numbers = #tpu.dot_dimension_numbers<[1], [1], [0], [0], [0, 0, 1, 0], [], []>} : vector<8x32xbf16>, vector<8x32xbf16>, vector<8x8xf32> -> vector<8x8xf32>
    %cst_104 = arith.constant 0.176776692 : f32
    %251 = vector.broadcast %cst_104 : f32 to vector<8x8xf32>
    %252 = arith.mulf %250, %251 : vector<8x8xf32>
    %253 = vector.broadcast %244 : vector<1x8xf32> to vector<8x8xf32>
    %254 = arith.addf %252, %253 : vector<8x8xf32>
    %cst_105 = arith.constant dense<0xFF800000> : vector<8xf32>
    %255 = vector.multi_reduction <maximumf>, %254, %cst_105 [1] : vector<8x8xf32> to vector<8xf32>
    %256 = vector.shape_cast %255 : vector<8xf32> to vector<8x1xf32>
    %257 = vector.broadcast %256 : vector<8x1xf32> to vector<8x8xf32>
    %258 = arith.subf %254, %257 : vector<8x8xf32>
    %259 = math.exp %258 : vector<8x8xf32>
    %cst_106 = arith.constant dense<0.000000e+00> : vector<8xf32>
    %260 = vector.multi_reduction <add>, %259, %cst_106 [1] : vector<8x8xf32> to vector<8xf32>
    %261 = vector.shape_cast %260 : vector<8xf32> to vector<8x1xf32>
    %262 = tpu.reciprocal %261 {approx = true} : vector<8x1xf32> -> vector<8x1xf32>
    %263 = vector.broadcast %262 : vector<8x1xf32> to vector<8x8xf32>
    %264 = arith.mulf %259, %263 : vector<8x8xf32>
    %265 = arith.truncf %264 : vector<8x8xf32> to vector<8x8xbf16>
    %266 = arith.truncf %247 : vector<8x32xf32> to vector<8x32xbf16>
    %cst_107 = arith.constant dense<0.000000e+00> : vector<8x32xf32>
    %267 = tpu.matmul %265, %266, %cst_107 {dimension_numbers = #tpu.dot_dimension_numbers<[1], [0], [0], [1], [0, 0, 1, 1], [], []>} : vector<8x8xbf16>, vector<8x32xbf16>, vector<8x32xf32> -> vector<8x32xf32>
    %268 = vector.extract_strided_slice %237 {offsets = [0, 32], sizes = [8, 32], strides = [1, 1]} : vector<16x64xf32> to vector<8x32xf32>
    %269 = vector.extract_strided_slice %238 {offsets = [0, 32], sizes = [8, 32], strides = [1, 1]} : vector<16x64xf32> to vector<8x32xf32>
    %270 = vector.extract_strided_slice %239 {offsets = [0, 32], sizes = [8, 32], strides = [1, 1]} : vector<16x64xf32> to vector<8x32xf32>
    %271 = arith.truncf %268 : vector<8x32xf32> to vector<8x32xbf16>
    %272 = arith.truncf %269 : vector<8x32xf32> to vector<8x32xbf16>
    %cst_108 = arith.constant dense<0.000000e+00> : vector<8x8xf32>
    %273 = tpu.matmul %271, %272, %cst_108 {dimension_numbers = #tpu.dot_dimension_numbers<[1], [1], [0], [0], [0, 0, 1, 0], [], []>} : vector<8x32xbf16>, vector<8x32xbf16>, vector<8x8xf32> -> vector<8x8xf32>
    %cst_109 = arith.constant 0.176776692 : f32
    %274 = vector.broadcast %cst_109 : f32 to vector<8x8xf32>
    %275 = arith.mulf %273, %274 : vector<8x8xf32>
    %276 = vector.broadcast %244 : vector<1x8xf32> to vector<8x8xf32>
    %277 = arith.addf %275, %276 : vector<8x8xf32>
    %cst_110 = arith.constant dense<0xFF800000> : vector<8xf32>
    %278 = vector.multi_reduction <maximumf>, %277, %cst_110 [1] : vector<8x8xf32> to vector<8xf32>
    %279 = vector.shape_cast %278 : vector<8xf32> to vector<8x1xf32>
    %280 = vector.broadcast %279 : vector<8x1xf32> to vector<8x8xf32>
    %281 = arith.subf %277, %280 : vector<8x8xf32>
    %282 = math.exp %281 : vector<8x8xf32>
    %cst_111 = arith.constant dense<0.000000e+00> : vector<8xf32>
    %283 = vector.multi_reduction <add>, %282, %cst_111 [1] : vector<8x8xf32> to vector<8xf32>
    %284 = vector.shape_cast %283 : vector<8xf32> to vector<8x1xf32>
    %285 = tpu.reciprocal %284 {approx = true} : vector<8x1xf32> -> vector<8x1xf32>
    %286 = vector.broadcast %285 : vector<8x1xf32> to vector<8x8xf32>
    %287 = arith.mulf %282, %286 : vector<8x8xf32>
    %288 = arith.truncf %287 : vector<8x8xf32> to vector<8x8xbf16>
    %289 = arith.truncf %270 : vector<8x32xf32> to vector<8x32xbf16>
    %cst_112 = arith.constant dense<0.000000e+00> : vector<8x32xf32>
    %290 = tpu.matmul %288, %289, %cst_112 {dimension_numbers = #tpu.dot_dimension_numbers<[1], [0], [0], [1], [0, 0, 1, 1], [], []>} : vector<8x8xbf16>, vector<8x32xbf16>, vector<8x32xf32> -> vector<8x32xf32>
    %291 = tpu.concatenate %267, %290 in 1 : vector<8x32xf32>, vector<8x32xf32> -> vector<8x64xf32>
    %292 = vector.extract_strided_slice %25 {offsets = [1, 0], sizes = [1, 8], strides = [1, 1]} : vector<2x8xf32> to vector<1x8xf32>
    %cst_113 = arith.constant 1.000000e+00 : f32
    %293 = vector.broadcast %cst_113 : f32 to vector<1x8xf32>
    %294 = arith.subf %293, %292 : vector<1x8xf32>
    %cst_114 = arith.constant -1.000000e+09 : f32
    %295 = vector.broadcast %cst_114 : f32 to vector<1x8xf32>
    %296 = arith.mulf %294, %295 : vector<1x8xf32>
    %297 = vector.extract_strided_slice %237 {offsets = [8, 0], sizes = [8, 32], strides = [1, 1]} : vector<16x64xf32> to vector<8x32xf32>
    %298 = vector.extract_strided_slice %238 {offsets = [8, 0], sizes = [8, 32], strides = [1, 1]} : vector<16x64xf32> to vector<8x32xf32>
    %299 = vector.extract_strided_slice %239 {offsets = [8, 0], sizes = [8, 32], strides = [1, 1]} : vector<16x64xf32> to vector<8x32xf32>
    %300 = arith.truncf %297 : vector<8x32xf32> to vector<8x32xbf16>
    %301 = arith.truncf %298 : vector<8x32xf32> to vector<8x32xbf16>
    %cst_115 = arith.constant dense<0.000000e+00> : vector<8x8xf32>
    %302 = tpu.matmul %300, %301, %cst_115 {dimension_numbers = #tpu.dot_dimension_numbers<[1], [1], [0], [0], [0, 0, 1, 0], [], []>} : vector<8x32xbf16>, vector<8x32xbf16>, vector<8x8xf32> -> vector<8x8xf32>
    %cst_116 = arith.constant 0.176776692 : f32
    %303 = vector.broadcast %cst_116 : f32 to vector<8x8xf32>
    %304 = arith.mulf %302, %303 : vector<8x8xf32>
    %305 = vector.broadcast %296 : vector<1x8xf32> to vector<8x8xf32>
    %306 = arith.addf %304, %305 : vector<8x8xf32>
    %cst_117 = arith.constant dense<0xFF800000> : vector<8xf32>
    %307 = vector.multi_reduction <maximumf>, %306, %cst_117 [1] : vector<8x8xf32> to vector<8xf32>
    %308 = vector.shape_cast %307 : vector<8xf32> to vector<8x1xf32>
    %309 = vector.broadcast %308 : vector<8x1xf32> to vector<8x8xf32>
    %310 = arith.subf %306, %309 : vector<8x8xf32>
    %311 = math.exp %310 : vector<8x8xf32>
    %cst_118 = arith.constant dense<0.000000e+00> : vector<8xf32>
    %312 = vector.multi_reduction <add>, %311, %cst_118 [1] : vector<8x8xf32> to vector<8xf32>
    %313 = vector.shape_cast %312 : vector<8xf32> to vector<8x1xf32>
    %314 = tpu.reciprocal %313 {approx = true} : vector<8x1xf32> -> vector<8x1xf32>
    %315 = vector.broadcast %314 : vector<8x1xf32> to vector<8x8xf32>
    %316 = arith.mulf %311, %315 : vector<8x8xf32>
    %317 = arith.truncf %316 : vector<8x8xf32> to vector<8x8xbf16>
    %318 = arith.truncf %299 : vector<8x32xf32> to vector<8x32xbf16>
    %cst_119 = arith.constant dense<0.000000e+00> : vector<8x32xf32>
    %319 = tpu.matmul %317, %318, %cst_119 {dimension_numbers = #tpu.dot_dimension_numbers<[1], [0], [0], [1], [0, 0, 1, 1], [], []>} : vector<8x8xbf16>, vector<8x32xbf16>, vector<8x32xf32> -> vector<8x32xf32>
    %320 = vector.extract_strided_slice %237 {offsets = [8, 32], sizes = [8, 32], strides = [1, 1]} : vector<16x64xf32> to vector<8x32xf32>
    %321 = vector.extract_strided_slice %238 {offsets = [8, 32], sizes = [8, 32], strides = [1, 1]} : vector<16x64xf32> to vector<8x32xf32>
    %322 = vector.extract_strided_slice %239 {offsets = [8, 32], sizes = [8, 32], strides = [1, 1]} : vector<16x64xf32> to vector<8x32xf32>
    %323 = arith.truncf %320 : vector<8x32xf32> to vector<8x32xbf16>
    %324 = arith.truncf %321 : vector<8x32xf32> to vector<8x32xbf16>
    %cst_120 = arith.constant dense<0.000000e+00> : vector<8x8xf32>
    %325 = tpu.matmul %323, %324, %cst_120 {dimension_numbers = #tpu.dot_dimension_numbers<[1], [1], [0], [0], [0, 0, 1, 0], [], []>} : vector<8x32xbf16>, vector<8x32xbf16>, vector<8x8xf32> -> vector<8x8xf32>
    %cst_121 = arith.constant 0.176776692 : f32
    %326 = vector.broadcast %cst_121 : f32 to vector<8x8xf32>
    %327 = arith.mulf %325, %326 : vector<8x8xf32>
    %328 = vector.broadcast %296 : vector<1x8xf32> to vector<8x8xf32>
    %329 = arith.addf %327, %328 : vector<8x8xf32>
    %cst_122 = arith.constant dense<0xFF800000> : vector<8xf32>
    %330 = vector.multi_reduction <maximumf>, %329, %cst_122 [1] : vector<8x8xf32> to vector<8xf32>
    %331 = vector.shape_cast %330 : vector<8xf32> to vector<8x1xf32>
    %332 = vector.broadcast %331 : vector<8x1xf32> to vector<8x8xf32>
    %333 = arith.subf %329, %332 : vector<8x8xf32>
    %334 = math.exp %333 : vector<8x8xf32>
    %cst_123 = arith.constant dense<0.000000e+00> : vector<8xf32>
    %335 = vector.multi_reduction <add>, %334, %cst_123 [1] : vector<8x8xf32> to vector<8xf32>
    %336 = vector.shape_cast %335 : vector<8xf32> to vector<8x1xf32>
    %337 = tpu.reciprocal %336 {approx = true} : vector<8x1xf32> -> vector<8x1xf32>
    %338 = vector.broadcast %337 : vector<8x1xf32> to vector<8x8xf32>
    %339 = arith.mulf %334, %338 : vector<8x8xf32>
    %340 = arith.truncf %339 : vector<8x8xf32> to vector<8x8xbf16>
    %341 = arith.truncf %322 : vector<8x32xf32> to vector<8x32xbf16>
    %cst_124 = arith.constant dense<0.000000e+00> : vector<8x32xf32>
    %342 = tpu.matmul %340, %341, %cst_124 {dimension_numbers = #tpu.dot_dimension_numbers<[1], [0], [0], [1], [0, 0, 1, 1], [], []>} : vector<8x8xbf16>, vector<8x32xbf16>, vector<8x32xf32> -> vector<8x32xf32>
    %343 = tpu.concatenate %319, %342 in 1 : vector<8x32xf32>, vector<8x32xf32> -> vector<8x64xf32>
    %344 = tpu.concatenate %291, %343 in 0 : vector<8x64xf32>, vector<8x64xf32> -> vector<16x64xf32>
    %345 = arith.truncf %344 : vector<16x64xf32> to vector<16x64xbf16>
    %346 = arith.truncf %222 : vector<64x64xf32> to vector<64x64xbf16>
    %cst_125 = arith.constant dense<0.000000e+00> : vector<16x64xf32>
    %347 = tpu.matmul %345, %346, %cst_125 {dimension_numbers = #tpu.dot_dimension_numbers<[1], [0], [0], [1], [0, 0, 1, 1], [], []>} : vector<16x64xbf16>, vector<64x64xbf16>, vector<16x64xf32> -> vector<16x64xf32>
    %348 = vector.broadcast %223 : vector<1x64xf32> to vector<16x64xf32>
    %349 = arith.addf %347, %348 : vector<16x64xf32>
    %350 = arith.addf %219, %349 : vector<16x64xf32>
    %cst_126 = arith.constant dense<0.000000e+00> : vector<16xf32>
    %351 = vector.multi_reduction <add>, %350, %cst_126 [1] : vector<16x64xf32> to vector<16xf32>
    %352 = vector.shape_cast %351 : vector<16xf32> to vector<16x1xf32>
    %cst_127 = arith.constant 6.400000e+01 : f32
    %353 = vector.broadcast %cst_127 : f32 to vector<16x1xf32>
    %354 = arith.divf %352, %353 : vector<16x1xf32>
    %355 = vector.broadcast %354 : vector<16x1xf32> to vector<16x64xf32>
    %356 = arith.subf %350, %355 : vector<16x64xf32>
    %357 = arith.mulf %356, %356 : vector<16x64xf32>
    %cst_128 = arith.constant dense<0.000000e+00> : vector<16xf32>
    %358 = vector.multi_reduction <add>, %357, %cst_128 [1] : vector<16x64xf32> to vector<16xf32>
    %359 = vector.shape_cast %358 : vector<16xf32> to vector<16x1xf32>
    %cst_129 = arith.constant 6.400000e+01 : f32
    %360 = vector.broadcast %cst_129 : f32 to vector<16x1xf32>
    %361 = arith.divf %359, %360 : vector<16x1xf32>
    %362 = vector.broadcast %354 : vector<16x1xf32> to vector<16x64xf32>
    %363 = arith.subf %350, %362 : vector<16x64xf32>
    %cst_130 = arith.constant 9.99999996E-13 : f32
    %364 = vector.broadcast %cst_130 : f32 to vector<16x1xf32>
    %365 = arith.addf %361, %364 : vector<16x1xf32>
    %366 = math.rsqrt %365 : vector<16x1xf32>
    %367 = vector.broadcast %366 : vector<16x1xf32> to vector<16x64xf32>
    %368 = arith.mulf %363, %367 : vector<16x64xf32>
    %369 = vector.broadcast %224 : vector<1x64xf32> to vector<16x64xf32>
    %370 = arith.mulf %368, %369 : vector<16x64xf32>
    %371 = vector.broadcast %225 : vector<1x64xf32> to vector<16x64xf32>
    %372 = arith.addf %370, %371 : vector<16x64xf32>
    %373 = arith.truncf %372 : vector<16x64xf32> to vector<16x64xbf16>
    %374 = arith.truncf %226 : vector<64x256xf32> to vector<64x256xbf16>
    %cst_131 = arith.constant dense<0.000000e+00> : vector<16x256xf32>
    %375 = tpu.matmul %373, %374, %cst_131 {dimension_numbers = #tpu.dot_dimension_numbers<[1], [0], [0], [1], [0, 0, 1, 1], [], []>} : vector<16x64xbf16>, vector<64x256xbf16>, vector<16x256xf32> -> vector<16x256xf32>
    %376 = vector.broadcast %227 : vector<1x256xf32> to vector<16x256xf32>
    %377 = arith.addf %375, %376 : vector<16x256xf32>
    %cst_132 = arith.constant 5.000000e-01 : f32
    %378 = vector.broadcast %cst_132 : f32 to vector<16x256xf32>
    %379 = arith.mulf %378, %377 : vector<16x256xf32>
    %cst_133 = arith.constant 1.41421354 : f32
    %380 = vector.broadcast %cst_133 : f32 to vector<16x256xf32>
    %381 = arith.divf %377, %380 : vector<16x256xf32>
    %382 = math.erf %381 : vector<16x256xf32>
    %cst_134 = arith.constant 1.000000e+00 : f32
    %383 = vector.broadcast %cst_134 : f32 to vector<16x256xf32>
    %384 = arith.addf %383, %382 : vector<16x256xf32>
    %385 = arith.mulf %379, %384 : vector<16x256xf32>
    %386 = arith.truncf %385 : vector<16x256xf32> to vector<16x256xbf16>
    %387 = arith.truncf %228 : vector<256x64xf32> to vector<256x64xbf16>
    %cst_135 = arith.constant dense<0.000000e+00> : vector<16x64xf32>
    %388 = tpu.matmul %386, %387, %cst_135 {dimension_numbers = #tpu.dot_dimension_numbers<[1], [0], [0], [1], [0, 0, 1, 1], [], []>} : vector<16x256xbf16>, vector<256x64xbf16>, vector<16x64xf32> -> vector<16x64xf32>
    %389 = vector.broadcast %229 : vector<1x64xf32> to vector<16x64xf32>
    %390 = arith.addf %388, %389 : vector<16x64xf32>
    %391 = arith.addf %372, %390 : vector<16x64xf32>
    %cst_136 = arith.constant dense<0.000000e+00> : vector<16xf32>
    %392 = vector.multi_reduction <add>, %391, %cst_136 [1] : vector<16x64xf32> to vector<16xf32>
    %393 = vector.shape_cast %392 : vector<16xf32> to vector<16x1xf32>
    %cst_137 = arith.constant 6.400000e+01 : f32
    %394 = vector.broadcast %cst_137 : f32 to vector<16x1xf32>
    %395 = arith.divf %393, %394 : vector<16x1xf32>
    %396 = vector.broadcast %395 : vector<16x1xf32> to vector<16x64xf32>
    %397 = arith.subf %391, %396 : vector<16x64xf32>
    %398 = arith.mulf %397, %397 : vector<16x64xf32>
    %cst_138 = arith.constant dense<0.000000e+00> : vector<16xf32>
    %399 = vector.multi_reduction <add>, %398, %cst_138 [1] : vector<16x64xf32> to vector<16xf32>
    %400 = vector.shape_cast %399 : vector<16xf32> to vector<16x1xf32>
    %cst_139 = arith.constant 6.400000e+01 : f32
    %401 = vector.broadcast %cst_139 : f32 to vector<16x1xf32>
    %402 = arith.divf %400, %401 : vector<16x1xf32>
    %403 = vector.broadcast %395 : vector<16x1xf32> to vector<16x64xf32>
    %404 = arith.subf %391, %403 : vector<16x64xf32>
    %cst_140 = arith.constant 9.99999996E-13 : f32
    %405 = vector.broadcast %cst_140 : f32 to vector<16x1xf32>
    %406 = arith.addf %402, %405 : vector<16x1xf32>
    %407 = math.rsqrt %406 : vector<16x1xf32>
    %408 = vector.broadcast %407 : vector<16x1xf32> to vector<16x64xf32>
    %409 = arith.mulf %404, %408 : vector<16x64xf32>
    %410 = vector.broadcast %230 : vector<1x64xf32> to vector<16x64xf32>
    %411 = arith.mulf %409, %410 : vector<16x64xf32>
    %412 = vector.broadcast %231 : vector<1x64xf32> to vector<16x64xf32>
    %413 = arith.addf %411, %412 : vector<16x64xf32>
    %c0_141 = arith.constant 0 : index
    %c0_142 = arith.constant 0 : index
    %414 = vector.load %arg28[%c0_141, %c0_142] : memref<64x64xf32, #tpu.memory_space<vmem>>, vector<64x64xf32>
    %c0_143 = arith.constant 0 : index
    %c0_144 = arith.constant 0 : index
    %415 = vector.load %arg29[%c0_143, %c0_144] : memref<1x64xf32, #tpu.memory_space<vmem>>, vector<1x64xf32>
    %416 = vector.extract_strided_slice %413 {offsets = [0, 0], sizes = [1, 64], strides = [1, 1]} : vector<16x64xf32> to vector<1x64xf32>
    %417 = vector.extract_strided_slice %413 {offsets = [8, 0], sizes = [1, 64], strides = [1, 1]} : vector<16x64xf32> to vector<1x64xf32>
    %418 = tpu.concatenate %416, %417 in 0 : vector<1x64xf32>, vector<1x64xf32> -> vector<2x64xf32>
    %419 = arith.truncf %418 : vector<2x64xf32> to vector<2x64xbf16>
    %420 = arith.truncf %414 : vector<64x64xf32> to vector<64x64xbf16>
    %cst_145 = arith.constant dense<0.000000e+00> : vector<2x64xf32>
    %421 = tpu.matmul %419, %420, %cst_145 {dimension_numbers = #tpu.dot_dimension_numbers<[1], [0], [0], [1], [0, 0, 1, 1], [], []>} : vector<2x64xbf16>, vector<64x64xbf16>, vector<2x64xf32> -> vector<2x64xf32>
    %422 = vector.broadcast %415 : vector<1x64xf32> to vector<2x64xf32>
    %423 = arith.addf %421, %422 : vector<2x64xf32>
    %424 = math.tanh %423 : vector<2x64xf32>
    %c0_146 = arith.constant 0 : index
    %c0_147 = arith.constant 0 : index
    %425 = vector.load %arg30[%c0_146, %c0_147] : memref<64x32xf32, #tpu.memory_space<vmem>>, vector<64x32xf32>
    %c0_148 = arith.constant 0 : index
    %c0_149 = arith.constant 0 : index
    %426 = vector.load %arg31[%c0_148, %c0_149] : memref<1x32xf32, #tpu.memory_space<vmem>>, vector<1x32xf32>
    %427 = arith.truncf %424 : vector<2x64xf32> to vector<2x64xbf16>
    %428 = arith.truncf %425 : vector<64x32xf32> to vector<64x32xbf16>
    %cst_150 = arith.constant dense<0.000000e+00> : vector<2x32xf32>
    %429 = tpu.matmul %427, %428, %cst_150 {dimension_numbers = #tpu.dot_dimension_numbers<[1], [0], [0], [1], [0, 0, 1, 1], [], []>} : vector<2x64xbf16>, vector<64x32xbf16>, vector<2x32xf32> -> vector<2x32xf32>
    %430 = vector.broadcast %426 : vector<1x32xf32> to vector<2x32xf32>
    %431 = arith.addf %429, %430 : vector<2x32xf32>
    %cst_151 = arith.constant 5.000000e-01 : f32
    %432 = vector.broadcast %cst_151 : f32 to vector<2x32xf32>
    %433 = arith.mulf %432, %431 : vector<2x32xf32>
    %cst_152 = arith.constant 1.41421354 : f32
    %434 = vector.broadcast %cst_152 : f32 to vector<2x32xf32>
    %435 = arith.divf %431, %434 : vector<2x32xf32>
    %436 = math.erf %435 : vector<2x32xf32>
    %cst_153 = arith.constant 1.000000e+00 : f32
    %437 = vector.broadcast %cst_153 : f32 to vector<2x32xf32>
    %438 = arith.addf %437, %436 : vector<2x32xf32>
    %439 = arith.mulf %433, %438 : vector<2x32xf32>
    %c0_154 = arith.constant 0 : index
    %c0_155 = arith.constant 0 : index
    %440 = vector.load %arg32[%c0_154, %c0_155] : memref<32x16xf32, #tpu.memory_space<vmem>>, vector<32x16xf32>
    %c0_156 = arith.constant 0 : index
    %c0_157 = arith.constant 0 : index
    %441 = vector.load %arg33[%c0_156, %c0_157] : memref<1x16xf32, #tpu.memory_space<vmem>>, vector<1x16xf32>
    %442 = arith.truncf %439 : vector<2x32xf32> to vector<2x32xbf16>
    %443 = arith.truncf %440 : vector<32x16xf32> to vector<32x16xbf16>
    %cst_158 = arith.constant dense<0.000000e+00> : vector<2x16xf32>
    %444 = tpu.matmul %442, %443, %cst_158 {dimension_numbers = #tpu.dot_dimension_numbers<[1], [0], [0], [1], [0, 0, 1, 1], [], []>} : vector<2x32xbf16>, vector<32x16xbf16>, vector<2x16xf32> -> vector<2x16xf32>
    %445 = vector.broadcast %441 : vector<1x16xf32> to vector<2x16xf32>
    %446 = arith.addf %444, %445 : vector<2x16xf32>
    %cst_159 = arith.constant 5.000000e-01 : f32
    %447 = vector.broadcast %cst_159 : f32 to vector<2x16xf32>
    %448 = arith.mulf %447, %446 : vector<2x16xf32>
    %cst_160 = arith.constant 1.41421354 : f32
    %449 = vector.broadcast %cst_160 : f32 to vector<2x16xf32>
    %450 = arith.divf %446, %449 : vector<2x16xf32>
    %451 = math.erf %450 : vector<2x16xf32>
    %cst_161 = arith.constant 1.000000e+00 : f32
    %452 = vector.broadcast %cst_161 : f32 to vector<2x16xf32>
    %453 = arith.addf %452, %451 : vector<2x16xf32>
    %454 = arith.mulf %448, %453 : vector<2x16xf32>
    %c0_162 = arith.constant 0 : index
    %c0_163 = arith.constant 0 : index
    %455 = vector.load %arg34[%c0_162, %c0_163] : memref<16x8xf32, #tpu.memory_space<vmem>>, vector<16x8xf32>
    %c0_164 = arith.constant 0 : index
    %c0_165 = arith.constant 0 : index
    %456 = vector.load %arg35[%c0_164, %c0_165] : memref<1x8xf32, #tpu.memory_space<vmem>>, vector<1x8xf32>
    %457 = arith.truncf %454 : vector<2x16xf32> to vector<2x16xbf16>
    %458 = arith.truncf %455 : vector<16x8xf32> to vector<16x8xbf16>
    %cst_166 = arith.constant dense<0.000000e+00> : vector<2x8xf32>
    %459 = tpu.matmul %457, %458, %cst_166 {dimension_numbers = #tpu.dot_dimension_numbers<[1], [0], [0], [1], [0, 0, 1, 1], [], []>} : vector<2x16xbf16>, vector<16x8xbf16>, vector<2x8xf32> -> vector<2x8xf32>
    %460 = vector.broadcast %456 : vector<1x8xf32> to vector<2x8xf32>
    %461 = arith.addf %459, %460 : vector<2x8xf32>
    %cst_167 = arith.constant 5.000000e-01 : f32
    %462 = vector.broadcast %cst_167 : f32 to vector<2x8xf32>
    %463 = arith.mulf %462, %461 : vector<2x8xf32>
    %cst_168 = arith.constant 1.41421354 : f32
    %464 = vector.broadcast %cst_168 : f32 to vector<2x8xf32>
    %465 = arith.divf %461, %464 : vector<2x8xf32>
    %466 = math.erf %465 : vector<2x8xf32>
    %cst_169 = arith.constant 1.000000e+00 : f32
    %467 = vector.broadcast %cst_169 : f32 to vector<2x8xf32>
    %468 = arith.addf %467, %466 : vector<2x8xf32>
    %469 = arith.mulf %463, %468 : vector<2x8xf32>
    %c0_170 = arith.constant 0 : index
    %c0_171 = arith.constant 0 : index
    %470 = vector.load %arg36[%c0_170, %c0_171] : memref<8x4xf32, #tpu.memory_space<vmem>>, vector<8x4xf32>
    %c0_172 = arith.constant 0 : index
    %c0_173 = arith.constant 0 : index
    %471 = vector.load %arg37[%c0_172, %c0_173] : memref<1x4xf32, #tpu.memory_space<vmem>>, vector<1x4xf32>
    %472 = arith.truncf %469 : vector<2x8xf32> to vector<2x8xbf16>
    %473 = arith.truncf %470 : vector<8x4xf32> to vector<8x4xbf16>
    %cst_174 = arith.constant dense<0.000000e+00> : vector<2x4xf32>
    %474 = tpu.matmul %472, %473, %cst_174 {dimension_numbers = #tpu.dot_dimension_numbers<[1], [0], [0], [1], [0, 0, 1, 1], [], []>} : vector<2x8xbf16>, vector<8x4xbf16>, vector<2x4xf32> -> vector<2x4xf32>
    %475 = vector.broadcast %471 : vector<1x4xf32> to vector<2x4xf32>
    %476 = arith.addf %474, %475 : vector<2x4xf32>
    %cst_175 = arith.constant 5.000000e-01 : f32
    %477 = vector.broadcast %cst_175 : f32 to vector<2x4xf32>
    %478 = arith.mulf %477, %476 : vector<2x4xf32>
    %cst_176 = arith.constant 1.41421354 : f32
    %479 = vector.broadcast %cst_176 : f32 to vector<2x4xf32>
    %480 = arith.divf %476, %479 : vector<2x4xf32>
    %481 = math.erf %480 : vector<2x4xf32>
    %cst_177 = arith.constant 1.000000e+00 : f32
    %482 = vector.broadcast %cst_177 : f32 to vector<2x4xf32>
    %483 = arith.addf %482, %481 : vector<2x4xf32>
    %484 = arith.mulf %478, %483 : vector<2x4xf32>
    %c0_178 = arith.constant 0 : index
    %c0_179 = arith.constant 0 : index
    %485 = vector.load %arg38[%c0_178, %c0_179] : memref<4x4xf32, #tpu.memory_space<vmem>>, vector<4x4xf32>
    %c0_180 = arith.constant 0 : index
    %c0_181 = arith.constant 0 : index
    %486 = vector.load %arg39[%c0_180, %c0_181] : memref<1x4xf32, #tpu.memory_space<vmem>>, vector<1x4xf32>
    %487 = arith.truncf %484 : vector<2x4xf32> to vector<2x4xbf16>
    %488 = arith.truncf %485 : vector<4x4xf32> to vector<4x4xbf16>
    %cst_182 = arith.constant dense<0.000000e+00> : vector<2x4xf32>
    %489 = tpu.matmul %487, %488, %cst_182 {dimension_numbers = #tpu.dot_dimension_numbers<[1], [0], [0], [1], [0, 0, 1, 1], [], []>} : vector<2x4xbf16>, vector<4x4xbf16>, vector<2x4xf32> -> vector<2x4xf32>
    %490 = vector.broadcast %486 : vector<1x4xf32> to vector<2x4xf32>
    %491 = arith.addf %489, %490 : vector<2x4xf32>
    %cst_183 = arith.constant dense<0xFF800000> : vector<2xf32>
    %492 = vector.multi_reduction <maximumf>, %491, %cst_183 [1] : vector<2x4xf32> to vector<2xf32>
    %493 = vector.shape_cast %492 : vector<2xf32> to vector<2x1xf32>
    %494 = vector.broadcast %493 : vector<2x1xf32> to vector<2x4xf32>
    %495 = arith.subf %491, %494 : vector<2x4xf32>
    %496 = math.exp %495 : vector<2x4xf32>
    %cst_184 = arith.constant dense<0.000000e+00> : vector<2xf32>
    %497 = vector.multi_reduction <add>, %496, %cst_184 [1] : vector<2x4xf32> to vector<2xf32>
    %498 = vector.shape_cast %497 : vector<2xf32> to vector<2x1xf32>
    %499 = tpu.reciprocal %498 : vector<2x1xf32> -> vector<2x1xf32>
    %500 = vector.broadcast %499 : vector<2x1xf32> to vector<2x4xf32>
    %501 = arith.mulf %496, %500 : vector<2x4xf32>
    %c0_185 = arith.constant 0 : index
    %c0_186 = arith.constant 0 : index
    %502 = vector.load %arg40[%c0_185, %c0_186] : memref<2x4xf32, #tpu.memory_space<vmem>>, vector<2x4xf32>
    tpu.vector_store %arg40[%c0_185, %c0_186], %501 {strides = array<i32>} : memref<2x4xf32, #tpu.memory_space<vmem>>, vector<2x4xf32>,
    return
  }
}

</mosaic_0001>

<bundles_post_ra>
// kernel: vit_bert_classifier_forward.1
= control target key start
LH: loop header
LB: loop body
LE: loop exit
PB: predicated region body
PF: predicated region fallthrough
CT: control target
= control target key end

     0   :  { %s2465_s6 = smov 1   ;;  %s2466_s10 = smov 2   ;;  %s3433_s0 = inlined_call_operand.smem [shape: u32[41], index: -1, kind: input, shape index: {}] }
   0x1   :  { %s2519_s5 = sld [smem:[%s3433_s0]]   ;;  %s2467_s14 = smov 3  }
   0x2   :  { %s2524_s9 = sld [smem:[%s3433_s0 + %s2465_s6]]   ;;  %s2468_s18 = smov 4  }
   0x3   :  { %s2529_s13 = sld [smem:[%s3433_s0 + %s2466_s10]]   ;;  %s2469_s22 = smov 5  }
   0x4   :  { %s2534_s17 = sld [smem:[%s3433_s0 + %s2467_s14]]   ;;  %s2470_s26 = smov 6  }
   0x5   :  { %s2539_s21 = sld [smem:[%s3433_s0 + %s2468_s18]]   ;;  %s2471_s30 = smov 7  }
   0x6   :  { %s2544_s25 = sld [smem:[%s3433_s0 + %s2469_s22]]   ;;  %s2472_s4 = smov 8  }
   0x7   :  { %s2549_s29 = sld [smem:[%s3433_s0 + %s2470_s26]]   ;;  %s2473_s10 = smov 9  }
   0x8   :  { %s2554_s3 = sld [smem:[%s3433_s0 + %s2471_s30]]   ;;  %s2474_s15 = smov 10  }
   0x9   :  { %s2559_s8 = sld [smem:[%s3433_s0 + %s2472_s4]]   ;;  %s2475_s20 = smov 11  }
   0xa   :  { %s2564_s14 = sld [smem:[%s3433_s0 + %s2473_s10]]   ;;  %s2476_s26 = smov 12  }
   0xb   :  { %s2569_s19 = sld [smem:[%s3433_s0 + %s2474_s15]]   ;;  %s2477_s1 = smov 13  }
   0xc   :  { %s2574_s24 = sld [smem:[%s3433_s0 + %s2475_s20]]   ;;  %s2478_s7 = smov 14  }
   0xd   :  { %s2579_s30 = sld [smem:[%s3433_s0 + %s2476_s26]]   ;;  %s2479_s15 = smov 15  }
   0xe   :  { %s2584_s6 = sld [smem:[%s3433_s0 + %s2477_s1]]   ;;  %s2480_s22 = smov 16  }
   0xf   :  { %s2589_s12 = sld [smem:[%s3433_s0 + %s2478_s7]]   ;;  %s2481_s28 = smov 17  }
  0x10   :  { %s2594_s20 = sld [smem:[%s3433_s0 + %s2479_s15]]   ;;  %s2482_s7 = smov 18  }
  0x11   :  { %s2599_s27 = sld [smem:[%s3433_s0 + %s2480_s22]]   ;;  %s2483_s15 = smov 19  }
  0x12   :  { %s2604_s4 = sld [smem:[%s3433_s0 + %s2481_s28]]   ;;  %s2484_s22 = smov 20  }
  0x13   :  { %s2485_s28 = smov 21  }
  0x15   :  { %3442 = sst [smem:[#allocation5_spill]] %s2589_s12 }
  0x16   :  { %3443 = sst [smem:[#allocation6_spill]] %s2594_s20 }
  0x17   :  { %3444 = sst [smem:[#allocation7_spill]] %s2599_s27 }
  0x18   :  { %3445 = sst [smem:[#allocation8_spill]] %s2604_s4 }
  0x19   :  { %s2609_s12 = sld [smem:[%s3433_s0 + %s2482_s7]]   ;;  %s2486_s7 = smov 22  }
  0x1a   :  { %s2614_s20 = sld [smem:[%s3433_s0 + %s2483_s15]]   ;;  %s2487_s15 = smov 23  }
  0x1b   :  { %s2619_s27 = sld [smem:[%s3433_s0 + %s2484_s22]]   ;;  %s2488_s22 = smov 24  }
  0x1c   :  { %s2624_s4 = sld [smem:[%s3433_s0 + %s2485_s28]]   ;;  %s2489_s28 = smov 25  }
  0x1f   :  { %3446 = sst [smem:[#allocation9_spill]] %s2609_s12 }
  0x20   :  { %3447 = sst [smem:[#allocation10_spill]] %s2614_s20 }
  0x21   :  { %3448 = sst [smem:[#allocation11_spill]] %s2619_s27 }
  0x22   :  { %3449 = sst [smem:[#allocation12_spill]] %s2624_s4 }
  0x23   :  { %s2629_s12 = sld [smem:[%s3433_s0 + %s2486_s7]]   ;;  %s2490_s7 = smov 26  }
  0x24   :  { %s2634_s20 = sld [smem:[%s3433_s0 + %s2487_s15]]   ;;  %s2491_s15 = smov 27  }
  0x25   :  { %s2639_s27 = sld [smem:[%s3433_s0 + %s2488_s22]]   ;;  %s2492_s22 = smov 28  }
  0x26   :  { %s2644_s4 = sld [smem:[%s3433_s0 + %s2489_s28]]   ;;  %s2493_s28 = smov 29  }
  0x29   :  { %3450 = sst [smem:[#allocation13_spill]] %s2629_s12 }
  0x2a   :  { %3451 = sst [smem:[#allocation14_spill]] %s2634_s20 }
  0x2b   :  { %3452 = sst [smem:[#allocation15_spill]] %s2639_s27 }
  0x2c   :  { %3453 = sst [smem:[#allocation16_spill]] %s2644_s4 }
  0x2d   :  { %s2649_s12 = sld [smem:[%s3433_s0 + %s2490_s7]]   ;;  %s2494_s7 = smov 30  }
  0x2e   :  { %s2654_s20 = sld [smem:[%s3433_s0 + %s2491_s15]]   ;;  %s2495_s15 = smov 31  }
  0x2f   :  { %s2659_s27 = sld [smem:[%s3433_s0 + %s2492_s22]]   ;;  %s2496_s22 = smov 32  }
  0x30   :  { %s2664_s4 = sld [smem:[%s3433_s0 + %s2493_s28]]   ;;  %s2497_s28 = smov 33  }
  0x33   :  { %3454 = sst [smem:[#allocation17_spill]] %s2649_s12 }
  0x34   :  { %3455 = sst [smem:[#allocation18_spill]] %s2654_s20 }
  0x35   :  { %3456 = sst [smem:[#allocation19_spill]] %s2659_s27 }
  0x36   :  { %3457 = sst [smem:[#allocation20_spill]] %s2664_s4 }
  0x37   :  { %s2669_s12 = sld [smem:[%s3433_s0 + %s2494_s7]]   ;;  %s2498_s7 = smov 34  }
  0x38   :  { %s2674_s20 = sld [smem:[%s3433_s0 + %s2495_s15]]   ;;  %s2499_s15 = smov 35  }
  0x39   :  { %s2679_s27 = sld [smem:[%s3433_s0 + %s2496_s22]]   ;;  %s2500_s22 = smov 36  }
  0x3a   :  { %s2684_s4 = sld [smem:[%s3433_s0 + %s2497_s28]]   ;;  %s2501_s28 = smov 37  }
  0x3d   :  { %3458 = sst [smem:[#allocation21_spill]] %s2669_s12 }
  0x3e   :  { %3459 = sst [smem:[#allocation22_spill]] %s2674_s20 }
  0x3f   :  { %3460 = sst [smem:[#allocation23_spill]] %s2679_s27 }
  0x40   :  { %3461 = sst [smem:[#allocation24_spill]] %s2684_s4 }
  0x41   :  { %s2689_s12 = sld [smem:[%s3433_s0 + %s2498_s7]]   ;;  %s2502_s7 = smov 38  }
  0x42   :  { %s2694_s20 = sld [smem:[%s3433_s0 + %s2499_s15]]   ;;  %s2503_s15 = smov 39  }
  0x43   :  { %s2699_s27 = sld [smem:[%s3433_s0 + %s2500_s22]]   ;;  %s2504_s22 = smov 40  }
  0x44   :  { %s2704_s4 = sld [smem:[%s3433_s0 + %s2501_s28]]  }
  0x47   :  { %3462 = sst [smem:[#allocation25_spill]] %s2689_s12 }
  0x48   :  { %3463 = sst [smem:[#allocation26_spill]] %s2694_s20 }
  0x49   :  { %3464 = sst [smem:[#allocation27_spill]] %s2699_s27 }
  0x4a   :  { %s2709_s12 = sld [smem:[%s3433_s0 + %s2502_s7]]  }
  0x4b   :  { %s2714_s20 = sld [smem:[%s3433_s0 + %s2503_s15]]  }
  0x4c   :  { %s2719_s27 = sld [smem:[%s3433_s0 + %s2504_s22]]  }
  0x4d   :  { %v168_v0 = vld [vmem:[%s2519_s5] sm:$0xff]  ;;  %vm172_vm0 = vcmask 523264   ;;  %v169_v1 = vld [vmem:[%s2519_s5 + $0x8] sm:$0xff] }
  0x4e   :  { %v173_v2 = vsel %vm172_vm0, %v168_v0, 0.0  ;;  %v176_v3 = vsel %vm172_vm0, %v169_v1, 0.0 }
  0x4f   :  { %174 = vadd.xlane.f32.xlu0 %v173_v2 }
  0x50   :  { %86 = vsyncpa [#allocation3], 0  ;;  %v2505_v4 = vmov 64.0   ;;  %v247_v21 = vld [vmem:[%s2539_s21 + $0x60] sm:$0xff]  ;;  %v249_v22 = vld [vmem:[%s2539_s21 + $0x70] sm:$0xff]  ;;  %vm406_vm8 = vcmask 1043456  }
  0x51   :  { %2353 = vrcp.f32 %v2505_v4  ;;  %v248_v23 = vld [vmem:[%s2539_s21 + $0x68] sm:$0xff]  ;;  %v322_v24 = vpack.c.bf16 %v249_v22, %v247_v21  ;;  %v250_v25 = vld [vmem:[%s2539_s21 + $0x78] sm:$0xff]  ;;  %v243_v27 = vld [vmem:[%s2539_s21 + $0x40] sm:$0xff]  ;;  %s2506_s0 = smov 32   ;;  %s2507_s5 = smov 64   ;;  %vm366_vm9 = vcmask 261120  }
  0x52   :  { %v323_v26 = vpack.c.bf16 %v250_v25, %v248_v23  ;;  %v245_v28 = vld [vmem:[%s2539_s21 + $0x50] sm:$0xff]  ;;  %v244_v29 = vld [vmem:[%s2539_s21 + $0x48] sm:$0xff]  ;;  %v246_v31 = vld [vmem:[%s2539_s21 + $0x58] sm:$0xff]  ;;  %vm389_vm10 = vcmask 64512   ;;  %s3485_s28 = sld [smem:[#allocation19_spill]] }
  0x53   :  { %336 = vmatpush.bf16.msra.mxu0 %v322_v24  ;;  %v320_v30 = vpack.c.bf16 %v245_v28, %v243_v27  ;;  %v321_v32 = vpack.c.bf16 %v246_v31, %v244_v29  ;;  %v239_v33 = vld [vmem:[%s2539_s21 + $0x20] sm:$0xff]  ;;  %v241_v34 = vld [vmem:[%s2539_s21 + $0x30] sm:$0xff]  ;;  %v240_v35 = vld [vmem:[%s2539_s21 + $0x28] sm:$0xff]  ;;  %s3486_s1 = sld [smem:[#allocation21_spill]] }
  0x54   :  { %350 = vmatpush.bf16.msra.mxu1 %v323_v26  ;;  %v318_v36 = vpack.c.bf16 %v241_v34, %v239_v33  ;;  %v242_v37 = vld [vmem:[%s2539_s21 + $0x38] sm:$0xff]  ;;  %v235_v39 = vld [vmem:[%s2539_s21] sm:$0xff]  ;;  %v237_v40 = vld [vmem:[%s2539_s21 + $0x10] sm:$0xff]  ;;  %s3487_s2 = sld [smem:[#allocation17_spill]] }
  0x55   :  { %v319_v38 = vpack.c.bf16 %v242_v37, %v240_v35  ;;  %v236_v41 = vld [vmem:[%s2539_s21 + $0x8] sm:$0xff]  ;;  %v316_v43 = vpack.c.bf16 %v237_v40, %v235_v39  ;;  %v238_v44 = vld [vmem:[%s2539_s21 + $0x18] sm:$0xff]  ;;  %v234_v35 = vld [vmem:[%s2524_s9] sm:$0x3]  ;;  %s2508_s9 = smov 96   ;;  %s3471_s21 = sld [smem:[#allocation6_spill]] }
  0x56   :  { %v317_v46 = vpack.c.bf16 %v238_v44, %v236_v41  ;;  %s3488_s7 = sld [smem:[#allocation18_spill]] }
  0x57   :  { %177 = vadd.xlane.f32.xlu0 %v176_v3  ;;  %v2354_v5 = vpop.eup %2353  ;;  %337 = vmatpush.bf16.msra.mxu0 %v320_v30  ;;  %s3489_s10 = sld [smem:[#allocation20_spill]] }
  0x58   :  { %v180_v6 = vmul.f32 64.0, %v2354_v5  ;;  %vm184_vm1 = vweird.f32 %v2354_v5  ;;  %351 = vmatpush.bf16.msra.mxu1 %v321_v32  ;;  %s3490_s11 = sld [smem:[#allocation22_spill]] }
  0x59   :  { %s3491_s15 = sld [smem:[#allocation23_spill]] }
  0x5a   :  { %v181_v7 = vsub.f32 1.0, %v180_v6  ;;  %s3492_s16 = sld [smem:[#allocation24_spill]] }
  0x5b   :  { %338 = vmatpush.bf16.msra.mxu0 %v318_v36  ;;  %v360_v36 = vsub.f32 1.0, %v234_v35  ;;  %s3493_s18 = sld [smem:[#allocation25_spill]] }
  0x5c   :  { %v182_v8 = vmul.f32 %v2354_v5, %v181_v7  ;;  %352 = vmatpush.bf16.msra.mxu1 %v319_v38  ;;  %s3494_s22 = sld [smem:[#allocation26_spill]] }
  0x5d   :  { %v361_v37 = vmul.f32 -1e+09, %v360_v36  ;;  %s3495_s23 = sld [smem:[#allocation27_spill]] }
  0x5e   :  { %v183_v9 = vadd.f32 %v2354_v5, %v182_v8 }
  0x5f   :  { %339 = vmatpush.bf16.msra.mxu0 %v316_v43  ;;  %v2788_v38 = vperm.slane %v361_v37, 0 }
  0x60   :  { %v2725_v10 = vsel %vm184_vm1, %v2354_v5, %v183_v9  ;;  %353 = vmatpush.bf16.msra.mxu1 %v317_v46  ;;  %v2334_v5 = vld [vmem:[%s2534_s17] ss:$0 sm:$0xff]  ;;  %s3470_s17 = sld [smem:[#allocation5_spill]] }
  0xc2   :  { %v175_v11 = vpop.xlane.xlu0 %174 }
  0xc3   :  { %v186_v12 = vmul.f32 %v2725_v10, %v175_v11  ;;  %v251_v11 = vld [vmem:[%s2544_s25] sm:$0x3]  ;;  %s3472_s25 = sld [smem:[#allocation8_spill]] }
  0xc5   :  { %v2728_v13 = vsub.f32 %v168_v0, %v186_v12  ;;  %v2333_v0 = vld [vmem:[%s2529_s13] ss:$0 sm:$0xff]  ;;  %v325_v12 = vperm.slane %v251_v11, 0  ;;  %s3469_s13 = sld [smem:[#allocation7_spill]] }
  0xc7   :  { %v190_v14 = vmul.f32 %v2728_v13, %v2728_v13 }
  0xc9   :  { %v192_v15 = vsel %vm172_vm0, %v190_v14, 0.0 }
  0xca   :  { %193 = vadd.xlane.f32.xlu1 %v192_v15  ;;  %v178_v16 = vpop.xlane.xlu0 %177 }
  0xcb   :  { %v187_v17 = vmul.f32 %v2725_v10, %v178_v16 }
  0xcd   :  { %v2734_v18 = vsub.f32 %v169_v1, %v187_v17 }
  0xcf   :  { %v191_v19 = vmul.f32 %v2734_v18, %v2734_v18 }
  0xd1   :  { %v195_v20 = vsel %vm172_vm0, %v191_v19, 0.0 }
  0xd2   :  { %196 = vadd.xlane.f32.xlu1 %v195_v20 }
 0x13d   :  { %v194_v42 = vpop.xlane.xlu1 %193 }
 0x13e   :  { %v198_v45 = vmul.f32 %v194_v42, %v2725_v10 }
 0x140   :  { %v200_v47 = vadd.f32 1e-12, %v198_v45 }
 0x142   :  { %2355 = vrsqrt.f32 %v200_v47  ;;  %vm208_vm3 = vweird.f32 %v200_v47 }
 0x145   :  { %v197_v48 = vpop.xlane.xlu1 %196 }
 0x146   :  { %v199_v49 = vmul.f32 %v197_v48, %v2725_v10 }
 0x148   :  { %v2356_v50 = vpop.eup %2355  ;;  %v201_v51 = vadd.f32 1e-12, %v199_v49 }
 0x149   :  { %v203_v52 = vmul.f32 %v2356_v50, %v200_v47  ;;  %vm209_vm2 = vweird.f32 %v2356_v50 }
 0x14a   :  { %2357 = vrsqrt.f32 %v201_v51  ;;  %vm210_vm4 = vmor %vm208_vm3, %vm209_vm2  ;;  %vm218_vm6 = vweird.f32 %v201_v51 }
 0x14b   :  { %v204_v53 = vmul.f32 %v2356_v50, %v203_v52 }
 0x14d   :  { %v205_v54 = vmul.f32 0.5, %v204_v53 }
 0x14f   :  { %v206_v55 = vsub.f32 1.5, %v205_v54 }
 0x150   :  { %v2358_v56 = vpop.eup %2357 }
 0x151   :  { %v207_v57 = vmul.f32 %v2356_v50, %v206_v55  ;;  %v213_v58 = vmul.f32 %v2358_v56, %v201_v51  ;;  %vm219_vm5 = vweird.f32 %v2358_v56 }
 0x152   :  { %vm220_vm7 = vmor %vm218_vm6, %vm219_vm5 }
 0x153   :  { %v214_v59 = vmul.f32 %v2358_v56, %v213_v58  ;;  %v211_v60 = vsel %vm210_vm4, %v2356_v50, %v207_v57 }
 0x154   :  { %v222_v63 = vmul.f32 %v211_v60, %v2728_v13  ;;  %v326_v13 = vperm.slane %v251_v11, 1 }
 0x155   :  { %v215_v61 = vmul.f32 0.5, %v214_v59 }
 0x156   :  { %v227_v4 = vmul.f32 %v2333_v0, %v222_v63 }
 0x157   :  { %v216_v62 = vsub.f32 1.5, %v215_v61 }
 0x158   :  { %v2761_v7 = vadd.f32 %v2334_v5, %v227_v4 }
 0x159   :  { %v217_v1 = vmul.f32 %v2358_v56, %v216_v62 }
 0x15b   :  { %v221_v2 = vsel %vm220_vm7, %v2358_v56, %v217_v1 }
 0x15c   :  { %v223_v3 = vmul.f32 %v221_v2, %v2734_v18 }
 0x15e   :  { %v228_v6 = vmul.f32 %v2333_v0, %v223_v3  ;;  %v2803_v3 = vperm.slane %v361_v37, 1 }
 0x160   :  { %v2763_v8 = vadd.f32 %v2334_v5, %v228_v6 }
 0x162   :  { %v315_v9 = vpack.c.bf16 %v2763_v8, %v2761_v7 }
 0x164   :  { %2233 = vmatmul.msk.bf16.vlgmr.msra.gmra.mxu0 %vm172_vm0, %v315_v9  ;;  %2234 = vmatmul.msk.bf16.vlgmr.msra.gmra.mxu1 %vm172_vm0, %v315_v9 }
 0x1e1   :  { %v341_v14 = vpop.f32.mrf.mxu0  ;;  %v355_v15 = vpop.f32.mrf.mxu1 }
 0x1e2   :  { %v342_v16 = vadd.f32 %v341_v14, %v325_v12  ;;  %v356_v17 = vadd.f32 %v355_v15, %v326_v13 }
 0x1e4   :  { %v362_v18 = vpack.c.bf16 %v342_v16, %v342_v16  ;;  %v2770_v19 = vpack.c.bf16 %v356_v17, %v356_v17 }
 0x1e6   :  { %425 = vrot.lane.b32.xlu1 %v362_v18, %s2506_s0  ;;  %364 = vrot.lane.b32.xlu2 %v362_v18, %s2507_s5  ;;  %v408_v20 = vsel %vm406_vm8, %v2770_v19, 0 }
 0x1e7   :  { %417 = vmatpush.bf16.msra.mxu3 %v408_v20 }
 0x1e9   :  { %v343_v21 = vpop.f32.mrf.mxu0  ;;  %v357_v22 = vpop.f32.mrf.mxu1 }
 0x1ea   :  { %v344_v23 = vadd.f32 %v343_v21, %v325_v12  ;;  %v358_v24 = vadd.f32 %v357_v22, %v326_v13 }
 0x1ec   :  { %v487_v25 = vpack.c.bf16 %v344_v23, %v344_v23  ;;  %v2776_v26 = vpack.c.bf16 %v358_v24, %v358_v24 }
 0x1ee   :  { %547 = vrot.lane.b32.xlu1 %v487_v25, %s2506_s0  ;;  %v530_v27 = vsel %vm406_vm8, %v2776_v26, 0 }
 0x1ef   :  { %539 = vmatpush.bf16.msrb.mxu1 %v530_v27 }
 0x1f6   :  { %489 = vrot.lane.b32.xlu1 %v487_v25, %s2507_s5 }
 0x240   :  { %v365_v28 = vpop.permute.xlu2 %364 }
 0x241   :  { %v371_v29 = vsel %vm366_vm9, %v365_v28, 0 }
 0x242   :  { %380 = vmatpush.bf16.xpose.msra.mxu2 %v371_v29 }
 0x249   :  { %2235 = vmatmul.msk.bf16.vlgmr.msra.gmra.mxu2 %vm366_vm9, %v362_v18 }
 0x258   :  { %v426_v30 = vpop.permute.xlu1 %425 }
 0x259   :  { %v431_v31 = vsel %vm366_vm9, %v426_v30, 0 }
 0x25a   :  { %440 = vmatpush.bf16.xpose.msrb.mxu3 %v431_v31 }
 0x260   :  { %v548_v32 = vpop.permute.xlu1 %547 }
 0x261   :  { %v553_v55 = vsel %vm366_vm9, %v548_v32, 0 }
 0x268   :  { %v490_v33 = vpop.permute.xlu1 %489 }
 0x269   :  { %v495_v34 = vsel %vm366_vm9, %v490_v33, 0 }
 0x26a   :  { %504 = vmatpush.bf16.xpose.msrb.mxu0 %v495_v34 }
 0x271   :  { %2239 = vmatmul.msk.bf16.vlgmr.msrb.gmra.mxu0 %vm366_vm9, %v487_v25 }
 0x2cc   :  { %v382_v39 = vpop.f32.mrf.mxu2 }
 0x2cd   :  { %v386_v40 = vmul.f32 0.17677669, %v382_v39 }
 0x2cf   :  { %v388_v41 = vadd.f32 %v2788_v38, %v386_v40 }
 0x2d1   :  { %v390_v42 = vsel %vm389_vm10, %v388_v41, -inf }
 0x2d2   :  { %391 = vmax.xlane.f32.xlu2 %v390_v42 }
 0x2d4   :  { %v384_v43 = vpop.f32.mrf.mxu2 }
 0x2ee   :  { %v506_v44 = vpop.f32.mrf.mxu0 }
 0x2ef   :  { %v510_v9 = vmul.f32 0.17677669, %v506_v44 }
 0x2f1   :  { %v512_v11 = vadd.f32 %v2803_v3, %v510_v9 }
 0x2f3   :  { %v513_v12 = vsel %vm389_vm10, %v512_v11, -inf }
 0x2f6   :  { %v508_v45 = vpop.f32.mrf.mxu0 }
 0x345   :  { %v392_v46 = vpop.xlane.xlu2 %391 }
 0x346   :  { %v393_v47 = vsub.f32 %v388_v41, %v392_v46 }
 0x348   :  { %v394_v48 = vmul.f32 1.442695, %v393_v47 }
 0x34a   :  { %2359 = vpow2.f32 %v394_v48 }
 0x350   :  { %v2360_v49 = vpop.eup %2359 }
 0x351   :  { %v396_v50 = vsel %vm389_vm10, %v2360_v49, 0.0 }
 0x352   :  { %397 = vadd.xlane.f32.xlu0 %v396_v50  ;;  %v258_v50 = vld [vmem:[%s2549_s29 + $0x30] sm:$0xff] }
 0x366   :  { %423 = vrot.lane.b32.xlu0 %v362_v18, %s2508_s9 }
 0x36e   :  { %545 = vrot.lane.b32.xlu0 %v487_v25, %s2508_s9 }
 0x3c5   :  { %v398_v51 = vpop.xlane.xlu0 %397 }
 0x3c6   :  { %2361 = vrcp.f32 %v398_v51  ;;  %v259_v51 = vld [vmem:[%s2549_s29 + $0x38] sm:$0xff] }
 0x3cc   :  { %v2362_v52 = vpop.eup %2361 }
 0x3cd   :  { %v400_v53 = vmul.f32 %v2362_v52, %v2360_v49  ;;  %v256_v52 = vld [vmem:[%s2549_s29 + $0x20] sm:$0xff] }
 0x3cf   :  { %v401_v54 = vpack.c.bf16 %v400_v53, %v400_v53  ;;  %v613_v53 = vpack.c.bf16 %v259_v51, %v258_v50  ;;  %v264_v50 = vld [vmem:[%s2569_s19 + $0x8] sm:$0xff] }
 0x3d1   :  { %2236 = vmatmul.msk.bf16.vlgmr.msra.gmra.mxu3 %vm389_vm10, %v401_v54  ;;  %v257_v54 = vld [vmem:[%s2549_s29 + $0x28] sm:$0xff]  ;;  %624 = vmatpush.bf16.msra.mxu0 %v613_v53  ;;  %v266_v53 = vld [vmem:[%s2569_s19 + $0x18] sm:$0xff] }
 0x3d2   :  { %562 = vmatpush.bf16.xpose.msra.mxu3 %v553_v55  ;;  %v612_v55 = vpack.c.bf16 %v257_v54, %v256_v52  ;;  %v692_v54 = vpack.c.bf16 %v266_v53, %v264_v50  ;;  %v311_v53 = vld [vmem:[%s2579_s30 + $0xf8] sm:$0xff] }
 0x3d5   :  { %625 = vmatpush.bf16.msra.mxu0 %v612_v55 }
 0x3d8   :  { %v424_v56 = vpop.permute.xlu0 %423 }
 0x3e0   :  { %v546_v57 = vpop.permute.xlu0 %545 }
 0x3e1   :  { %2237 = vmatmul.msk.bf16.vlgmr.msrb.gmra.mxu3 %vm366_vm9, %v424_v56  ;;  %v254_v56 = vld [vmem:[%s2549_s29 + $0x10] sm:$0xff] }
 0x3f1   :  { %2241 = vmatmul.msk.bf16.vlgmr.msra.gmra.mxu3 %vm366_vm9, %v546_v57  ;;  %v255_v57 = vld [vmem:[%s2549_s29 + $0x18] sm:$0xff] }
 0x454   :  { %v2799_v58 = vpop.f32.mrf.mxu3 }
 0x45c   :  { %v421_v59 = vpop.f32.mrf.mxu3 }
 0x45d   :  { %v611_v59 = vpack.c.bf16 %v255_v57, %v254_v56 }
 0x45f   :  { %626 = vmatpush.bf16.msra.mxu0 %v611_v59 }
 0x464   :  { %v442_v60 = vpop.f32.mrf.mxu3 }
 0x465   :  { %v446_v61 = vmul.f32 0.17677669, %v442_v60 }
 0x467   :  { %v447_v62 = vadd.f32 %v446_v61, %v2788_v38 }
 0x469   :  { %v448_v63 = vsel %vm389_vm10, %v447_v62, -inf }
 0x46a   :  { %449 = vmax.xlane.f32.xlu2 %v448_v63  ;;  %v253_v63 = vld [vmem:[%s2549_s29 + $0x8] sm:$0xff] }
 0x46c   :  { %v444_v0 = vpop.f32.mrf.mxu3 }
 0x474   :  { %v564_v1 = vpop.f32.mrf.mxu3 }
 0x475   :  { %v568_v2 = vmul.f32 0.17677669, %v564_v1 }
 0x477   :  { %v569_v4 = vadd.f32 %v568_v2, %v2803_v3 }
 0x479   :  { %v570_v5 = vsel %vm389_vm10, %v569_v4, -inf }
 0x47a   :  { %571 = vmax.xlane.f32.xlu0 %v570_v5 }
 0x47c   :  { %v566_v6 = vpop.f32.mrf.mxu3 }
 0x482   :  { %461 = vrot.lane.b32.xlu2 %v2770_v19, %s2508_s9 }
 0x4ab   :  { %514 = vmax.xlane.f32.xlu2 %v513_v12 }
 0x4dd   :  { %v450_v13 = vpop.xlane.xlu2 %449 }
 0x4de   :  { %v451_v14 = vsub.f32 %v447_v62, %v450_v13  ;;  %v252_v62 = vld [vmem:[%s2549_s29] sm:$0xff]  ;;  %s3473_s29 = sld [smem:[#allocation9_spill]] }
 0x4df   :  { %v610_v0 = vpack.c.bf16 %v253_v63, %v252_v62 }
 0x4e0   :  { %v452_v15 = vmul.f32 1.442695, %v451_v14 }
 0x4e1   :  { %627 = vmatpush.bf16.msra.mxu0 %v610_v0 }
 0x4e2   :  { %2363 = vpow2.f32 %v452_v15 }
 0x4e5   :  { %v462_v16 = vpop.permute.xlu2 %461 }
 0x4e6   :  { %v467_v17 = vsel %vm406_vm8, %v462_v16, 0 }
 0x4e7   :  { %476 = vmatpush.bf16.msrb.mxu2 %v467_v17 }
 0x4e8   :  { %v2364_v18 = vpop.eup %2363 }
 0x4e9   :  { %v454_v20 = vsel %vm389_vm10, %v2364_v18, 0.0 }
 0x4ea   :  { %455 = vadd.xlane.f32.xlu1 %v454_v20 }
 0x4ed   :  { %v572_v21 = vpop.xlane.xlu0 %571 }
 0x4ee   :  { %v573_v19 = vsub.f32 %v569_v4, %v572_v21 }
 0x4f0   :  { %v574_v22 = vmul.f32 1.442695, %v573_v19 }
 0x4f2   :  { %2365 = vpow2.f32 %v574_v22 }
 0x4f8   :  { %v2366_v23 = vpop.eup %2365 }
 0x4f9   :  { %v576_v24 = vsel %vm389_vm10, %v2366_v23, 0.0 }
 0x4fa   :  { %577 = vadd.xlane.f32.xlu0 %v576_v24 }
 0x503   :  { %583 = vrot.lane.b32.xlu1 %v2776_v26, %s2508_s9 }
 0x51e   :  { %v515_v25 = vpop.xlane.xlu2 %514 }
 0x51f   :  { %v516_v27 = vsub.f32 %v512_v11, %v515_v25  ;;  %v2335_v11 = vld [vmem:[%s2554_s3] ss:$0 sm:$0xff]  ;;  %s3474_s3 = sld [smem:[#allocation10_spill]] }
 0x521   :  { %v517_v28 = vmul.f32 1.442695, %v516_v27 }
 0x523   :  { %2367 = vpow2.f32 %v517_v28  ;;  %v275_v28 = vld [vmem:[%s2569_s19 + $0x60] sm:$0xff] }
 0x529   :  { %v2368_v29 = vpop.eup %2367 }
 0x52a   :  { %v519_v30 = vsel %vm389_vm10, %v2368_v29, 0.0 }
 0x52b   :  { %520 = vadd.xlane.f32.xlu0 %v519_v30  ;;  %v276_v30 = vld [vmem:[%s2569_s19 + $0x68] sm:$0xff] }
 0x55d   :  { %v456_v31 = vpop.xlane.xlu1 %455 }
 0x55e   :  { %2369 = vrcp.f32 %v456_v31 }
 0x564   :  { %v2370_v32 = vpop.eup %2369 }
 0x565   :  { %v458_v33 = vmul.f32 %v2370_v32, %v2364_v18  ;;  %v278_v32 = vld [vmem:[%s2569_s19 + $0x78] sm:$0xff] }
 0x567   :  { %v459_v34 = vpack.c.bf16 %v458_v33, %v458_v33  ;;  %v698_v33 = vpack.c.bf16 %v278_v32, %v276_v30 }
 0x569   :  { %2238 = vmatmul.msk.bf16.vlgmr.msrb.gmra.mxu2 %vm389_vm10, %v459_v34  ;;  %725 = vmatpush.bf16.msrb.mxu3 %v698_v33  ;;  %v271_v34 = vld [vmem:[%s2569_s19 + $0x40] sm:$0xff] }
 0x56d   :  { %v578_v35 = vpop.xlane.xlu0 %577 }
 0x56e   :  { %2371 = vrcp.f32 %v578_v35  ;;  %v273_v35 = vld [vmem:[%s2569_s19 + $0x50] sm:$0xff] }
 0x574   :  { %v2372_v36 = vpop.eup %2371 }
 0x575   :  { %v580_v37 = vmul.f32 %v2372_v36, %v2366_v23  ;;  %v584_v26 = vpop.permute.xlu1 %583  ;;  %v272_v36 = vld [vmem:[%s2569_s19 + $0x48] sm:$0xff] }
 0x576   :  { %v589_v39 = vsel %vm406_vm8, %v584_v26, 0  ;;  %v274_v26 = vld [vmem:[%s2569_s19 + $0x58] sm:$0xff] }
 0x577   :  { %v581_v40 = vpack.c.bf16 %v580_v37, %v580_v37  ;;  %598 = vmatpush.bf16.msra.mxu2 %v589_v39  ;;  %v695_v37 = vpack.c.bf16 %v273_v35, %v271_v34  ;;  %v696_v39 = vpack.c.bf16 %v274_v26, %v272_v36  ;;  %v294_v35 = vld [vmem:[%s2579_s30 + $0x70] sm:$0xff]  ;;  %v295_v36 = vld [vmem:[%s2579_s30 + $0x78] sm:$0xff] }
 0x579   :  { %726 = vmatpush.bf16.msrb.mxu3 %v696_v39  ;;  %v927_v39 = vpack.c.bf16 %v295_v36, %v294_v35 }
 0x57a   :  { %2242 = vmatmul.msk.bf16.vlgmr.msra.gmra.mxu2 %vm389_vm10, %v581_v40  ;;  %v267_v40 = vld [vmem:[%s2569_s19 + $0x20] sm:$0xff] }
 0x57b   :  { %939 = vmatpush.bf16.msrb.mxu2 %v927_v39 }
 0x59e   :  { %v521_v41 = vpop.xlane.xlu0 %520 }
 0x59f   :  { %2373 = vrcp.f32 %v521_v41  ;;  %v269_v41 = vld [vmem:[%s2569_s19 + $0x30] sm:$0xff] }
 0x5a5   :  { %v2374_v42 = vpop.eup %2373 }
 0x5a6   :  { %v523_v43 = vmul.f32 %v2374_v42, %v2368_v29  ;;  %v277_v29 = vld [vmem:[%s2569_s19 + $0x70] sm:$0xff]  ;;  %v268_v42 = vld [vmem:[%s2569_s19 + $0x28] sm:$0xff] }
 0x5a7   :  { %v697_v31 = vpack.c.bf16 %v277_v29, %v275_v28 }
 0x5a8   :  { %v524_v44 = vpack.c.bf16 %v523_v43, %v523_v43  ;;  %v693_v43 = vpack.c.bf16 %v269_v41, %v267_v40 }
 0x5a9   :  { %711 = vmatpush.bf16.msra.mxu1 %v697_v31 }
 0x5aa   :  { %2240 = vmatmul.msk.bf16.vlgmr.msrb.gmra.mxu1 %vm389_vm10, %v524_v44  ;;  %v270_v44 = vld [vmem:[%s2569_s19 + $0x38] sm:$0xff] }
 0x5ad   :  { %712 = vmatpush.bf16.msra.mxu1 %v695_v37 }
 0x5b1   :  { %713 = vmatpush.bf16.msra.mxu1 %v693_v43 }
 0x5ec   :  { %v478_v45 = vpop.f32.mrf.mxu2 }
 0x5f4   :  { %v480_v46 = vpop.f32.mrf.mxu2 }
 0x5f5   :  { %v694_v46 = vpack.c.bf16 %v270_v44, %v268_v42 }
 0x5f7   :  { %727 = vmatpush.bf16.msrb.mxu3 %v694_v46  ;;  %v293_v46 = vld [vmem:[%s2579_s30 + $0x68] sm:$0xff] }
 0x5fb   :  { %728 = vmatpush.bf16.msrb.mxu3 %v692_v54 }
 0x5fd   :  { %v600_v47 = vpop.f32.mrf.mxu2 }
 0x5fe   :  { %v2323_v48 = vpack.i.bf16 %v600_v47, %v478_v45 }
 0x600   :  { %2324 = vrot.lane.b32.xlu0 %v2323_v48, %s2506_s0  ;;  %v263_v48 = vld [vmem:[%s2569_s19] sm:$0xff] }
 0x605   :  { %v602_v49 = vpop.f32.mrf.mxu2 }
 0x606   :  { %v265_v49 = vld [vmem:[%s2569_s19 + $0x10] sm:$0xff]  ;;  %s3477_s19 = sld [smem:[#allocation12_spill]] }
 0x607   :  { %v691_v52 = vpack.c.bf16 %v265_v49, %v263_v48 }
 0x609   :  { %714 = vmatpush.bf16.msra.mxu1 %v691_v52  ;;  %v310_v52 = vld [vmem:[%s2579_s30 + $0xf0] sm:$0xff] }
 0x627   :  { %v541_v60 = vpop.f32.mrf.mxu1 }
 0x62f   :  { %v543_v61 = vpop.f32.mrf.mxu1 }
 0x672   :  { %v2325_v1 = vpop.permute.xlu0 %2324 }
 0x673   :  { %v2327_v2 = vunpack.i.h.bf16 %v2325_v1  ;;  %v2326_v4 = vunpack.i.l.bf16 %v2325_v1 }
 0x675   :  { %v608_v5 = vsel %vm366_vm9, %v541_v60, %v2327_v2  ;;  %v486_v6 = vsel %vm366_vm9, %v2799_v58, %v2326_v4 }
 0x676   :  { %v609_v9 = vpack.c.bf16 %v608_v5, %v486_v6 }
 0x678   :  { %2243 = vmatmul.msk.bf16.vlgmr.msra.gmra.mxu0 %vm172_vm0, %v609_v9 }
 0x6f5   :  { %v629_v12 = vpop.f32.mrf.mxu0 }
 0x6f6   :  { %v630_v13 = vadd.f32 %v2335_v11, %v629_v12 }
 0x6f8   :  { %v634_v14 = vadd.f32 %v630_v13, %v2761_v7 }
 0x6fa   :  { %v636_v15 = vsel %vm172_vm0, %v634_v14, 0.0 }
 0x6fb   :  { %637 = vadd.xlane.f32.xlu2 %v636_v15  ;;  %v2337_v15 = vld [vmem:[%s2564_s14] ss:$0 sm:$0xff]  ;;  %s3476_s14 = sld [smem:[#allocation11_spill]] }
 0x6fd   :  { %v631_v16 = vpop.f32.mrf.mxu0 }
 0x6fe   :  { %v632_v17 = vadd.f32 %v2335_v11, %v631_v16  ;;  %v2336_v11 = vld [vmem:[%s2559_s8] ss:$0 sm:$0xff]  ;;  %s3475_s8 = sld [smem:[#allocation13_spill]] }
 0x700   :  { %v635_v18 = vadd.f32 %v632_v17, %v2763_v8 }
 0x702   :  { %v639_v20 = vsel %vm172_vm0, %v635_v18, 0.0 }
 0x703   :  { %640 = vadd.xlane.f32.xlu1 %v639_v20 }
 0x76e   :  { %v638_v58 = vpop.xlane.xlu2 %637 }
 0x76f   :  { %v642_v21 = vmul.f32 %v638_v58, %v2725_v10 }
 0x771   :  { %v2840_v19 = vsub.f32 %v634_v14, %v642_v21 }
 0x773   :  { %v646_v7 = vmul.f32 %v2840_v19, %v2840_v19 }
 0x775   :  { %v648_v22 = vsel %vm172_vm0, %v646_v7, 0.0 }
 0x776   :  { %v641_v23 = vpop.xlane.xlu1 %640  ;;  %649 = vadd.xlane.f32.xlu0 %v648_v22 }
 0x777   :  { %v643_v8 = vmul.f32 %v641_v23, %v2725_v10 }
 0x779   :  { %v2846_v24 = vsub.f32 %v635_v18, %v643_v8 }
 0x77b   :  { %v647_v25 = vmul.f32 %v2846_v24, %v2846_v24 }
 0x77d   :  { %v651_v27 = vsel %vm172_vm0, %v647_v25, 0.0 }
 0x77e   :  { %652 = vadd.xlane.f32.xlu2 %v651_v27 }
 0x7e9   :  { %v650_v45 = vpop.xlane.xlu0 %649 }
 0x7ea   :  { %v654_v47 = vmul.f32 %v650_v45, %v2725_v10  ;;  %v292_v45 = vld [vmem:[%s2579_s30 + $0x60] sm:$0xff] }
 0x7eb   :  { %v926_v50 = vpack.c.bf16 %v293_v46, %v292_v45 }
 0x7ec   :  { %v656_v51 = vadd.f32 1e-12, %v654_v47 }
 0x7ed   :  { %940 = vmatpush.bf16.msrb.mxu2 %v926_v50 }
 0x7ee   :  { %2375 = vrsqrt.f32 %v656_v51  ;;  %vm664_vm12 = vweird.f32 %v656_v51 }
 0x7f1   :  { %v653_v55 = vpop.xlane.xlu2 %652 }
 0x7f2   :  { %v655_v56 = vmul.f32 %v653_v55, %v2725_v10 }
 0x7f4   :  { %v2376_v57 = vpop.eup %2375  ;;  %v657_v59 = vadd.f32 1e-12, %v655_v56 }
 0x7f5   :  { %v659_v60 = vmul.f32 %v2376_v57, %v656_v51  ;;  %vm665_vm11 = vweird.f32 %v2376_v57 }
 0x7f6   :  { %2377 = vrsqrt.f32 %v657_v59  ;;  %vm666_vm13 = vmor %vm664_vm12, %vm665_vm11  ;;  %vm674_vm15 = vweird.f32 %v657_v59 }
 0x7f7   :  { %v660_v61 = vmul.f32 %v2376_v57, %v659_v60 }
 0x7f9   :  { %v661_v62 = vmul.f32 0.5, %v660_v61  ;;  %v290_v61 = vld [vmem:[%s2579_s30 + $0x50] sm:$0xff] }
 0x7fb   :  { %v662_v63 = vsub.f32 1.5, %v661_v62  ;;  %v291_v62 = vld [vmem:[%s2579_s30 + $0x58] sm:$0xff] }
 0x7fc   :  { %v2378_v0 = vpop.eup %2377 }
 0x7fd   :  { %v663_v1 = vmul.f32 %v2376_v57, %v662_v63  ;;  %v669_v2 = vmul.f32 %v2378_v0, %v657_v59  ;;  %vm675_vm14 = vweird.f32 %v2378_v0 }
 0x7fe   :  { %vm676_vm1 = vmor %vm674_vm15, %vm675_vm14 }
 0x7ff   :  { %v670_v4 = vmul.f32 %v2378_v0, %v669_v2  ;;  %v667_v5 = vsel %vm666_vm13, %v2376_v57, %v663_v1  ;;  %v935_v57 = vpack.c.bf16 %v311_v53, %v310_v52 }
 0x800   :  { %v678_v12 = vmul.f32 %v667_v5, %v2840_v19  ;;  %v2509_v19 = vmov 1.4142135   ;;  %v925_v5 = vpack.c.bf16 %v291_v62, %v290_v61 }
 0x801   :  { %v671_v6 = vmul.f32 0.5, %v670_v4  ;;  %2379 = vrcp.f32 %v2509_v19  ;;  %953 = vmatpush.bf16.msrb.mxu0 %v935_v57  ;;  %v288_v19 = vld [vmem:[%s2579_s30 + $0x40] sm:$0xff] }
 0x802   :  { %v683_v16 = vmul.f32 %v2336_v11, %v678_v12  ;;  %941 = vmatpush.bf16.msrb.mxu2 %v925_v5  ;;  %v286_v5 = vld [vmem:[%s2579_s30 + $0x30] sm:$0xff] }
 0x803   :  { %v672_v9 = vsub.f32 1.5, %v671_v6  ;;  %v308_v6 = vld [vmem:[%s2579_s30 + $0xe0] sm:$0xff] }
 0x804   :  { %v2873_v20 = vadd.f32 %v2337_v15, %v683_v16 }
 0x805   :  { %v673_v13 = vmul.f32 %v2378_v0, %v672_v9  ;;  %v309_v9 = vld [vmem:[%s2579_s30 + $0xe8] sm:$0xff] }
 0x807   :  { %v677_v14 = vsel %vm676_vm1, %v2378_v0, %v673_v13  ;;  %v2380_v7 = vpop.eup %2379 }
 0x808   :  { %v679_v17 = vmul.f32 %v677_v14, %v2846_v24  ;;  %v740_v22 = vmul.f32 1.4142135, %v2380_v7  ;;  %v279_v24 = vld [vmem:[%s2574_s24] sm:$0x3]  ;;  %vm744_vm2 = vweird.f32 %v2380_v7  ;;  %s3478_s24 = sld [smem:[#allocation14_spill]] }
 0x809   :  { %v700_v27 = vperm.slane %v279_v24, 0  ;;  %v701_v32 = vperm.slane %v279_v24, 1 }
 0x80a   :  { %v684_v18 = vmul.f32 %v2336_v11, %v679_v17  ;;  %v741_v23 = vsub.f32 1.0, %v740_v22 }
 0x80c   :  { %v2875_v58 = vadd.f32 %v2337_v15, %v684_v18  ;;  %v742_v8 = vmul.f32 %v2380_v7, %v741_v23 }
 0x80e   :  { %v690_v21 = vpack.c.bf16 %v2875_v58, %v2873_v20  ;;  %v743_v25 = vadd.f32 %v2380_v7, %v742_v8 }
 0x810   :  { %2244 = vmatmul.msk.bf16.vlgmr.msra.gmra.mxu1 %vm172_vm0, %v690_v21  ;;  %2245 = vmatmul.msk.bf16.vlgmr.msrb.gmra.mxu3 %vm172_vm0, %v690_v21  ;;  %v2882_v29 = vsel %vm744_vm2, %v2380_v7, %v743_v25  ;;  %v934_v21 = vpack.c.bf16 %v309_v9, %v308_v6  ;;  %v289_v7 = vld [vmem:[%s2579_s30 + $0x48] sm:$0xff]  ;;  %v306_v25 = vld [vmem:[%s2579_s30 + $0xd0] sm:$0xff]  ;;  %v287_v6 = vld [vmem:[%s2579_s30 + $0x38] sm:$0xff] }
 0x812   :  { %954 = vmatpush.bf16.msrb.mxu0 %v934_v21  ;;  %v285_v21 = vld [vmem:[%s2579_s30 + $0x28] sm:$0xff] }
 0x88d   :  { %v716_v28 = vpop.f32.mrf.mxu1 }
 0x88e   :  { %v2884_v30 = vadd.f32 %v716_v28, %v700_v27 }
 0x890   :  { %v2888_v31 = vmul.f32 %v2882_v29, %v2884_v30 }
 0x892   :  { %v750_v33 = vmul.f32 %v2888_v31, %v2888_v31 }
 0x893   :  { %v730_v34 = vpop.f32.mrf.mxu3 }
 0x894   :  { %v2894_v37 = vmin.f32 %v750_v33, 16.0  ;;  %v2896_v26 = vadd.f32 %v730_v34, %v701_v32  ;;  %v924_v33 = vpack.c.bf16 %v289_v7, %v288_v19 }
 0x895   :  { %v718_v40 = vpop.f32.mrf.mxu1 }
 0x896   :  { %v752_v41 = vmul.f32 2.1237322e-06, %v2894_v37  ;;  %v763_v42 = vmul.f32 3.8918573e-05, %v2894_v37  ;;  %v2902_v43 = vmul.f32 %v2882_v29, %v2896_v26  ;;  %v2904_v44 = vadd.f32 %v718_v40, %v700_v27  ;;  %v307_v27 = vld [vmem:[%s2579_s30 + $0xd8] sm:$0xff]  ;;  %942 = vmatpush.bf16.msrb.mxu2 %v924_v33 }
 0x898   :  { %v753_v47 = vadd.f32 0.00028619796, %v752_v41  ;;  %v764_v48 = vadd.f32 0.001143296, %v763_v42  ;;  %v790_v49 = vmul.f32 %v2902_v43, %v2902_v43  ;;  %v2912_v51 = vmul.f32 %v2882_v29, %v2904_v44 }
 0x899   :  { %v933_v41 = vpack.c.bf16 %v307_v27, %v306_v25 }
 0x89a   :  { %v754_v54 = vmul.f32 %v753_v47, %v2894_v37  ;;  %v765_v55 = vmul.f32 %v764_v48, %v2894_v37  ;;  %v2918_v56 = vmin.f32 %v790_v49, 16.0  ;;  %v830_v59 = vmul.f32 %v2912_v51, %v2912_v51 }
 0x89b   :  { %v732_v60 = vpop.f32.mrf.mxu3  ;;  %955 = vmatpush.bf16.msrb.mxu0 %v933_v41  ;;  %v303_v41 = vld [vmem:[%s2579_s30 + $0xb8] sm:$0xff] }
 0x89c   :  { %v766_v63 = vadd.f32 0.014752088, %v765_v55  ;;  %v792_v0 = vmul.f32 2.1237322e-06, %v2918_v56  ;;  %v2925_v1 = vadd.f32 %v732_v60, %v701_v32  ;;  %v803_v2 = vmul.f32 3.8918573e-05, %v2918_v56 }
 0x89d   :  { %v2928_v4 = vmin.f32 %v830_v59, 16.0  ;;  %v755_v11 = vadd.f32 0.0036580483, %v754_v54 }
 0x89e   :  { %v767_v12 = vmul.f32 %v766_v63, %v2894_v37  ;;  %v804_v13 = vadd.f32 0.001143296, %v803_v2  ;;  %v2937_v16 = vmul.f32 %v2882_v29, %v2925_v1  ;;  %v793_v18 = vadd.f32 0.00028619796, %v792_v0 }
 0x89f   :  { %v832_v14 = vmul.f32 2.1237322e-06, %v2928_v4  ;;  %v843_v15 = vmul.f32 3.8918573e-05, %v2928_v4  ;;  %v756_v28 = vmul.f32 %v755_v11, %v2894_v37 }
 0x8a0   :  { %v768_v17 = vadd.f32 0.112945676, %v767_v12  ;;  %v805_v22 = vmul.f32 %v804_v13, %v2918_v56  ;;  %v870_v24 = vmul.f32 %v2937_v16, %v2937_v16  ;;  %v794_v42 = vmul.f32 %v793_v18, %v2918_v56  ;;  %v304_v12 = vld [vmem:[%s2579_s30 + $0xc0] sm:$0xff]  ;;  %v305_v13 = vld [vmem:[%s2579_s30 + $0xc8] sm:$0xff] }
 0x8a1   :  { %v833_v23 = vadd.f32 0.00028619796, %v832_v14  ;;  %v844_v8 = vadd.f32 0.001143296, %v843_v15  ;;  %v757_v52 = vadd.f32 0.05243302, %v756_v28  ;;  %v932_v25 = vpack.c.bf16 %v305_v13, %v304_v12 }
 0x8a2   :  { %v769_v32 = vmul.f32 %v768_v17, %v2894_v37  ;;  %v806_v34 = vadd.f32 0.014752088, %v805_v22  ;;  %v2950_v39 = vmin.f32 %v870_v24, 16.0  ;;  %v795_v59 = vadd.f32 0.0036580483, %v794_v42  ;;  %v284_v18 = vld [vmem:[%s2579_s30 + $0x20] sm:$0xff] }
 0x8a3   :  { %v834_v35 = vmul.f32 %v833_v23, %v2928_v4  ;;  %v845_v36 = vmul.f32 %v844_v8, %v2928_v4  ;;  %v758_v0 = vmul.f32 %v757_v52, %v2894_v37  ;;  %v923_v23 = vpack.c.bf16 %v287_v6, %v286_v5  ;;  %956 = vmatpush.bf16.msrb.mxu0 %v932_v25  ;;  %v298_v12 = vld [vmem:[%s2579_s30 + $0x90] sm:$0xff]  ;;  %v299_v13 = vld [vmem:[%s2579_s30 + $0x98] sm:$0xff] }
 0x8a4   :  { %v770_v40 = vadd.f32 0.4994258, %v769_v32  ;;  %v807_v45 = vmul.f32 %v806_v34, %v2918_v56  ;;  %v872_v47 = vmul.f32 2.1237322e-06, %v2950_v39  ;;  %v883_v50 = vmul.f32 3.8918573e-05, %v2950_v39 }
 0x8a5   :  { %v846_v46 = vadd.f32 0.014752088, %v845_v36  ;;  %v835_v49 = vadd.f32 0.0036580483, %v834_v35  ;;  %v796_v14 = vmul.f32 %v795_v59, %v2918_v56  ;;  %v759_v8 = vadd.f32 0.18741608, %v758_v0  ;;  %943 = vmatpush.bf16.msrb.mxu2 %v923_v23 }
 0x8a6   :  { %v771_v48 = vmul.f32 %v770_v40, %v2894_v37  ;;  %v808_v53 = vadd.f32 0.112945676, %v807_v45  ;;  %v884_v57 = vadd.f32 0.001143296, %v883_v50  ;;  %v873_v62 = vadd.f32 0.00028619796, %v872_v47 }
 0x8a7   :  { %v847_v54 = vmul.f32 %v846_v46, %v2928_v4  ;;  %v836_v63 = vmul.f32 %v835_v49, %v2928_v4  ;;  %v922_v33 = vpack.c.bf16 %v285_v21, %v284_v18  ;;  %v797_v35 = vadd.f32 0.05243302, %v796_v14  ;;  %v302_v40 = vld [vmem:[%s2579_s30 + $0xb0] sm:$0xff]  ;;  %v283_v50 = vld [vmem:[%s2579_s30 + $0x18] sm:$0xff] }
 0x8a8   :  { %v2958_v55 = vadd.f32 1.0, %v771_v48  ;;  %v809_v60 = vmul.f32 %v808_v53, %v2918_v56  ;;  %v885_v11 = vmul.f32 %v884_v57, %v2950_v39  ;;  %v874_v17 = vmul.f32 %v873_v62, %v2950_v39  ;;  %v282_v49 = vld [vmem:[%s2579_s30 + $0x10] sm:$0xff]  ;;  %v300_v53 = vld [vmem:[%s2579_s30 + $0xa0] sm:$0xff] }
 0x8a9   :  { %v848_v61 = vadd.f32 0.112945676, %v847_v54  ;;  %v837_v19 = vadd.f32 0.05243302, %v836_v63  ;;  %v760_v45 = vmul.f32 %v759_v8, %v2894_v37  ;;  %944 = vmatpush.bf16.msrb.mxu2 %v922_v33  ;;  %v931_v52 = vpack.c.bf16 %v303_v41, %v302_v40  ;;  %v301_v54 = vld [vmem:[%s2579_s30 + $0xa8] sm:$0xff]  ;;  %v296_v33 = vld [vmem:[%s2579_s30 + $0x80] sm:$0xff] }
 0x8aa   :  { %2381 = vrcp.f32 %v2958_v55  ;;  %v810_v2 = vadd.f32 0.4994258, %v809_v60  ;;  %v886_v22 = vadd.f32 0.014752088, %v885_v11  ;;  %v875_v36 = vadd.f32 0.0036580483, %v874_v17 }
 0x8ab   :  { %v849_v9 = vmul.f32 %v848_v61, %v2928_v4  ;;  %v838_v42 = vmul.f32 %v837_v19, %v2928_v4  ;;  %v798_v59 = vmul.f32 %v797_v35, %v2918_v56  ;;  %v280_v60 = vld [vmem:[%s2579_s30] sm:$0xff]  ;;  %v281_v61 = vld [vmem:[%s2579_s30 + $0x8] sm:$0xff]  ;;  %957 = vmatpush.bf16.msrb.mxu0 %v931_v52  ;;  %v921_v0 = vpack.c.bf16 %v283_v50, %v282_v49 }
 0x8ac   :  { %v811_v15 = vmul.f32 %v810_v2, %v2918_v56  ;;  %v887_v32 = vmul.f32 %v886_v22, %v2950_v39  ;;  %v876_v37 = vmul.f32 %v875_v36, %v2950_v39  ;;  %v761_v5 = vadd.f32 1.1283791, %v760_v45 }
 0x8ad   :  { %v850_v7 = vadd.f32 0.4994258, %v849_v9  ;;  %v839_v62 = vadd.f32 0.18741608, %v838_v42  ;;  %v784_v9 = vand.u32 2147483648, %v2958_v55  ;;  %v930_v11 = vpack.c.bf16 %v301_v54, %v300_v53  ;;  %945 = vmatpush.bf16.msrb.mxu2 %v921_v0 }
 0x8ae   :  { %v2975_v24 = vadd.f32 1.0, %v811_v15  ;;  %v888_v48 = vadd.f32 0.112945676, %v887_v32  ;;  %vm778_vm4 = vweird.f32 %v2958_v55  ;;  %v782_v14 = vand.u32 2147483647, %v2958_v55 }
 0x8af   :  { %v851_v28 = vmul.f32 %v850_v7, %v2928_v4  ;;  %v920_v17 = vpack.c.bf16 %v281_v61, %v280_v60  ;;  %v799_v21 = vadd.f32 0.18741608, %v798_v59  ;;  %v877_v19 = vadd.f32 0.05243302, %v876_v37  ;;  %958 = vmatpush.bf16.msrb.mxu0 %v930_v11 }
 0x8b0   :  { %v2977_v27 = vpop.eup %2381  ;;  %2383 = vrcp.f32 %v2975_v24  ;;  %v889_v63 = vmul.f32 %v888_v48, %v2950_v39  ;;  %v840_v23 = vmul.f32 %v839_v62, %v2928_v4  ;;  %v929_v8 = vpack.c.bf16 %v299_v13, %v298_v12 }
 0x8b1   :  { %v774_v34 = vmul.f32 %v2977_v27, %v2958_v55  ;;  %v2988_v47 = vadd.f32 1.0, %v851_v28  ;;  %vm779_vm3 = vweird.f32 %v2977_v27  ;;  %v785_v28 = vor.u32 1.1754944e-38, %v784_v9  ;;  %946 = vmatpush.bf16.msrb.mxu2 %v920_v17 }
 0x8b2   :  { %vm3014_vm5 = vmor %vm778_vm4, %vm779_vm3  ;;  %v890_v7 = vadd.f32 0.4994258, %v889_v63  ;;  %vm783_vm6 = vcmp.eq.f32.partialorder %v782_v14, 8.507059e+37  ;;  %v762_v40 = vmul.f32 %v761_v5, %v2888_v31  ;;  %v878_v41 = vmul.f32 %v877_v19, %v2950_v39 }
 0x8b3   :  { %v775_v46 = vsub.f32 1.0, %v774_v34  ;;  %2385 = vrcp.f32 %v2988_v47  ;;  %v297_v34 = vld [vmem:[%s2579_s30 + $0x88] sm:$0xff]  ;;  %v800_v42 = vmul.f32 %v799_v21, %v2918_v56  ;;  %v841_v45 = vadd.f32 1.1283791, %v840_v23  ;;  %959 = vmatpush.bf16.msrb.mxu0 %v929_v8  ;;  %s3479_s30 = sld [smem:[#allocation15_spill]] }
 0x8b4   :  { %v891_v32 = vmul.f32 %v890_v7, %v2950_v39  ;;  %v928_v48 = vpack.c.bf16 %v297_v34, %v296_v33  ;;  %v862_v49 = vand.u32 2147483647, %v2988_v47  ;;  %v864_v50 = vand.u32 2147483648, %v2988_v47 }
 0x8b5   :  { %v776_v57 = vmul.f32 %v2977_v27, %v775_v46  ;;  %vm818_vm12 = vweird.f32 %v2975_v24  ;;  %v824_v56 = vand.u32 2147483648, %v2975_v24  ;;  %v879_v54 = vadd.f32 0.18741608, %v878_v41 }
 0x8b6   :  { %v3002_v2 = vpop.eup %2383  ;;  %v892_v4 = vadd.f32 1.0, %v891_v32  ;;  %v822_v59 = vand.u32 2147483647, %v2975_v24  ;;  %vm858_vm14 = vweird.f32 %v2988_v47  ;;  %v801_v60 = vadd.f32 1.1283791, %v800_v42 }
 0x8b7   :  { %v777_v6 = vadd.f32 %v2977_v27, %v776_v57  ;;  %v814_v15 = vmul.f32 %v3002_v2, %v2975_v24  ;;  %vm819_vm7 = vweird.f32 %v3002_v2  ;;  %960 = vmatpush.bf16.msrb.mxu0 %v928_v48  ;;  %v842_v61 = vmul.f32 %v841_v45, %v2912_v51  ;;  %v2338_v45 = vld [vmem:[%s2584_s6] ss:$0 sm:$0xff]  ;;  %s3484_s6 = sld [smem:[#allocation16_spill]] }
 0x8b8   :  { %2387 = vrcp.f32 %v892_v4  ;;  %vm3036_vm13 = vmor %vm818_vm12, %vm819_vm7  ;;  %v865_v62 = vor.u32 1.1754944e-38, %v864_v50  ;;  %vm863_vm1 = vcmp.eq.f32.partialorder %v862_v49, 8.507059e+37  ;;  %v825_v9 = vor.u32 1.1754944e-38, %v824_v56 }
 0x8b9   :  { %v781_v55 = vsel %vm3014_vm5, %v2977_v27, %v777_v6  ;;  %v815_v22 = vsub.f32 1.0, %v814_v15  ;;  %v2386_v25 = vpop.eup %2385  ;;  %v880_v24 = vmul.f32 %v879_v54, %v2950_v39  ;;  %vm823_vm2 = vcmp.eq.f32.partialorder %v822_v59, 8.507059e+37 }
 0x8ba   :  { %v854_v36 = vmul.f32 %v2386_v25, %v2988_v47  ;;  %v786_v27 = vsel %vm783_vm6, %v785_v28, %v781_v55  ;;  %vm859_vm11 = vweird.f32 %v2386_v25  ;;  %v735_v13 = vmul.f32 0.5, %v2884_v30 }
 0x8bb   :  { %v816_v35 = vmul.f32 %v3002_v2, %v815_v22  ;;  %v787_v52 = vmul.f32 %v786_v27, %v762_v40  ;;  %vm860_vm15 = vmor %vm858_vm14, %vm859_vm11  ;;  %v802_v15 = vmul.f32 %v801_v60, %v2902_v43  ;;  %v881_v21 = vadd.f32 1.1283791, %v880_v24 }
 0x8bc   :  { %v855_v46 = vsub.f32 1.0, %v854_v36  ;;  %v902_v19 = vand.u32 2147483647, %v892_v4  ;;  %v904_v7 = vand.u32 2147483648, %v892_v4  ;;  %vm898_vm4 = vweird.f32 %v892_v4 }
 0x8bd   :  { %v817_v31 = vadd.f32 %v3002_v2, %v816_v35  ;;  %v2246_v63 = vclamps-f32 %v787_v52, 1.0  ;;  %v882_v30 = vmul.f32 %v881_v21, %v2937_v16  ;;  %v736_v40 = vmul.f32 0.5, %v2896_v26  ;;  %v1027_v21 = vld [vmem:[%s3469_s13 + $0x20] sm:$0xff] }
 0x8be   :  { %v856_v53 = vmul.f32 %v2386_v25, %v855_v46  ;;  %v2388_v6 = vpop.eup %2387  ;;  %v905_v28 = vor.u32 1.1754944e-38, %v904_v7  ;;  %vm903_vm6 = vcmp.eq.f32.partialorder %v902_v19, 8.507059e+37  ;;  %v738_v27 = vmul.f32 0.5, %v2925_v1  ;;  %v1029_v19 = vld [vmem:[%s3469_s13 + $0x30] sm:$0xff]  ;;  %v1028_v7 = vld [vmem:[%s3469_s13 + $0x28] sm:$0xff] }
 0x8bf   :  { %v821_v0 = vsel %vm3036_vm13, %v3002_v2, %v817_v31  ;;  %v894_v12 = vmul.f32 %v2388_v6, %v892_v4  ;;  %v910_v14 = vadd.f32 1.0, %v2246_v63  ;;  %v737_v2 = vmul.f32 0.5, %v2904_v44 }
 0x8c0   :  { %v857_v37 = vadd.f32 %v2386_v25, %v856_v53  ;;  %v826_v51 = vsel %vm823_vm2, %v825_v9, %v821_v0  ;;  %vm899_vm3 = vweird.f32 %v2388_v6  ;;  %v1037_v9 = vld [vmem:[%s3469_s13 + $0x70] sm:$0xff] }
 0x8c1   :  { %v895_v18 = vsub.f32 1.0, %v894_v12  ;;  %v827_v55 = vmul.f32 %v826_v51, %v802_v15  ;;  %v914_v39 = vmul.f32 %v910_v14, %v735_v13  ;;  %vm900_vm5 = vmor %vm898_vm4, %vm899_vm3  ;;  %v1031_v13 = vld [vmem:[%s3469_s13 + $0x40] sm:$0xff]  ;;  %v1033_v51 = vld [vmem:[%s3469_s13 + $0x50] sm:$0xff] }
 0x8c2   :  { %v861_v5 = vsel %vm860_vm15, %v2386_v25, %v857_v37  ;;  %v1032_v14 = vld [vmem:[%s3469_s13 + $0x48] sm:$0xff]  ;;  %v1108_v15 = vpack.c.bf16 %v1033_v51, %v1031_v13 }
 0x8c3   :  { %v866_v11 = vsel %vm863_vm1, %v865_v62, %v861_v5  ;;  %v896_v23 = vmul.f32 %v2388_v6, %v895_v18  ;;  %v2247_v43 = vclamps-f32 %v827_v55, 1.0 }
 0x8c4   :  { %v867_v47 = vmul.f32 %v866_v11, %v842_v61  ;;  %v1036_v11 = vld [vmem:[%s3469_s13 + $0x68] sm:$0xff] }
 0x8c5   :  { %v897_v25 = vadd.f32 %v2388_v6, %v896_v23  ;;  %v911_v35 = vadd.f32 1.0, %v2247_v43  ;;  %v1030_v23 = vld [vmem:[%s3469_s13 + $0x38] sm:$0xff] }
 0x8c6   :  { %v2248_v17 = vclamps-f32 %v867_v47, 1.0  ;;  %v1038_v47 = vld [vmem:[%s3469_s13 + $0x78] sm:$0xff] }
 0x8c7   :  { %v901_v33 = vsel %vm900_vm5, %v2388_v6, %v897_v25  ;;  %v915_v4 = vmul.f32 %v911_v35, %v736_v40  ;;  %v1035_v6 = vld [vmem:[%s3469_s13 + $0x60] sm:$0xff]  ;;  %v1111_v12 = vpack.c.bf16 %v1038_v47, %v1036_v11 }
 0x8c8   :  { %v912_v22 = vadd.f32 1.0, %v2248_v17  ;;  %v906_v44 = vsel %vm903_vm6, %v905_v28, %v901_v33  ;;  %v1110_v24 = vpack.c.bf16 %v1037_v9, %v1035_v6  ;;  %v1034_v17 = vld [vmem:[%s3469_s13 + $0x58] sm:$0xff]  ;;  %v1023_v25 = vld [vmem:[%s3469_s13] sm:$0xff]  ;;  %v1024_v28 = vld [vmem:[%s3469_s13 + $0x8] sm:$0xff] }
 0x8c9   :  { %v907_v34 = vmul.f32 %v906_v44, %v882_v30  ;;  %1138 = vmatpush.bf16.msra.mxu3 %v1111_v12  ;;  %v1109_v18 = vpack.c.bf16 %v1034_v17, %v1032_v14  ;;  %v1025_v30 = vld [vmem:[%s3469_s13 + $0x10] sm:$0xff] }
 0x8ca   :  { %v916_v8 = vmul.f32 %v912_v22, %v737_v2  ;;  %1124 = vmatpush.bf16.msrb.mxu1 %v1110_v24  ;;  %v1106_v22 = vpack.c.bf16 %v1029_v19, %v1027_v21  ;;  %v1104_v43 = vpack.c.bf16 %v1025_v30, %v1023_v25 }
 0x8cb   :  { %v2249_v36 = vclamps-f32 %v907_v34, 1.0 }
 0x8cc   :  { %v918_v32 = vpack.c.bf16 %v916_v8, %v914_v39  ;;  %v1107_v39 = vpack.c.bf16 %v1030_v23, %v1028_v7 }
 0x8cd   :  { %v913_v41 = vadd.f32 1.0, %v2249_v36  ;;  %1139 = vmatpush.bf16.msra.mxu3 %v1109_v18 }
 0x8ce   :  { %947 = vmatmul.bf16.vlgmr.msrb.gmra.mxu2 %v918_v32  ;;  %1125 = vmatpush.bf16.msrb.mxu1 %v1108_v15  ;;  %v1026_v32 = vld [vmem:[%s3469_s13 + $0x18] sm:$0xff] }
 0x8cf   :  { %v917_v42 = vmul.f32 %v913_v41, %v738_v27  ;;  %v1105_v33 = vpack.c.bf16 %v1026_v32, %v1024_v28 }
 0x8d1   :  { %v919_v16 = vpack.c.bf16 %v917_v42, %v915_v4  ;;  %1140 = vmatpush.bf16.msra.mxu3 %v1107_v39 }
 0x8d2   :  { %1126 = vmatpush.bf16.msrb.mxu1 %v1106_v22 }
 0x8d3   :  { %961 = vmatmul.bf16.vlgmr.msrb.gmra.mxu0 %v919_v16 }
 0x8d5   :  { %1141 = vmatpush.bf16.msra.mxu3 %v1105_v33 }
 0x8d6   :  { %1127 = vmatpush.bf16.msrb.mxu1 %v1104_v43 }
 0x950   :  { %v962_v49 = vpop.f32.mrf.mxu0 }
 0x951   :  { %v948_v46 = vpop.f32.mrf.mxu2 }
 0x952   :  { %v949_v48 = vadd.f32 %v2338_v45, %v948_v46 }
 0x954   :  { %v963_v50 = vadd.f32 %v962_v49, %v949_v48 }
 0x956   :  { %v967_v52 = vadd.f32 %v963_v50, %v2873_v20 }
 0x958   :  { %v969_v56 = vsel %vm172_vm0, %v967_v52, 0.0  ;;  %v964_v26 = vpop.f32.mrf.mxu0 }
 0x959   :  { %v950_v31 = vpop.f32.mrf.mxu2  ;;  %970 = vadd.xlane.f32.xlu2 %v969_v56 }
 0x95a   :  { %v951_v53 = vadd.f32 %v2338_v45, %v950_v31 }
 0x95c   :  { %v965_v54 = vadd.f32 %v964_v26, %v951_v53  ;;  %v2340_v26 = vld [vmem:[%s3471_s21] ss:$0 sm:$0xff] }
 0x95e   :  { %v968_v1 = vadd.f32 %v965_v54, %v2875_v58 }
 0x960   :  { %v972_v57 = vsel %vm172_vm0, %v968_v1, 0.0 }
 0x961   :  { %973 = vadd.xlane.f32.xlu2 %v972_v57 }
 0x9cc   :  { %v971_v59 = vpop.xlane.xlu2 %970 }
 0x9cd   :  { %v975_v37 = vmul.f32 %v971_v59, %v2725_v10 }
 0x9cf   :  { %v3059_v20 = vsub.f32 %v967_v52, %v975_v37  ;;  %v2339_v52 = vld [vmem:[%s3470_s17] ss:$0 sm:$0xff] }
 0x9d1   :  { %v979_v60 = vmul.f32 %v3059_v20, %v3059_v20 }
 0x9d3   :  { %v981_v61 = vsel %vm172_vm0, %v979_v60, 0.0 }
 0x9d4   :  { %982 = vadd.xlane.f32.xlu2 %v981_v61  ;;  %v974_v58 = vpop.xlane.xlu2 %973 }
 0x9d5   :  { %v976_v62 = vmul.f32 %v974_v58, %v2725_v10 }
 0x9d7   :  { %v3065_v63 = vsub.f32 %v968_v1, %v976_v62 }
 0x9d9   :  { %v980_v0 = vmul.f32 %v3065_v63, %v3065_v63 }
 0x9db   :  { %v984_v5 = vsel %vm172_vm0, %v980_v0, 0.0 }
 0x9dc   :  { %985 = vadd.xlane.f32.xlu2 %v984_v5 }
 0xa47   :  { %v983_v2 = vpop.xlane.xlu2 %982 }
 0xa48   :  { %v987_v55 = vmul.f32 %v983_v2, %v2725_v10 }
 0xa4a   :  { %v989_v8 = vadd.f32 1e-12, %v987_v55 }
 0xa4c   :  { %2389 = vrsqrt.f32 %v989_v8  ;;  %vm997_vm11 = vweird.f32 %v989_v8 }
 0xa4f   :  { %v986_v44 = vpop.xlane.xlu2 %985 }
 0xa50   :  { %v988_v34 = vmul.f32 %v986_v44, %v2725_v10 }
 0xa52   :  { %v2390_v35 = vpop.eup %2389  ;;  %v990_v36 = vadd.f32 1e-12, %v988_v34 }
 0xa53   :  { %v992_v40 = vmul.f32 %v2390_v35, %v989_v8  ;;  %vm998_vm7 = vweird.f32 %v2390_v35 }
 0xa54   :  { %2391 = vrsqrt.f32 %v990_v36  ;;  %vm999_vm12 = vmor %vm997_vm11, %vm998_vm7  ;;  %vm1007_vm14 = vweird.f32 %v990_v36 }
 0xa55   :  { %v993_v27 = vmul.f32 %v2390_v35, %v992_v40 }
 0xa57   :  { %v994_v41 = vmul.f32 0.5, %v993_v27 }
 0xa59   :  { %v995_v4 = vsub.f32 1.5, %v994_v41 }
 0xa5a   :  { %v2392_v42 = vpop.eup %2391 }
 0xa5b   :  { %v996_v16 = vmul.f32 %v2390_v35, %v995_v4  ;;  %v1002_v45 = vmul.f32 %v2392_v42, %v990_v36  ;;  %vm1008_vm13 = vweird.f32 %v2392_v42 }
 0xa5c   :  { %vm1009_vm15 = vmor %vm1007_vm14, %vm1008_vm13 }
 0xa5d   :  { %v1003_v46 = vmul.f32 %v2392_v42, %v1002_v45  ;;  %v1000_v48 = vsel %vm999_vm12, %v2390_v35, %v996_v16 }
 0xa5e   :  { %v1011_v31 = vmul.f32 %v1000_v48, %v3059_v20  ;;  %v1039_v20 = vld [vmem:[%s3472_s25] sm:$0x3] }
 0xa5f   :  { %v1004_v49 = vmul.f32 0.5, %v1003_v46  ;;  %v1113_v61 = vperm.slane %v1039_v20, 0  ;;  %v1114_v5 = vperm.slane %v1039_v20, 1 }
 0xa60   :  { %v1016_v54 = vmul.f32 %v2339_v52, %v1011_v31 }
 0xa61   :  { %v1005_v50 = vsub.f32 1.5, %v1004_v49 }
 0xa62   :  { %v3092_v59 = vadd.f32 %v2340_v26, %v1016_v54 }
 0xa63   :  { %v1006_v53 = vmul.f32 %v2392_v42, %v1005_v50 }
 0xa65   :  { %v1010_v56 = vsel %vm1009_vm15, %v2392_v42, %v1006_v53 }
 0xa66   :  { %v1012_v1 = vmul.f32 %v1010_v56, %v3065_v63 }
 0xa68   :  { %v1017_v57 = vmul.f32 %v2339_v52, %v1012_v1 }
 0xa6a   :  { %v3094_v37 = vadd.f32 %v2340_v26, %v1017_v57 }
 0xa6c   :  { %v1103_v60 = vpack.c.bf16 %v3094_v37, %v3092_v59 }
 0xa6e   :  { %2250 = vmatmul.msk.bf16.vlgmr.msrb.gmra.mxu1 %vm172_vm0, %v1103_v60  ;;  %2251 = vmatmul.msk.bf16.vlgmr.msra.gmra.mxu3 %vm172_vm0, %v1103_v60 }
 0xaeb   :  { %v1129_v58 = vpop.f32.mrf.mxu1 }
 0xaec   :  { %v1130_v62 = vadd.f32 %v1129_v58, %v1113_v61 }
 0xaee   :  { %v1148_v0 = vpack.c.bf16 %v1130_v62, %v1130_v62 }
 0xaf0   :  { %1205 = vrot.lane.b32.xlu2 %v1148_v0, %s2508_s9  ;;  %1207 = vrot.lane.b32.xlu1 %v1148_v0, %s2506_s0 }
 0xaf1   :  { %v1143_v63 = vpop.f32.mrf.mxu3 }
 0xaf2   :  { %v1144_v6 = vadd.f32 %v1143_v63, %v1114_v5 }
 0xaf3   :  { %v1131_v9 = vpop.f32.mrf.mxu1 }
 0xaf4   :  { %v1185_v11 = vpack.c.bf16 %v1144_v6, %v1144_v6  ;;  %v1132_v24 = vadd.f32 %v1131_v9, %v1113_v61 }
 0xaf6   :  { %v1190_v47 = vsel %vm406_vm8, %v1185_v11, 0  ;;  %v1269_v12 = vpack.c.bf16 %v1132_v24, %v1132_v24 }
 0xaf7   :  { %1199 = vmatpush.bf16.msrb.mxu3 %v1190_v47 }
 0xaf8   :  { %1328 = vrot.lane.b32.xlu0 %v1269_v12, %s2506_s0  ;;  %1271 = vrot.lane.b32.xlu2 %v1269_v12, %s2507_s5 }
 0xaf9   :  { %1326 = vrot.lane.b32.xlu1 %v1269_v12, %s2508_s9  ;;  %v1145_v13 = vpop.f32.mrf.mxu3 }
 0xafa   :  { %v1146_v51 = vadd.f32 %v1145_v13, %v1114_v5 }
 0xafc   :  { %v3107_v14 = vpack.c.bf16 %v1146_v51, %v1146_v51 }
 0xafe   :  { %v1311_v15 = vsel %vm406_vm8, %v3107_v14, 0 }
 0xaff   :  { %1320 = vmatpush.bf16.msra.mxu3 %v1311_v15 }
 0xb00   :  { %1150 = vrot.lane.b32.xlu0 %v1148_v0, %s2507_s5  ;;  %s2455_s5 = scalar_lea.hbm %s2719_s27, 2 }
 0xb4a   :  { %v1206_v2 = vpop.permute.xlu2 %1205 }
 0xb52   :  { %v1272_v7 = vpop.permute.xlu2 %1271 }
 0xb53   :  { %v1277_v23 = vsel %vm366_vm9, %v1272_v7, 0 }
 0xb62   :  { %v1208_v17 = vpop.permute.xlu1 %1207 }
 0xb63   :  { %v1213_v18 = vsel %vm366_vm9, %v1208_v17, 0 }
 0xb64   :  { %1222 = vmatpush.bf16.xpose.msra.mxu2 %v1213_v18 }
 0xb6a   :  { %v1329_v21 = vpop.permute.xlu0 %1328 }
 0xb6b   :  { %v1334_v19 = vsel %vm366_vm9, %v1329_v21, 0  ;;  %2254 = vmatmul.msk.bf16.vlgmr.msra.gmra.mxu2 %vm366_vm9, %v1206_v2  ;;  %v1327_v39 = vpop.permute.xlu1 %1326 }
 0xb6c   :  { %1343 = vmatpush.bf16.xpose.msrb.mxu2 %v1334_v19 }
 0xb72   :  { %v1151_v55 = vpop.permute.xlu0 %1150 }
 0xb73   :  { %v1156_v22 = vsel %vm366_vm9, %v1151_v55, 0 }
 0xb74   :  { %1165 = vmatpush.bf16.xpose.msra.mxu1 %v1156_v22 }
 0xb7b   :  { %2252 = vmatmul.msk.bf16.vlgmr.msra.gmra.mxu1 %vm366_vm9, %v1148_v0  ;;  %2258 = vmatmul.msk.bf16.vlgmr.msrb.gmra.mxu2 %vm366_vm9, %v1327_v39 }
 0xb7c   :  { %1286 = vmatpush.bf16.xpose.msrb.mxu1 %v1277_v23 }
 0xb8b   :  { %2256 = vmatmul.msk.bf16.vlgmr.msrb.gmra.mxu1 %vm366_vm9, %v1269_v12 }
 0xbee   :  { %v1224_v8 = vpop.f32.mrf.mxu2 }
 0xbef   :  { %v1228_v25 = vmul.f32 0.17677669, %v1224_v8 }
 0xbf1   :  { %v1229_v30 = vadd.f32 %v1228_v25, %v2788_v38 }
 0xbf3   :  { %v1230_v28 = vsel %vm389_vm10, %v1229_v30, -inf }
 0xbf4   :  { %1231 = vmax.xlane.f32.xlu1 %v1230_v28 }
 0xbf6   :  { %v1226_v43 = vpop.f32.mrf.mxu2 }
 0xbf7   :  { %v1046_v43 = vld [vmem:[%s3473_s29 + $0x30] sm:$0xff] }
 0xbf8   :  { %v1167_v32 = vpop.f32.mrf.mxu1 }
 0xbf9   :  { %v1171_v33 = vmul.f32 0.17677669, %v1167_v32  ;;  %v1047_v32 = vld [vmem:[%s3473_s29 + $0x38] sm:$0xff] }
 0xbfb   :  { %v1172_v44 = vadd.f32 %v1171_v33, %v2788_v38  ;;  %v1044_v33 = vld [vmem:[%s3473_s29 + $0x20] sm:$0xff] }
 0xbfd   :  { %v1173_v34 = vsel %vm389_vm10, %v1172_v44, -inf }
 0xbfe   :  { %1174 = vmax.xlane.f32.xlu2 %v1173_v34  ;;  %v1345_v35 = vpop.f32.mrf.mxu2  ;;  %v1045_v34 = vld [vmem:[%s3473_s29 + $0x28] sm:$0xff] }
 0xbff   :  { %v1349_v36 = vmul.f32 0.17677669, %v1345_v35 }
 0xc00   :  { %v1169_v40 = vpop.f32.mrf.mxu1 }
 0xc01   :  { %v1350_v27 = vadd.f32 %v1349_v36, %v2803_v3  ;;  %v1393_v36 = vpack.c.bf16 %v1045_v34, %v1044_v33  ;;  %v1042_v40 = vld [vmem:[%s3473_s29 + $0x10] sm:$0xff] }
 0xc02   :  { %v1053_v33 = vld [vmem:[%s3475_s8 + $0x10] sm:$0xff] }
 0xc03   :  { %v1351_v41 = vsel %vm389_vm10, %v1350_v27, -inf }
 0xc04   :  { %1352 = vmax.xlane.f32.xlu0 %v1351_v41 }
 0xc06   :  { %v1347_v4 = vpop.f32.mrf.mxu2 }
 0xc08   :  { %v1288_v42 = vpop.f32.mrf.mxu1 }
 0xc09   :  { %v1292_v16 = vmul.f32 0.17677669, %v1288_v42 }
 0xc0b   :  { %v1293_v45 = vadd.f32 %v1292_v16, %v2803_v3 }
 0xc0d   :  { %v1294_v46 = vsel %vm389_vm10, %v1293_v45, -inf }
 0xc0e   :  { %1295 = vmax.xlane.f32.xlu1 %v1294_v46  ;;  %v1040_v46 = vld [vmem:[%s3473_s29] sm:$0xff] }
 0xc10   :  { %v1290_v38 = vpop.f32.mrf.mxu1 }
 0xc11   :  { %v1041_v38 = vld [vmem:[%s3473_s29 + $0x8] sm:$0xff] }
 0xc16   :  { %1243 = vrot.lane.b32.xlu2 %v1185_v11, %s2508_s9 }
 0xc67   :  { %v1232_v48 = vpop.xlane.xlu1 %1231 }
 0xc68   :  { %v1233_v49 = vsub.f32 %v1229_v30, %v1232_v48  ;;  %v1391_v48 = vpack.c.bf16 %v1041_v38, %v1040_v46 }
 0xc6a   :  { %v1234_v50 = vmul.f32 1.442695, %v1233_v49 }
 0xc6c   :  { %2393 = vpow2.f32 %v1234_v50 }
 0xc71   :  { %v1175_v52 = vpop.xlane.xlu2 %1174 }
 0xc72   :  { %v2394_v31 = vpop.eup %2393  ;;  %v1176_v1 = vsub.f32 %v1172_v44, %v1175_v52  ;;  %v1394_v44 = vpack.c.bf16 %v1047_v32, %v1046_v43  ;;  %v1051_v32 = vld [vmem:[%s3475_s8] sm:$0xff] }
 0xc73   :  { %v1236_v53 = vsel %vm389_vm10, %v2394_v31, 0.0  ;;  %v1472_v34 = vpack.c.bf16 %v1053_v33, %v1051_v32 }
 0xc74   :  { %1237 = vadd.xlane.f32.xlu0 %v1236_v53  ;;  %v1177_v60 = vmul.f32 1.442695, %v1176_v1  ;;  %1405 = vmatpush.bf16.msra.mxu1 %v1394_v44  ;;  %v1052_v44 = vld [vmem:[%s3475_s8 + $0x8] sm:$0xff] }
 0xc77   :  { %v1353_v56 = vpop.xlane.xlu0 %1352 }
 0xc78   :  { %v1354_v26 = vsub.f32 %v1350_v27, %v1353_v56  ;;  %v1043_v27 = vld [vmem:[%s3473_s29 + $0x18] sm:$0xff]  ;;  %1406 = vmatpush.bf16.msra.mxu1 %v1393_v36 }
 0xc79   :  { %v1244_v54 = vpop.permute.xlu2 %1243  ;;  %v1392_v41 = vpack.c.bf16 %v1043_v27, %v1042_v40 }
 0xc7a   :  { %v1355_v3 = vmul.f32 1.442695, %v1354_v26  ;;  %v1249_v57 = vsel %vm406_vm8, %v1244_v54, 0  ;;  %v2341_v26 = vld [vmem:[%s3474_s3] ss:$0 sm:$0xff] }
 0xc7b   :  { %1258 = vmatpush.bf16.msra.mxu0 %v1249_v57 }
 0xc7c   :  { %2395 = vpow2.f32 %v1355_v3  ;;  %1407 = vmatpush.bf16.msra.mxu1 %v1392_v41 }
 0xc7d   :  { %2397 = vpow2.f32 %v1177_v60 }
 0xc80   :  { %1408 = vmatpush.bf16.msra.mxu1 %v1391_v48 }
 0xc81   :  { %v1296_v20 = vpop.xlane.xlu1 %1295 }
 0xc82   :  { %v2396_v61 = vpop.eup %2395  ;;  %v1297_v58 = vsub.f32 %v1293_v45, %v1296_v20 }
 0xc83   :  { %v1357_v62 = vsel %vm389_vm10, %v2396_v61, 0.0  ;;  %v2398_v5 = vpop.eup %2397 }
 0xc84   :  { %1358 = vadd.xlane.f32.xlu1 %v1357_v62  ;;  %v1298_v0 = vmul.f32 1.442695, %v1297_v58  ;;  %v1179_v63 = vsel %vm389_vm10, %v2398_v5, 0.0 }
 0xc86   :  { %2399 = vpow2.f32 %v1298_v0 }
 0xc88   :  { %1364 = vrot.lane.b32.xlu0 %v3107_v14, %s2508_s9 }
 0xc8c   :  { %1180 = vadd.xlane.f32.xlu1 %v1179_v63  ;;  %v2400_v6 = vpop.eup %2399 }
 0xc8d   :  { %v1300_v9 = vsel %vm389_vm10, %v2400_v6, 0.0 }
 0xc94   :  { %1301 = vadd.xlane.f32.xlu1 %v1300_v9 }
 0xce7   :  { %v1238_v11 = vpop.xlane.xlu0 %1237 }
 0xce8   :  { %2401 = vrcp.f32 %v1238_v11 }
 0xcee   :  { %v2402_v24 = vpop.eup %2401 }
 0xcef   :  { %v1240_v47 = vmul.f32 %v2402_v24, %v2394_v31 }
 0xcf1   :  { %v1241_v12 = vpack.c.bf16 %v1240_v47, %v1240_v47  ;;  %v1063_v47 = vld [vmem:[%s3475_s8 + $0x60] sm:$0xff] }
 0xcf3   :  { %2255 = vmatmul.msk.bf16.vlgmr.msra.gmra.mxu0 %vm389_vm10, %v1241_v12  ;;  %v1065_v12 = vld [vmem:[%s3475_s8 + $0x70] sm:$0xff] }
 0xcf7   :  { %v1359_v13 = vpop.xlane.xlu1 %1358 }
 0xcf8   :  { %2403 = vrcp.f32 %v1359_v13  ;;  %v1064_v13 = vld [vmem:[%s3475_s8 + $0x68] sm:$0xff] }
 0xcfa   :  { %v1365_v51 = vpop.permute.xlu0 %1364 }
 0xcfb   :  { %v1370_v14 = vsel %vm406_vm8, %v1365_v51, 0  ;;  %v1478_v51 = vpack.c.bf16 %v1065_v12, %v1063_v47 }
 0xcfc   :  { %1379 = vmatpush.bf16.msrb.mxu0 %v1370_v14  ;;  %v1066_v14 = vld [vmem:[%s3475_s8 + $0x78] sm:$0xff] }
 0xcfe   :  { %v2404_v15 = vpop.eup %2403 }
 0xcff   :  { %v1361_v17 = vmul.f32 %v2404_v15, %v2396_v61  ;;  %v1181_v18 = vpop.xlane.xlu1 %1180  ;;  %v1479_v15 = vpack.c.bf16 %v1066_v14, %v1064_v13 }
 0xd00   :  { %2405 = vrcp.f32 %v1181_v18  ;;  %v1061_v18 = vld [vmem:[%s3475_s8 + $0x50] sm:$0xff] }
 0xd01   :  { %v1362_v2 = vpack.c.bf16 %v1361_v17, %v1361_v17  ;;  %1506 = vmatpush.bf16.msra.mxu2 %v1479_v15  ;;  %v1059_v17 = vld [vmem:[%s3475_s8 + $0x40] sm:$0xff] }
 0xd03   :  { %2259 = vmatmul.msk.bf16.vlgmr.msrb.gmra.mxu0 %vm389_vm10, %v1362_v2  ;;  %v1060_v2 = vld [vmem:[%s3475_s8 + $0x48] sm:$0xff] }
 0xd06   :  { %v2406_v21 = vpop.eup %2405 }
 0xd07   :  { %v1183_v19 = vmul.f32 %v2406_v21, %v2398_v5  ;;  %v1302_v55 = vpop.xlane.xlu1 %1301  ;;  %v1476_v21 = vpack.c.bf16 %v1061_v18, %v1059_v17 }
 0xd08   :  { %2407 = vrcp.f32 %v1302_v55 }
 0xd09   :  { %v1184_v7 = vpack.c.bf16 %v1183_v19, %v1183_v19  ;;  %v1062_v19 = vld [vmem:[%s3475_s8 + $0x58] sm:$0xff] }
 0xd0b   :  { %2253 = vmatmul.msk.bf16.vlgmr.msrb.gmra.mxu3 %vm389_vm10, %v1184_v7  ;;  %v1477_v7 = vpack.c.bf16 %v1062_v19, %v1060_v2 }
 0xd0c   :  { %1492 = vmatpush.bf16.msrb.mxu3 %v1478_v51 }
 0xd0d   :  { %1507 = vmatpush.bf16.msra.mxu2 %v1477_v7 }
 0xd0e   :  { %v2408_v22 = vpop.eup %2407 }
 0xd0f   :  { %v1304_v23 = vmul.f32 %v2408_v22, %v2400_v6  ;;  %v1055_v22 = vld [vmem:[%s3475_s8 + $0x20] sm:$0xff] }
 0xd10   :  { %1493 = vmatpush.bf16.msrb.mxu3 %v1476_v21 }
 0xd11   :  { %v1305_v39 = vpack.c.bf16 %v1304_v23, %v1304_v23  ;;  %v1057_v23 = vld [vmem:[%s3475_s8 + $0x30] sm:$0xff] }
 0xd1b   :  { %2257 = vmatmul.msk.bf16.vlgmr.msra.gmra.mxu3 %vm389_vm10, %v1305_v39  ;;  %v1056_v39 = vld [vmem:[%s3475_s8 + $0x28] sm:$0xff] }
 0xd70   :  { %v1260_v8 = vpop.f32.mrf.mxu0 }
 0xd78   :  { %v1262_v25 = vpop.f32.mrf.mxu0 }
 0xd79   :  { %v1474_v25 = vpack.c.bf16 %v1057_v23, %v1055_v22  ;;  %v1082_v22 = vld [vmem:[%s3479_s30 + $0x70] sm:$0xff]  ;;  %v1083_v23 = vld [vmem:[%s3479_s30 + $0x78] sm:$0xff] }
 0xd7b   :  { %1494 = vmatpush.bf16.msrb.mxu3 %v1474_v25 }
 0xd7f   :  { %1495 = vmatpush.bf16.msrb.mxu3 %v1472_v34  ;;  %v1081_v34 = vld [vmem:[%s3479_s30 + $0x68] sm:$0xff] }
 0xd80   :  { %v1381_v30 = vpop.f32.mrf.mxu0 }
 0xd81   :  { %v2328_v28 = vpack.i.bf16 %v1381_v30, %v1260_v8  ;;  %v1058_v30 = vld [vmem:[%s3475_s8 + $0x38] sm:$0xff] }
 0xd83   :  { %2329 = vrot.lane.b32.xlu2 %v2328_v28, %s2506_s0  ;;  %v1475_v28 = vpack.c.bf16 %v1058_v30, %v1056_v39  ;;  %v1098_v39 = vld [vmem:[%s3479_s30 + $0xf0] sm:$0xff] }
 0xd85   :  { %1508 = vmatpush.bf16.msra.mxu2 %v1475_v28  ;;  %v1099_v28 = vld [vmem:[%s3479_s30 + $0xf8] sm:$0xff] }
 0xd88   :  { %v1383_v35 = vpop.f32.mrf.mxu0 }
 0xd89   :  { %v1054_v35 = vld [vmem:[%s3475_s8 + $0x18] sm:$0xff] }
 0xd8a   :  { %v1473_v36 = vpack.c.bf16 %v1054_v35, %v1052_v44  ;;  %v1080_v44 = vld [vmem:[%s3479_s30 + $0x60] sm:$0xff] }
 0xd8b   :  { %v1096_v35 = vld [vmem:[%s3479_s30 + $0xe0] sm:$0xff] }
 0xd8c   :  { %1509 = vmatpush.bf16.msra.mxu2 %v1473_v36 }
 0xd8e   :  { %v1201_v4 = vpop.f32.mrf.mxu3 }
 0xd96   :  { %v1203_v42 = vpop.f32.mrf.mxu3 }
 0xd9e   :  { %v1322_v16 = vpop.f32.mrf.mxu3 }
 0xda6   :  { %v1324_v45 = vpop.f32.mrf.mxu3 }
 0xddd   :  { %v2330_v49 = vpop.permute.xlu2 %2329 }
 0xdde   :  { %v2332_v50 = vunpack.i.h.bf16 %v2330_v49  ;;  %v2331_v52 = vunpack.i.l.bf16 %v2330_v49 }
 0xde0   :  { %v1268_v31 = vsel %vm366_vm9, %v1201_v4, %v2331_v52  ;;  %v1389_v53 = vsel %vm366_vm9, %v1322_v16, %v2332_v50 }
 0xde1   :  { %v1390_v56 = vpack.c.bf16 %v1389_v53, %v1268_v31 }
 0xde3   :  { %2260 = vmatmul.msk.bf16.vlgmr.msra.gmra.mxu1 %vm172_vm0, %v1390_v56  ;;  %v2342_v56 = vld [vmem:[%s3476_s14] ss:$0 sm:$0xff] }
 0xe60   :  { %v1410_v54 = vpop.f32.mrf.mxu1 }
 0xe61   :  { %v1411_v1 = vadd.f32 %v2341_v26, %v1410_v54 }
 0xe63   :  { %v1415_v3 = vadd.f32 %v1411_v1, %v3092_v59 }
 0xe65   :  { %v1417_v57 = vsel %vm172_vm0, %v1415_v3, 0.0 }
 0xe66   :  { %1418 = vadd.xlane.f32.xlu0 %v1417_v57 }
 0xe68   :  { %v1412_v60 = vpop.f32.mrf.mxu1 }
 0xe69   :  { %v1413_v20 = vadd.f32 %v2341_v26, %v1412_v60 }
 0xe6b   :  { %v1416_v61 = vadd.f32 %v1413_v20, %v3094_v37 }
 0xe6d   :  { %v1420_v58 = vsel %vm172_vm0, %v1416_v61, 0.0 }
 0xe6e   :  { %1421 = vadd.xlane.f32.xlu1 %v1420_v58 }
 0xed9   :  { %v1419_v62 = vpop.xlane.xlu0 %1418 }
 0xeda   :  { %v1423_v0 = vmul.f32 %v1419_v62, %v2725_v10 }
 0xedc   :  { %v3159_v5 = vsub.f32 %v1415_v3, %v1423_v0  ;;  %v2343_v3 = vld [vmem:[%s3477_s19] ss:$0 sm:$0xff] }
 0xedd   :  { %v1067_v0 = vld [vmem:[%s3478_s24] sm:$0x3] }
 0xede   :  { %v1427_v59 = vmul.f32 %v3159_v5, %v3159_v5 }
 0xee0   :  { %v1429_v63 = vsel %vm172_vm0, %v1427_v59, 0.0  ;;  %v1482_v59 = vperm.slane %v1067_v0, 1 }
 0xee1   :  { %v1422_v6 = vpop.xlane.xlu1 %1421  ;;  %1430 = vadd.xlane.f32.xlu2 %v1429_v63 }
 0xee2   :  { %v1424_v37 = vmul.f32 %v1422_v6, %v2725_v10 }
 0xee4   :  { %v3165_v9 = vsub.f32 %v1416_v61, %v1424_v37 }
 0xee6   :  { %v1428_v11 = vmul.f32 %v3165_v9, %v3165_v9 }
 0xee8   :  { %v1432_v24 = vsel %vm172_vm0, %v1428_v11, 0.0 }
 0xee9   :  { %1433 = vadd.xlane.f32.xlu1 %v1432_v24 }
 0xf54   :  { %v1431_v55 = vpop.xlane.xlu2 %1430 }
 0xf55   :  { %v1435_v8 = vmul.f32 %v1431_v55, %v2725_v10 }
 0xf57   :  { %v1437_v43 = vadd.f32 1e-12, %v1435_v8 }
 0xf59   :  { %2409 = vrsqrt.f32 %v1437_v43  ;;  %vm1445_vm2 = vweird.f32 %v1437_v43 }
 0xf5c   :  { %v1434_v40 = vpop.xlane.xlu1 %1433 }
 0xf5d   :  { %v1436_v27 = vmul.f32 %v1434_v40, %v2725_v10 }
 0xf5f   :  { %v2410_v41 = vpop.eup %2409  ;;  %v1438_v4 = vadd.f32 1e-12, %v1436_v27  ;;  %v1701_v27 = vpack.c.bf16 %v1083_v23, %v1082_v22 }
 0xf60   :  { %v1440_v42 = vmul.f32 %v2410_v41, %v1437_v43  ;;  %vm1446_vm1 = vweird.f32 %v2410_v41 }
 0xf61   :  { %2411 = vrsqrt.f32 %v1438_v4  ;;  %vm1447_vm3 = vmor %vm1445_vm2, %vm1446_vm1  ;;  %vm1455_vm5 = vweird.f32 %v1438_v4  ;;  %1713 = vmatpush.bf16.msra.mxu0 %v1701_v27 }
 0xf62   :  { %v1441_v16 = vmul.f32 %v2410_v41, %v1440_v42 }
 0xf64   :  { %v1442_v45 = vmul.f32 0.5, %v1441_v16 }
 0xf66   :  { %v1443_v46 = vsub.f32 1.5, %v1442_v45 }
 0xf67   :  { %v2412_v38 = vpop.eup %2411 }
 0xf68   :  { %v1444_v48 = vmul.f32 %v2410_v41, %v1443_v46  ;;  %v1450_v49 = vmul.f32 %v2412_v38, %v1438_v4  ;;  %vm1456_vm4 = vweird.f32 %v2412_v38  ;;  %v1097_v4 = vld [vmem:[%s3479_s30 + $0xe8] sm:$0xff]  ;;  %v1700_v46 = vpack.c.bf16 %v1081_v34, %v1080_v44 }
 0xf69   :  { %vm1457_vm6 = vmor %vm1455_vm5, %vm1456_vm4 }
 0xf6a   :  { %v1451_v50 = vmul.f32 %v2412_v38, %v1450_v49  ;;  %v1448_v52 = vsel %vm1447_vm3, %v2410_v41, %v1444_v48  ;;  %v1709_v41 = vpack.c.bf16 %v1099_v28, %v1098_v39  ;;  %1714 = vmatpush.bf16.msra.mxu0 %v1700_v46  ;;  %v1093_v46 = vld [vmem:[%s3479_s30 + $0xc8] sm:$0xff] }
 0xf6b   :  { %v1459_v26 = vmul.f32 %v1448_v52, %v3159_v5  ;;  %v1481_v5 = vperm.slane %v1067_v0, 0 }
 0xf6c   :  { %v1452_v31 = vmul.f32 0.5, %v1451_v50  ;;  %1727 = vmatpush.bf16.msrb.mxu1 %v1709_v41 }
 0xf6d   :  { %v1464_v57 = vmul.f32 %v2342_v56, %v1459_v26 }
 0xf6e   :  { %v1453_v53 = vsub.f32 1.5, %v1452_v31  ;;  %v1078_v31 = vld [vmem:[%s3479_s30 + $0x50] sm:$0xff] }
 0xf6f   :  { %v3192_v61 = vadd.f32 %v2343_v3, %v1464_v57 }
 0xf70   :  { %v1454_v54 = vmul.f32 %v2412_v38, %v1453_v53  ;;  %v1079_v53 = vld [vmem:[%s3479_s30 + $0x58] sm:$0xff] }
 0xf72   :  { %v1458_v1 = vsel %vm1457_vm6, %v2412_v38, %v1454_v54  ;;  %v1708_v38 = vpack.c.bf16 %v1097_v4, %v1096_v35  ;;  %v1076_v4 = vld [vmem:[%s3479_s30 + $0x40] sm:$0xff] }
 0xf73   :  { %v1460_v60 = vmul.f32 %v1458_v1, %v3165_v9 }
 0xf74   :  { %1728 = vmatpush.bf16.msrb.mxu1 %v1708_v38 }
 0xf75   :  { %v1465_v20 = vmul.f32 %v2342_v56, %v1460_v60 }
 0xf77   :  { %v3194_v58 = vadd.f32 %v2343_v3, %v1465_v20  ;;  %v1699_v20 = vpack.c.bf16 %v1079_v53, %v1078_v31 }
 0xf79   :  { %v1471_v62 = vpack.c.bf16 %v3194_v58, %v3192_v61  ;;  %1715 = vmatpush.bf16.msra.mxu0 %v1699_v20 }
 0xf7b   :  { %2261 = vmatmul.msk.bf16.vlgmr.msrb.gmra.mxu3 %vm172_vm0, %v1471_v62  ;;  %2262 = vmatmul.msk.bf16.vlgmr.msra.gmra.mxu2 %vm172_vm0, %v1471_v62 }
 0xffe   :  { %v1497_v63 = vpop.f32.mrf.mxu3  ;;  %v1511_v6 = vpop.f32.mrf.mxu2 }
 0xfff   :  { %v3201_v37 = vadd.f32 %v1497_v63, %v1481_v5  ;;  %v3203_v9 = vadd.f32 %v1511_v6, %v1482_v59  ;;  %v1094_v63 = vld [vmem:[%s3479_s30 + $0xd0] sm:$0xff]  ;;  %v1095_v6 = vld [vmem:[%s3479_s30 + $0xd8] sm:$0xff] }
0x1001   :  { %v3207_v11 = vmul.f32 %v3201_v37, %v2882_v29  ;;  %v3211_v24 = vmul.f32 %v3203_v9, %v2882_v29 }
0x1003   :  { %v1524_v47 = vmul.f32 %v3207_v11, %v3207_v11  ;;  %v1564_v12 = vmul.f32 %v3211_v24, %v3211_v24 }
0x1005   :  { %v3217_v13 = vmin.f32 %v1524_v47, 16.0  ;;  %v3219_v51 = vmin.f32 %v1564_v12, 16.0 }
0x1006   :  { %v1499_v14 = vpop.f32.mrf.mxu3  ;;  %v1513_v15 = vpop.f32.mrf.mxu2 }
0x1007   :  { %v1526_v17 = vmul.f32 2.1237322e-06, %v3217_v13  ;;  %v1537_v18 = vmul.f32 3.8918573e-05, %v3217_v13  ;;  %v3223_v2 = vadd.f32 %v1499_v14, %v1481_v5  ;;  %v1577_v21 = vmul.f32 3.8918573e-05, %v3219_v51 }
0x1008   :  { %v3226_v19 = vadd.f32 %v1513_v15, %v1482_v59  ;;  %v1566_v8 = vmul.f32 2.1237322e-06, %v3219_v51 }
0x1009   :  { %v1538_v7 = vadd.f32 0.001143296, %v1537_v18  ;;  %v3230_v55 = vmul.f32 %v3223_v2, %v2882_v29  ;;  %v1578_v25 = vadd.f32 0.001143296, %v1577_v21  ;;  %v1527_v43 = vadd.f32 0.00028619796, %v1526_v17 }
0x100a   :  { %v3238_v30 = vmul.f32 %v3226_v19, %v2882_v29  ;;  %v1567_v50 = vadd.f32 0.00028619796, %v1566_v8 }
0x100b   :  { %v1539_v32 = vmul.f32 %v1538_v7, %v3217_v13  ;;  %v1604_v33 = vmul.f32 %v3230_v55, %v3230_v55  ;;  %v1579_v36 = vmul.f32 %v1578_v25, %v3219_v51  ;;  %v1528_v48 = vmul.f32 %v1527_v43, %v3217_v13 }
0x100c   :  { %v1644_v40 = vmul.f32 %v3238_v30, %v3238_v30  ;;  %v1568_v5 = vmul.f32 %v1567_v50, %v3219_v51  ;;  %v1707_v7 = vpack.c.bf16 %v1095_v6, %v1094_v63  ;;  %v1075_v50 = vld [vmem:[%s3479_s30 + $0x38] sm:$0xff] }
0x100d   :  { %v1540_v42 = vadd.f32 0.014752088, %v1539_v32  ;;  %v1580_v16 = vadd.f32 0.014752088, %v1579_v36  ;;  %v3251_v45 = vmin.f32 %v1604_v33, 16.0 }
0x100e   :  { %v3255_v52 = vmin.f32 %v1644_v40, 16.0  ;;  %v1529_v62 = vadd.f32 0.0036580483, %v1528_v48  ;;  %v1569_v39 = vadd.f32 0.0036580483, %v1568_v5  ;;  %1729 = vmatpush.bf16.msrb.mxu1 %v1707_v7  ;;  %v1089_v7 = vld [vmem:[%s3479_s30 + $0xa8] sm:$0xff] }
0x100f   :  { %v1541_v49 = vmul.f32 %v1540_v42, %v3217_v13  ;;  %v1581_v56 = vmul.f32 %v1580_v16, %v3219_v51  ;;  %v1606_v26 = vmul.f32 2.1237322e-06, %v3251_v45  ;;  %v1617_v54 = vmul.f32 3.8918573e-05, %v3251_v45  ;;  %v1077_v42 = vld [vmem:[%s3479_s30 + $0x48] sm:$0xff]  ;;  %v1092_v16 = vld [vmem:[%s3479_s30 + $0xc0] sm:$0xff] }
0x1010   :  { %v1646_v59 = vmul.f32 2.1237322e-06, %v3255_v52  ;;  %v1657_v15 = vmul.f32 3.8918573e-05, %v3255_v52  ;;  %v1530_v22 = vmul.f32 %v1529_v62, %v3217_v13  ;;  %v1570_v40 = vmul.f32 %v1569_v39, %v3219_v51 }
0x1011   :  { %v1542_v1 = vadd.f32 0.112945676, %v1541_v49  ;;  %v1582_v3 = vadd.f32 0.112945676, %v1581_v56  ;;  %v1607_v57 = vadd.f32 0.00028619796, %v1606_v26  ;;  %v1698_v26 = vpack.c.bf16 %v1077_v42, %v1076_v4 }
0x1012   :  { %v1618_v60 = vadd.f32 0.001143296, %v1617_v54  ;;  %v1647_v8 = vadd.f32 0.00028619796, %v1646_v59  ;;  %v1658_v32 = vadd.f32 0.001143296, %v1657_v15  ;;  %v1706_v20 = vpack.c.bf16 %v1093_v46, %v1092_v16 }
0x1013   :  { %v1543_v0 = vmul.f32 %v1542_v1, %v3217_v13  ;;  %v1583_v47 = vmul.f32 %v1582_v3, %v3219_v51  ;;  %v1608_v12 = vmul.f32 %v1607_v57, %v3251_v45  ;;  %v1531_v36 = vadd.f32 0.05243302, %v1530_v22  ;;  %v1074_v49 = vld [vmem:[%s3479_s30 + $0x30] sm:$0xff]  ;;  %v1091_v1 = vld [vmem:[%s3479_s30 + $0xb8] sm:$0xff]  ;;  %1716 = vmatpush.bf16.msra.mxu0 %v1698_v26  ;;  %v1068_v26 = vld [vmem:[%s3479_s30] sm:$0xff] }
0x1014   :  { %v1619_v14 = vmul.f32 %v1618_v60, %v3251_v45  ;;  %v1659_v35 = vmul.f32 %v1658_v32, %v3255_v52  ;;  %v1648_v27 = vmul.f32 %v1647_v8, %v3255_v52  ;;  %v1571_v53 = vadd.f32 0.05243302, %v1570_v40  ;;  %v1090_v54 = vld [vmem:[%s3479_s30 + $0xb0] sm:$0xff]  ;;  %1730 = vmatpush.bf16.msrb.mxu1 %v1706_v20  ;;  %v1087_v42 = vld [vmem:[%s3479_s30 + $0x98] sm:$0xff]  ;;  %v1085_v20 = vld [vmem:[%s3479_s30 + $0x88] sm:$0xff] }
0x1015   :  { %v1544_v17 = vadd.f32 0.4994258, %v1543_v0  ;;  %v1584_v18 = vadd.f32 0.4994258, %v1583_v47  ;;  %v1609_v28 = vadd.f32 0.0036580483, %v1608_v12  ;;  %v1532_v31 = vmul.f32 %v1531_v36, %v3217_v13 }
0x1016   :  { %v1620_v21 = vadd.f32 0.014752088, %v1619_v14  ;;  %v1660_v48 = vadd.f32 0.014752088, %v1659_v35  ;;  %v1649_v56 = vadd.f32 0.0036580483, %v1648_v27  ;;  %v1697_v0 = vpack.c.bf16 %v1075_v50, %v1074_v49 }
0x1017   :  { %v1545_v23 = vmul.f32 %v1544_v17, %v3217_v13  ;;  %v1585_v25 = vmul.f32 %v1584_v18, %v3219_v51  ;;  %v1610_v41 = vmul.f32 %v1609_v28, %v3251_v45  ;;  %v1705_v6 = vpack.c.bf16 %v1091_v1, %v1090_v54  ;;  %v1072_v47 = vld [vmem:[%s3479_s30 + $0x20] sm:$0xff]  ;;  %v1073_v12 = vld [vmem:[%s3479_s30 + $0x28] sm:$0xff]  ;;  %v1070_v35 = vld [vmem:[%s3479_s30 + $0x10] sm:$0xff] }
0x1018   :  { %v1621_v43 = vmul.f32 %v1620_v21, %v3251_v45  ;;  %v1661_v60 = vmul.f32 %v1660_v48, %v3255_v52  ;;  %v1533_v14 = vadd.f32 0.18741608, %v1532_v31  ;;  %v1650_v17 = vmul.f32 %v1649_v56, %v3255_v52  ;;  %v1088_v21 = vld [vmem:[%s3479_s30 + $0xa0] sm:$0xff]  ;;  %1717 = vmatpush.bf16.msra.mxu0 %v1697_v0  ;;  %v1071_v36 = vld [vmem:[%s3479_s30 + $0x18] sm:$0xff]  ;;  %v1086_v4 = vld [vmem:[%s3479_s30 + $0x90] sm:$0xff] }
0x1019   :  { %v3275_v33 = vadd.f32 1.0, %v1545_v23  ;;  %v3277_v44 = vadd.f32 1.0, %v1585_v25  ;;  %v1611_v3 = vadd.f32 0.05243302, %v1610_v41  ;;  %v1572_v23 = vmul.f32 %v1571_v53, %v3219_v51  ;;  %1731 = vmatpush.bf16.msrb.mxu1 %v1705_v6  ;;  %v1069_v54 = vld [vmem:[%s3479_s30 + $0x8] sm:$0xff] }
0x101a   :  { %v1622_v34 = vadd.f32 0.112945676, %v1621_v43  ;;  %v1662_v18 = vadd.f32 0.112945676, %v1661_v60  ;;  %v1696_v28 = vpack.c.bf16 %v1073_v12, %v1072_v47  ;;  %v1534_v40 = vmul.f32 %v1533_v14, %v3217_v13  ;;  %v1084_v60 = vld [vmem:[%s3479_s30 + $0x80] sm:$0xff] }
0x101b   :  { %2413 = vrcp.f32 %v3275_v33  ;;  %v1612_v39 = vmul.f32 %v1611_v3, %v3251_v45  ;;  %v1651_v27 = vadd.f32 0.05243302, %v1650_v17  ;;  %v1558_v46 = vand.u32 2147483648, %v3275_v33 }
0x101c   :  { %2415 = vrcp.f32 %v3277_v44  ;;  %v1623_v38 = vmul.f32 %v1622_v34, %v3251_v45  ;;  %v1663_v25 = vmul.f32 %v1662_v18, %v3255_v52  ;;  %v1704_v34 = vpack.c.bf16 %v1089_v7, %v1088_v21  ;;  %1718 = vmatpush.bf16.msra.mxu0 %v1696_v28 }
0x101d   :  { %v1613_v48 = vadd.f32 0.18741608, %v1612_v39  ;;  %vm1552_vm11 = vweird.f32 %v3275_v33  ;;  %v1556_v13 = vand.u32 2147483647, %v3275_v33  ;;  %v1695_v50 = vpack.c.bf16 %v1071_v36, %v1070_v35 }
0x101e   :  { %v1624_v57 = vadd.f32 0.4994258, %v1623_v38  ;;  %v1664_v41 = vadd.f32 0.4994258, %v1663_v25  ;;  %v1573_v38 = vadd.f32 0.18741608, %v1572_v23  ;;  %1732 = vmatpush.bf16.msrb.mxu1 %v1704_v34  ;;  %v1703_v56 = vpack.c.bf16 %v1087_v42, %v1086_v4 }
0x101f   :  { %v1535_v1 = vadd.f32 1.1283791, %v1534_v40  ;;  %v1614_v6 = vmul.f32 %v1613_v48, %v3251_v45  ;;  %vm1557_vm13 = vcmp.eq.f32.partialorder %v1556_v13, 8.507059e+37  ;;  %v1694_v12 = vpack.c.bf16 %v1069_v54, %v1068_v26 }
0x1020   :  { %v1625_v63 = vmul.f32 %v1624_v57, %v3251_v45  ;;  %v1665_v49 = vmul.f32 %v1664_v41, %v3255_v52  ;;  %1719 = vmatpush.bf16.msra.mxu0 %v1695_v50  ;;  %vm1592_vm15 = vweird.f32 %v3277_v44  ;;  %v1596_v21 = vand.u32 2147483647, %v3277_v44 }
0x1021   :  { %v3296_v62 = vpop.eup %2413  ;;  %v1536_v17 = vmul.f32 %v1535_v1, %v3207_v11  ;;  %v1615_v7 = vadd.f32 1.1283791, %v1614_v6 }
0x1022   :  { %v3298_v5 = vpop.eup %2415  ;;  %v1548_v59 = vmul.f32 %v3296_v62, %v3275_v33  ;;  %v3312_v8 = vadd.f32 1.0, %v1625_v63  ;;  %vm1553_vm7 = vweird.f32 %v3296_v62  ;;  %v1652_v33 = vmul.f32 %v1651_v27, %v3255_v52  ;;  %1733 = vmatpush.bf16.msrb.mxu1 %v1703_v56 }
0x1023   :  { %v1588_v15 = vmul.f32 %v3298_v5, %v3277_v44  ;;  %vm3328_vm12 = vmor %vm1552_vm11, %vm1553_vm7  ;;  %v3339_v57 = vadd.f32 1.0, %v1665_v49  ;;  %v1574_v63 = vmul.f32 %v1573_v38, %v3219_v51  ;;  %vm1593_vm14 = vweird.f32 %v3298_v5 }
0x1024   :  { %v1549_v22 = vsub.f32 1.0, %v1548_v59  ;;  %2417 = vrcp.f32 %v3312_v8  ;;  %v1559_v59 = vor.u32 1.1754944e-38, %v1558_v46  ;;  %v1598_v51 = vand.u32 2147483648, %v3277_v44  ;;  %vm3354_vm1 = vmor %vm1592_vm15, %vm1593_vm14  ;;  %1720 = vmatpush.bf16.msra.mxu0 %v1694_v12 }
0x1025   :  { %v1589_v32 = vsub.f32 1.0, %v1588_v15  ;;  %2419 = vrcp.f32 %v3339_v57  ;;  %v1702_v15 = vpack.c.bf16 %v1085_v20, %v1084_v60  ;;  %v1653_v45 = vadd.f32 0.18741608, %v1652_v33 }
0x1026   :  { %v1550_v43 = vmul.f32 %v3296_v62, %v1549_v22  ;;  %v1638_v22 = vand.u32 2147483648, %v3312_v8  ;;  %v1636_v11 = vand.u32 2147483647, %v3312_v8  ;;  %v1575_v28 = vadd.f32 1.1283791, %v1574_v63 }
0x1027   :  { %v1590_v53 = vmul.f32 %v3298_v5, %v1589_v32  ;;  %1734 = vmatpush.bf16.msrb.mxu1 %v1702_v15  ;;  %v1599_v32 = vor.u32 1.1754944e-38, %v1598_v51  ;;  %vm1632_vm3 = vweird.f32 %v3312_v8  ;;  %v1654_v35 = vmul.f32 %v1653_v45, %v3255_v52 }
0x1028   :  { %v1551_v16 = vadd.f32 %v3296_v62, %v1550_v43  ;;  %vm1597_vm4 = vcmp.eq.f32.partialorder %v1596_v21, 8.507059e+37  ;;  %v1616_v36 = vmul.f32 %v1615_v7, %v3230_v55  ;;  %v1639_v40 = vor.u32 1.1754944e-38, %v1638_v22 }
0x1029   :  { %v1591_v14 = vadd.f32 %v3298_v5, %v1590_v53  ;;  %vm1637_vm6 = vcmp.eq.f32.partialorder %v1636_v11, 8.507059e+37  ;;  %v1655_v48 = vadd.f32 1.1283791, %v1654_v35  ;;  %v1676_v55 = vand.u32 2147483647, %v3339_v57  ;;  %v1803_v35 = vld [vmem:[%s3485_s28 + $0x30] sm:$0xff] }
0x102a   :  { %v1555_v3 = vsel %vm3328_vm12, %v3296_v62, %v1551_v16  ;;  %v2418_v0 = vpop.eup %2417  ;;  %vm1672_vm11 = vweird.f32 %v3339_v57  ;;  %v1516_v53 = vmul.f32 0.5, %v3201_v37  ;;  %v1517_v37 = vmul.f32 0.5, %v3203_v9 }
0x102b   :  { %v1628_v47 = vmul.f32 %v2418_v0, %v3312_v8  ;;  %v1560_v62 = vsel %vm1557_vm13, %v1559_v59, %v1555_v3  ;;  %vm1633_vm2 = vweird.f32 %v2418_v0  ;;  %v1595_v43 = vsel %vm3354_vm1, %v3298_v5, %v1591_v14  ;;  %v2420_v44 = vpop.eup %2419 }
0x102c   :  { %v1561_v23 = vmul.f32 %v1560_v62, %v1536_v17  ;;  %vm1634_vm5 = vmor %vm1632_vm3, %vm1633_vm2  ;;  %v1668_v27 = vmul.f32 %v2420_v44, %v3339_v57  ;;  %v1600_v4 = vsel %vm1597_vm4, %v1599_v32, %v1595_v43  ;;  %v1576_v5 = vmul.f32 %v1575_v28, %v3211_v24  ;;  %v2344_v17 = vld [vmem:[%s3484_s6] ss:$0 sm:$0xff] }
0x102d   :  { %v1629_v18 = vsub.f32 1.0, %v1628_v47  ;;  %v1678_v8 = vand.u32 2147483648, %v3339_v57  ;;  %vm1673_vm7 = vweird.f32 %v2420_v44  ;;  %v1518_v24 = vmul.f32 0.5, %v3223_v2 }
0x102e   :  { %v2263_v41 = vclamps-f32 %v1561_v23, 1.0  ;;  %v1669_v46 = vsub.f32 1.0, %v1668_v27  ;;  %v1601_v52 = vmul.f32 %v1600_v4, %v1576_v5  ;;  %vm1674_vm12 = vmor %vm1672_vm11, %vm1673_vm7  ;;  %v1656_v1 = vmul.f32 %v1655_v48, %v3238_v30  ;;  %v1801_v27 = vld [vmem:[%s3485_s28 + $0x20] sm:$0xff] }
0x102f   :  { %v1630_v25 = vmul.f32 %v2418_v0, %v1629_v18  ;;  %v1679_v26 = vor.u32 1.1754944e-38, %v1678_v8  ;;  %vm1677_vm13 = vcmp.eq.f32.partialorder %v1676_v55, 8.507059e+37  ;;  %v1519_v2 = vmul.f32 0.5, %v3226_v19  ;;  %v1797_v8 = vld [vmem:[%s3485_s28] sm:$0xff] }
0x1030   :  { %v1670_v13 = vmul.f32 %v2420_v44, %v1669_v46  ;;  %v1684_v49 = vadd.f32 1.0, %v2263_v41  ;;  %v2264_v54 = vclamps-f32 %v1601_v52, 1.0  ;;  %v1802_v41 = vld [vmem:[%s3485_s28 + $0x28] sm:$0xff]  ;;  %v1800_v46 = vld [vmem:[%s3485_s28 + $0x18] sm:$0xff] }
0x1031   :  { %v1631_v34 = vadd.f32 %v2418_v0, %v1630_v25  ;;  %v1814_v4 = vpack.c.bf16 %v1802_v41, %v1801_v27  ;;  %v1798_v52 = vld [vmem:[%s3485_s28 + $0x8] sm:$0xff] }
0x1032   :  { %v1671_v31 = vadd.f32 %v2420_v44, %v1670_v13  ;;  %v1688_v33 = vmul.f32 %v1684_v49, %v1516_v53  ;;  %v1685_v63 = vadd.f32 1.0, %v2264_v54  ;;  %v1812_v13 = vpack.c.bf16 %v1798_v52, %v1797_v8  ;;  %v1842_v49 = vld [vmem:[%s3486_s1 + $0x30] sm:$0xff] }
0x1033   :  { %v1635_v42 = vsel %vm1634_vm5, %v2418_v0, %v1631_v34  ;;  %vm1809_vm5 = vcmask 1040384  }
0x1034   :  { %v1640_v16 = vsel %vm1637_vm6, %v1639_v40, %v1635_v42  ;;  %v1675_v3 = vsel %vm1674_vm12, %v2420_v44, %v1671_v31  ;;  %v1689_v47 = vmul.f32 %v1685_v63, %v1517_v37 }
0x1035   :  { %v1641_v38 = vmul.f32 %v1640_v16, %v1616_v36  ;;  %v1680_v20 = vsel %vm1677_vm13, %v1679_v26, %v1675_v3  ;;  %v1804_v36 = vld [vmem:[%s3485_s28 + $0x38] sm:$0xff]  ;;  %v1799_v16 = vld [vmem:[%s3485_s28 + $0x10] sm:$0xff] }
0x1036   :  { %v1681_v0 = vmul.f32 %v1680_v20, %v1656_v1  ;;  %v1815_v40 = vpack.c.bf16 %v1804_v36, %v1803_v35 }
0x1037   :  { %v2265_v50 = vclamps-f32 %v1641_v38, 1.0  ;;  %v1813_v38 = vpack.c.bf16 %v1800_v46, %v1799_v16 }
0x1038   :  { %v2266_v57 = vclamps-f32 %v1681_v0, 1.0  ;;  %1826 = vmatpush.bf16.msra.mxu3 %v1815_v40 }
0x1039   :  { %v1686_v56 = vadd.f32 1.0, %v2265_v50  ;;  %v1843_v50 = vld [vmem:[%s3486_s1 + $0x38] sm:$0xff] }
0x103a   :  { %v1687_v6 = vadd.f32 1.0, %v2266_v57  ;;  %v1849_v53 = vpack.c.bf16 %v1843_v50, %v1842_v49 }
0x103b   :  { %v1690_v60 = vmul.f32 %v1686_v56, %v1518_v24 }
0x103c   :  { %v1691_v12 = vmul.f32 %v1687_v6, %v1519_v2  ;;  %1827 = vmatpush.bf16.msra.mxu3 %v1814_v4  ;;  %1860 = vmatpush.bf16.msrb.mxu2 %v1849_v53  ;;  %v2346_v2 = vld [vmem:[%s3488_s7] ss:$0 sm:$0xff] }
0x103d   :  { %v1692_v59 = vpack.c.bf16 %v1690_v60, %v1688_v33 }
0x103e   :  { %v1693_v62 = vpack.c.bf16 %v1691_v12, %v1689_v47 }
0x103f   :  { %1721 = vmatmul.bf16.vlgmr.msra.gmra.mxu0 %v1692_v59 }
0x1040   :  { %1735 = vmatmul.bf16.vlgmr.msrb.gmra.mxu1 %v1693_v62  ;;  %1828 = vmatpush.bf16.msra.mxu3 %v1813_v38 }
0x1044   :  { %1829 = vmatpush.bf16.msra.mxu3 %v1812_v13  ;;  %v1915_v13 = vld [vmem:[%s3491_s15 + $0x10] sm:$0xff] }
0x10bc   :  { %v1722_v30 = vpop.f32.mrf.mxu0 }
0x10bd   :  { %v1736_v14 = vpop.f32.mrf.mxu1  ;;  %v1723_v45 = vadd.f32 %v2344_v17, %v1722_v30 }
0x10bf   :  { %v1737_v22 = vadd.f32 %v1736_v14, %v1723_v45  ;;  %v1840_v45 = vld [vmem:[%s3486_s1 + $0x20] sm:$0xff] }
0x10c1   :  { %v1741_v19 = vadd.f32 %v1737_v22, %v3192_v61  ;;  %v1838_v22 = vld [vmem:[%s3486_s1 + $0x10] sm:$0xff] }
0x10c3   :  { %v1743_v23 = vsel %vm172_vm0, %v1741_v19, 0.0 }
0x10c4   :  { %v1724_v15 = vpop.f32.mrf.mxu0 }
0x10c5   :  { %v1725_v51 = vadd.f32 %v2344_v17, %v1724_v15  ;;  %v1738_v18 = vpop.f32.mrf.mxu1 }
0x10c7   :  { %v1739_v21 = vadd.f32 %v1738_v18, %v1725_v51 }
0x10c9   :  { %v1742_v7 = vadd.f32 %v1739_v21, %v3194_v58  ;;  %v1841_v21 = vld [vmem:[%s3486_s1 + $0x28] sm:$0xff] }
0x10cb   :  { %v1746_v9 = vsel %vm172_vm0, %v1742_v7, 0.0 }
0x10cc   :  { %1747 = vadd.xlane.f32.xlu1 %v1746_v9  ;;  %v1839_v9 = vld [vmem:[%s3486_s1 + $0x18] sm:$0xff] }
0x10d4   :  { %1744 = vadd.xlane.f32.xlu1 %v1743_v23  ;;  %v1836_v23 = vld [vmem:[%s3486_s1] sm:$0xff] }
0x113f   :  { %v1748_v39 = vpop.xlane.xlu1 %1747 }
0x1140   :  { %v1750_v25 = vmul.f32 %v1748_v39, %v2725_v10  ;;  %v1837_v39 = vld [vmem:[%s3486_s1 + $0x8] sm:$0xff] }
0x1142   :  { %v1752_v11 = vsub.f32 %v1742_v7, %v1750_v25  ;;  %v1848_v7 = vpack.c.bf16 %v1841_v21, %v1840_v45  ;;  %v1846_v25 = vpack.c.bf16 %v1837_v39, %v1836_v23 }
0x1144   :  { %v1754_v28 = vmul.f32 %v1752_v11, %v1752_v11  ;;  %1861 = vmatpush.bf16.msrb.mxu2 %v1848_v7  ;;  %v2349_v7 = vld [vmem:[%s3492_s16] ss:$0 sm:$0xff] }
0x1146   :  { %v1758_v58 = vsel %vm172_vm0, %v1754_v28, 0.0 }
0x1147   :  { %1759 = vadd.xlane.f32.xlu1 %v1758_v58  ;;  %v1745_v43 = vpop.xlane.xlu1 %1744 }
0x1148   :  { %v1749_v44 = vmul.f32 %v1745_v43, %v2725_v10 }
0x114a   :  { %v1751_v61 = vsub.f32 %v1741_v19, %v1749_v44  ;;  %v1847_v19 = vpack.c.bf16 %v1839_v9, %v1838_v22 }
0x114c   :  { %v1753_v32 = vmul.f32 %v1751_v61, %v1751_v61  ;;  %1862 = vmatpush.bf16.msrb.mxu2 %v1847_v19 }
0x114e   :  { %v1755_v34 = vsel %vm172_vm0, %v1753_v32, 0.0  ;;  %v2348_v32 = vld [vmem:[%s3490_s11] ss:$0 sm:$0xff] }
0x114f   :  { %1756 = vadd.xlane.f32.xlu0 %v1755_v34 }
0x1150   :  { %1863 = vmatpush.bf16.msrb.mxu2 %v1846_v25 }
0x11ba   :  { %v1760_v42 = vpop.xlane.xlu1 %1759 }
0x11bb   :  { %v1762_v5 = vmul.f32 %v1760_v42, %v2725_v10 }
0x11bd   :  { %v1764_v48 = vadd.f32 1e-12, %v1762_v5 }
0x11bf   :  { %2421 = vrsqrt.f32 %v1764_v48  ;;  %vm1781_vm15 = vweird.f32 %v1764_v48 }
0x11c2   :  { %v1757_v55 = vpop.xlane.xlu0 %1756 }
0x11c3   :  { %v1761_v31 = vmul.f32 %v1757_v55, %v2725_v10  ;;  %v2345_v10 = vld [vmem:[%s3487_s2] ss:$0 sm:$0xff]  ;;  %v1916_v55 = vld [vmem:[%s3491_s15 + $0x18] sm:$0xff] }
0x11c4   :  { %v1920_v49 = vpack.c.bf16 %v1916_v55, %v1915_v13 }
0x11c5   :  { %v2422_v24 = vpop.eup %2421  ;;  %v1763_v56 = vadd.f32 1e-12, %v1761_v31 }
0x11c6   :  { %v1776_v26 = vmul.f32 %v2422_v24, %v1764_v48  ;;  %vm1782_vm14 = vweird.f32 %v2422_v24  ;;  %1933 = vmatpush.bf16.msrb.mxu3 %v1920_v49 }
0x11c7   :  { %2423 = vrsqrt.f32 %v1763_v56  ;;  %vm1783_vm1 = vmor %vm1781_vm15, %vm1782_vm14  ;;  %vm1771_vm3 = vweird.f32 %v1763_v56  ;;  %vm1992_vm15 = vcmask 130048  }
0x11c8   :  { %v1777_v54 = vmul.f32 %v2422_v24, %v1776_v26 }
0x11ca   :  { %v1778_v1 = vmul.f32 0.5, %v1777_v54 }
0x11cc   :  { %v1779_v3 = vsub.f32 1.5, %v1778_v1 }
0x11cd   :  { %v2424_v33 = vpop.eup %2423 }
0x11ce   :  { %v1780_v60 = vmul.f32 %v2422_v24, %v1779_v3  ;;  %v1766_v20 = vmul.f32 %v2424_v33, %v1763_v56  ;;  %vm1772_vm2 = vweird.f32 %v2424_v33  ;;  %v1914_v56 = vld [vmem:[%s3491_s15 + $0x8] sm:$0xff] }
0x11cf   :  { %vm1773_vm4 = vmor %vm1771_vm3, %vm1772_vm2 }
0x11d0   :  { %v1784_v0 = vsel %vm1783_vm1, %v2422_v24, %v1780_v60  ;;  %v1767_v59 = vmul.f32 %v2424_v33, %v1766_v20  ;;  %v1913_v24 = vld [vmem:[%s3491_s15] sm:$0xff] }
0x11d1   :  { %v1786_v63 = vmul.f32 %v1784_v0, %v1752_v11  ;;  %v2347_v11 = vld [vmem:[%s3489_s10] ss:$0 sm:$0xff]  ;;  %v1919_v26 = vpack.c.bf16 %v1914_v56, %v1913_v24 }
0x11d2   :  { %v1768_v57 = vmul.f32 0.5, %v1767_v59 }
0x11d3   :  { %v1791_v6 = vmul.f32 %v2345_v10, %v1786_v63  ;;  %1934 = vmatpush.bf16.msrb.mxu3 %v1919_v26 }
0x11d4   :  { %v1769_v37 = vsub.f32 1.5, %v1768_v57 }
0x11d5   :  { %v1796_v62 = vadd.f32 %v2346_v2, %v1791_v6 }
0x11d6   :  { %v1770_v47 = vmul.f32 %v2424_v33, %v1769_v37 }
0x11d7   :  { %v1807_v15 = vrot.slane %v1796_v62, 7 }
0x11d8   :  { %v1774_v12 = vsel %vm1773_vm4, %v2424_v33, %v1770_v47 }
0x11d9   :  { %v1785_v30 = vmul.f32 %v1774_v12, %v1751_v61 }
0x11db   :  { %v1790_v14 = vmul.f32 %v2345_v10, %v1785_v30 }
0x11dd   :  { %v1795_v17 = vadd.f32 %v2346_v2, %v1790_v14 }
0x11df   :  { %v1810_v51 = vsel %vm1809_vm5, %v1795_v17, %v1807_v15 }
0x11e0   :  { %v1811_v18 = vpack.c.bf16 %v1810_v51, %v1810_v51 }
0x11e2   :  { %2267 = vmatmul.msk.bf16.vlgmr.msra.gmra.mxu3 %vm172_vm0, %v1811_v18 }
0x1265   :  { %v1831_v28 = vpop.f32.mrf.mxu3 }
0x1266   :  { %v1832_v58 = vadd.f32 %v2347_v11, %v1831_v28 }
0x1268   :  { %2425 = vtanh.f32 %v1832_v58 }
0x126d   :  { %v1833_v43 = vpop.f32.mrf.mxu3 }
0x126e   :  { %v2426_v44 = vpop.eup %2425 }
0x126f   :  { %v1845_v61 = vpack.c.bf16 %v2426_v44, %v2426_v44 }
0x1271   :  { %2268 = vmatmul.msk.bf16.vlgmr.msrb.gmra.mxu2 %vm172_vm0, %v1845_v61 }
0x12f4   :  { %v1865_v34 = vpop.f32.mrf.mxu2 }
0x12f5   :  { %v1866_v35 = vadd.f32 %v2348_v32, %v1865_v34 }
0x12f7   :  { %v1870_v36 = vmul.f32 %v1866_v35, %v2882_v29  ;;  %v1869_v51 = vmul.f32 0.5, %v1866_v35 }
0x12f9   :  { %v1871_v40 = vmul.f32 %v1870_v36, %v1870_v36 }
0x12fb   :  { %v1872_v27 = vmin.f32 %v1871_v40, 16.0 }
0x12fc   :  { %v1867_v41 = vpop.f32.mrf.mxu2 }
0x12fd   :  { %v1873_v4 = vmul.f32 2.1237322e-06, %v1872_v27  ;;  %v1884_v42 = vmul.f32 3.8918573e-05, %v1872_v27  ;;  %v1984_v41 = vld [vmem:[%s3493_s18] sm:$0xff] }
0x12ff   :  { %v1874_v5 = vadd.f32 0.00028619796, %v1873_v4  ;;  %v1885_v16 = vadd.f32 0.001143296, %v1884_v42  ;;  %v1985_v4 = vld [vmem:[%s3493_s18 + $0x8] sm:$0xff] }
0x1300   :  { %v1988_v42 = vpack.c.bf16 %v1985_v4, %v1984_v41 }
0x1301   :  { %v1875_v46 = vmul.f32 %v1874_v5, %v1872_v27  ;;  %v1886_v38 = vmul.f32 %v1885_v16, %v1872_v27 }
0x1302   :  { %2003 = vmatpush.bf16.msra.mxu2 %v1988_v42 }
0x1303   :  { %v1887_v48 = vadd.f32 0.014752088, %v1886_v38  ;;  %v1876_v8 = vadd.f32 0.0036580483, %v1875_v46 }
0x1305   :  { %v1888_v52 = vmul.f32 %v1887_v48, %v1872_v27  ;;  %v1877_v31 = vmul.f32 %v1876_v8, %v1872_v27 }
0x1307   :  { %v1889_v50 = vadd.f32 0.112945676, %v1888_v52  ;;  %v1878_v1 = vadd.f32 0.05243302, %v1877_v31 }
0x1309   :  { %v1890_v53 = vmul.f32 %v1889_v50, %v1872_v27  ;;  %v1879_v60 = vmul.f32 %v1878_v1, %v1872_v27 }
0x130b   :  { %v1891_v54 = vadd.f32 0.4994258, %v1890_v53  ;;  %v1880_v20 = vadd.f32 0.18741608, %v1879_v60 }
0x130d   :  { %v1892_v3 = vmul.f32 %v1891_v54, %v1872_v27  ;;  %v1881_v59 = vmul.f32 %v1880_v20, %v1872_v27 }
0x130f   :  { %v1893_v33 = vadd.f32 1.0, %v1892_v3  ;;  %v1882_v37 = vadd.f32 1.1283791, %v1881_v59 }
0x1311   :  { %2427 = vrcp.f32 %v1893_v33  ;;  %v1905_v57 = vand.u32 2147483648, %v1893_v33  ;;  %v1903_v6 = vand.u32 2147483647, %v1893_v33  ;;  %vm1899_vm6 = vweird.f32 %v1893_v33 }
0x1312   :  { %v1883_v62 = vmul.f32 %v1882_v37, %v1870_v36 }
0x1313   :  { %v1906_v12 = vor.u32 1.1754944e-38, %v1905_v57  ;;  %vm1904_vm11 = vcmp.eq.f32.partialorder %v1903_v6, 8.507059e+37 }
0x1317   :  { %v2428_v0 = vpop.eup %2427 }
0x1318   :  { %v1895_v10 = vmul.f32 %v2428_v0, %v1893_v33  ;;  %vm1900_vm0 = vweird.f32 %v2428_v0 }
0x1319   :  { %vm1901_vm7 = vmor %vm1899_vm6, %vm1900_vm0 }
0x131a   :  { %v1896_v63 = vsub.f32 1.0, %v1895_v10 }
0x131c   :  { %v1897_v2 = vmul.f32 %v2428_v0, %v1896_v63  ;;  %v2350_v63 = vld [vmem:[%s3494_s22] ss:$0 sm:$0xff] }
0x131e   :  { %v1898_v47 = vadd.f32 %v2428_v0, %v1897_v2 }
0x1320   :  { %v1902_v30 = vsel %vm1901_vm7, %v2428_v0, %v1898_v47  ;;  %vm2130_vm7 = vcmask 31744  }
0x1321   :  { %v1907_v14 = vsel %vm1904_vm11, %v1906_v12, %v1902_v30  ;;  %vm2151_vm11 = vcmask 25600  }
0x1322   :  { %v1908_v15 = vmul.f32 %v1907_v14, %v1883_v62 }
0x1324   :  { %v2269_v17 = vclamps-f32 %v1908_v15, 1.0 }
0x1326   :  { %v1911_v18 = vadd.f32 1.0, %v2269_v17 }
0x1328   :  { %v1912_v45 = vmul.f32 %v1911_v18, %v1869_v51 }
0x132a   :  { %v1918_v21 = vpack.c.bf16 %v1912_v45, %v1912_v45 }
0x132c   :  { %2270 = vmatmul.msk.bf16.vlgmr.msrb.gmra.mxu3 %vm366_vm9, %v1918_v21 }
0x13af   :  { %v1936_v22 = vpop.f32.mrf.mxu3 }
0x13b0   :  { %v1937_v9 = vadd.f32 %v2349_v7, %v1936_v22 }
0x13b2   :  { %v1941_v19 = vmul.f32 %v1937_v9, %v2882_v29  ;;  %v1940_v20 = vmul.f32 0.5, %v1937_v9  ;;  %v2053_v9 = vld [vmem:[%s3495_s23] sm:$0xff] }
0x13b4   :  { %v1942_v23 = vmul.f32 %v1941_v19, %v1941_v19 }
0x13b6   :  { %v1943_v39 = vmin.f32 %v1942_v23, 16.0  ;;  %v2056_v23 = vpack.c.bf16 %v2053_v9, %v2053_v9 }
0x13b7   :  { %v1938_v25 = vpop.f32.mrf.mxu3 }
0x13b8   :  { %v1944_v11 = vmul.f32 2.1237322e-06, %v1943_v39  ;;  %v1955_v28 = vmul.f32 3.8918573e-05, %v1943_v39  ;;  %v2064_v25 = vsel %vm406_vm8, %v2056_v23, 0 }
0x13b9   :  { %2073 = vmatpush.bf16.msrb.mxu0 %v2064_v25 }
0x13ba   :  { %v1945_v58 = vadd.f32 0.00028619796, %v1944_v11  ;;  %v1956_v43 = vadd.f32 0.001143296, %v1955_v28 }
0x13bc   :  { %v1946_v44 = vmul.f32 %v1945_v58, %v1943_v39  ;;  %v1957_v61 = vmul.f32 %v1956_v43, %v1943_v39 }
0x13be   :  { %v1958_v32 = vadd.f32 0.014752088, %v1957_v61  ;;  %v1947_v34 = vadd.f32 0.0036580483, %v1946_v44 }
0x13c0   :  { %v1959_v35 = vmul.f32 %v1958_v32, %v1943_v39  ;;  %v1948_v40 = vmul.f32 %v1947_v34, %v1943_v39 }
0x13c2   :  { %v1960_v36 = vadd.f32 0.112945676, %v1959_v35  ;;  %v1949_v16 = vadd.f32 0.05243302, %v1948_v40 }
0x13c4   :  { %v1961_v27 = vmul.f32 %v1960_v36, %v1943_v39  ;;  %v1950_v48 = vmul.f32 %v1949_v16, %v1943_v39 }
0x13c6   :  { %v1962_v5 = vadd.f32 0.4994258, %v1961_v27  ;;  %v1951_v8 = vadd.f32 0.18741608, %v1950_v48 }
0x13c8   :  { %v1963_v46 = vmul.f32 %v1962_v5, %v1943_v39  ;;  %v1952_v13 = vmul.f32 %v1951_v8, %v1943_v39 }
0x13ca   :  { %v1964_v38 = vadd.f32 1.0, %v1963_v46  ;;  %v1953_v31 = vadd.f32 1.1283791, %v1952_v13 }
0x13cc   :  { %2429 = vrcp.f32 %v1964_v38  ;;  %v1976_v50 = vand.u32 2147483648, %v1964_v38  ;;  %v1974_v24 = vand.u32 2147483647, %v1964_v38  ;;  %vm1970_vm12 = vweird.f32 %v1964_v38 }
0x13cd   :  { %v1954_v54 = vmul.f32 %v1953_v31, %v1941_v19 }
0x13ce   :  { %v1977_v26 = vor.u32 1.1754944e-38, %v1976_v50  ;;  %vm1975_vm14 = vcmp.eq.f32.partialorder %v1974_v24, 8.507059e+37 }
0x13d2   :  { %v2430_v52 = vpop.eup %2429 }
0x13d3   :  { %v1966_v55 = vmul.f32 %v2430_v52, %v1964_v38  ;;  %vm1971_vm9 = vweird.f32 %v2430_v52 }
0x13d4   :  { %vm1972_vm13 = vmor %vm1970_vm12, %vm1971_vm9 }
0x13d5   :  { %v1967_v49 = vsub.f32 1.0, %v1966_v55 }
0x13d7   :  { %v1968_v53 = vmul.f32 %v2430_v52, %v1967_v49  ;;  %v2351_v49 = vld [vmem:[%s2704_s4] ss:$0 sm:$0xff]  ;;  %s2184_s4 = sshll.u32 %s2719_s27, 4  ;;  %s2185_s4 = int_to_ptr.hbm [resolvable:$true] %s2184_s4 }
0x13d8   :  { %s2451_s26 = sshra.s32 %s2185_s4, 4  ;;  %s2452_s26 = int_to_ptr.hbm [resolvable:$true] %s2451_s26 }
0x13d9   :  { %v1969_v56 = vadd.f32 %v2430_v52, %v1968_v53  ;;  %s2453_s0 = scalar_lea.hbm %s2452_s26, 2  ;;  %p2456_p1 = scmp.lt.s32.totalorder %s2452_s26, %s2719_s27 }
0x13da   :  { %p2454_p0 = scmp.ne.s32.totalorder %s2452_s26, %s2453_s0  ;;  %p2457_p2 = scmp.lt.s32.totalorder %s2455_s5, %s2453_s0 }
0x13db   :  { %v1973_v1 = vsel %vm1972_vm13, %v2430_v52, %v1969_v56 }
0x13dc   :  { %v1978_v3 = vsel %vm1975_vm14, %v1977_v26, %v1973_v1  ;;  %p2458_p3 = por %p2457_p2, %p2456_p1 }
0x13dd   :  { %v1979_v33 = vmul.f32 %v1978_v3, %v1954_v54 }
0x13de   :  { %p2459_p4 = pnand %p2458_p3, %p2454_p0 }
0x13df   :  { %v2271_v60 = vclamps-f32 %v1979_v33, 1.0 }
0x13e1   :  { %v1982_v0 = vadd.f32 1.0, %v2271_v60 }
0x13e3   :  { %v1983_v59 = vmul.f32 %v1982_v0, %v1940_v20 }
0x13e5   :  { %v1987_v10 = vpack.c.bf16 %v1983_v59, %v1983_v59 }
0x13e7   :  { %2272 = vmatmul.msk.bf16.vlgmr.msra.gmra.mxu2 %vm1992_vm15, %v1987_v10 }
0x146a   :  { %v2005_v57 = vpop.f32.mrf.mxu2 }
0x146b   :  { %v2006_v37 = vadd.f32 %v2350_v63, %v2005_v57 }
0x146d   :  { %v2010_v2 = vmul.f32 %v2006_v37, %v2882_v29  ;;  %v2009_v8 = vmul.f32 0.5, %v2006_v37  ;;  %v2123_v37 = vld [vmem:[%s2709_s12] sm:$0xf]  ;;  %s2510_s12 = smov [#allocation2]  }
0x146f   :  { %v2011_v6 = vmul.f32 %v2010_v2, %v2010_v2 }
0x1471   :  { %v2012_v47 = vmin.f32 %v2011_v6, 16.0  ;;  %v2126_v6 = vpack.c.bf16 %v2123_v37, %v2123_v37 }
0x1472   :  { %v2007_v12 = vpop.f32.mrf.mxu2 }
0x1473   :  { %v2013_v62 = vmul.f32 2.1237322e-06, %v2012_v47  ;;  %v2024_v30 = vmul.f32 3.8918573e-05, %v2012_v47 }
0x1475   :  { %v2014_v14 = vadd.f32 0.00028619796, %v2013_v62  ;;  %v2025_v15 = vadd.f32 0.001143296, %v2024_v30 }
0x1477   :  { %v2015_v17 = vmul.f32 %v2014_v14, %v2012_v47  ;;  %v2026_v51 = vmul.f32 %v2025_v15, %v2012_v47 }
0x1479   :  { %v2027_v18 = vadd.f32 0.014752088, %v2026_v51  ;;  %v2016_v45 = vadd.f32 0.0036580483, %v2015_v17 }
0x147b   :  { %v2028_v21 = vmul.f32 %v2027_v18, %v2012_v47  ;;  %v2017_v22 = vmul.f32 %v2016_v45, %v2012_v47 }
0x147d   :  { %v2029_v7 = vadd.f32 0.112945676, %v2028_v21  ;;  %v2018_v11 = vadd.f32 0.05243302, %v2017_v22 }
0x147f   :  { %v2030_v19 = vmul.f32 %v2029_v7, %v2012_v47  ;;  %v2019_v43 = vmul.f32 %v2018_v11, %v2012_v47 }
0x1481   :  { %v2031_v39 = vadd.f32 0.4994258, %v2030_v19  ;;  %v2020_v44 = vadd.f32 0.18741608, %v2019_v43 }
0x1483   :  { %v2032_v28 = vmul.f32 %v2031_v39, %v2012_v47  ;;  %v2021_v32 = vmul.f32 %v2020_v44, %v2012_v47 }
0x1485   :  { %v2033_v58 = vadd.f32 1.0, %v2032_v28  ;;  %v2022_v40 = vadd.f32 1.1283791, %v2021_v32 }
0x1487   :  { %2431 = vrcp.f32 %v2033_v58  ;;  %v2045_v36 = vand.u32 2147483648, %v2033_v58  ;;  %v2043_v41 = vand.u32 2147483647, %v2033_v58  ;;  %vm2039_vm2 = vweird.f32 %v2033_v58 }
0x1488   :  { %v2023_v5 = vmul.f32 %v2022_v40, %v2010_v2 }
0x1489   :  { %v2046_v42 = vor.u32 1.1754944e-38, %v2045_v36  ;;  %vm2044_vm3 = vcmp.eq.f32.partialorder %v2043_v41, 8.507059e+37 }
0x148d   :  { %v2432_v61 = vpop.eup %2431 }
0x148e   :  { %v2035_v34 = vmul.f32 %v2432_v61, %v2033_v58  ;;  %vm2040_vm1 = vweird.f32 %v2432_v61 }
0x148f   :  { %vm2041_vm8 = vmor %vm2039_vm2, %vm2040_vm1 }
0x1490   :  { %v2036_v35 = vsub.f32 1.0, %v2035_v34  ;;  %v2352_v34 = vld [vmem:[%s2714_s20] ss:$0 sm:$0xff]  ;;  %s2182_s20 = sshll.u32 %s2510_s12, 4  ;;  %s2183_s20 = int_to_ptr.vmem [resolvable:$true] %s2182_s20 }
0x1492   :  { %v2037_v27 = vmul.f32 %v2432_v61, %v2036_v35 }
0x1494   :  { %v2038_v4 = vadd.f32 %v2432_v61, %v2037_v27 }
0x1496   :  { %v2042_v16 = vsel %vm2041_vm8, %v2432_v61, %v2038_v4 }
0x1497   :  { %v2047_v46 = vsel %vm2044_vm3, %v2046_v42, %v2042_v16 }
0x1498   :  { %v2048_v38 = vmul.f32 %v2047_v46, %v2023_v5 }
0x149a   :  { %v2273_v48 = vclamps-f32 %v2048_v38, 1.0 }
0x149c   :  { %v2051_v52 = vadd.f32 1.0, %v2273_v48 }
0x149e   :  { %v2052_v13 = vmul.f32 %v2051_v52, %v2009_v8 }
0x14a0   :  { %v2055_v55 = vpack.c.bf16 %v2052_v13, %v2052_v13 }
0x14a2   :  { %2274 = vmatmul.msk.bf16.vlgmr.msrb.gmra.mxu0 %vm389_vm10, %v2055_v55  ;;  %vm2134_vm10 = vcmask 1041408  }
0x151f   :  { %v2075_v50 = vpop.f32.mrf.mxu0 }
0x1520   :  { %v2076_v31 = vadd.f32 %v2351_v49, %v2075_v50 }
0x1522   :  { %v2080_v53 = vmul.f32 %v2076_v31, %v2882_v29  ;;  %v2136_v29 = vsel %vm2134_vm10, %v2126_v6, 0  ;;  %v2079_v43 = vmul.f32 0.5, %v2076_v31 }
0x1523   :  { %2145 = vmatpush.bf16.msra.mxu1 %v2136_v29 }
0x1524   :  { %v2081_v24 = vmul.f32 %v2080_v53, %v2080_v53 }
0x1526   :  { %v2082_v56 = vmin.f32 %v2081_v24, 16.0 }
0x1527   :  { %v2077_v26 = vpop.f32.mrf.mxu0 }
0x1528   :  { %v2083_v54 = vmul.f32 2.1237322e-06, %v2082_v56  ;;  %v2094_v1 = vmul.f32 3.8918573e-05, %v2082_v56 }
0x152a   :  { %v2084_v3 = vadd.f32 0.00028619796, %v2083_v54  ;;  %v2095_v33 = vadd.f32 0.001143296, %v2094_v1 }
0x152c   :  { %v2085_v60 = vmul.f32 %v2084_v3, %v2082_v56  ;;  %v2096_v20 = vmul.f32 %v2095_v33, %v2082_v56 }
0x152e   :  { %v2097_v0 = vadd.f32 0.014752088, %v2096_v20  ;;  %v2086_v59 = vadd.f32 0.0036580483, %v2085_v60 }
0x1530   :  { %v2098_v10 = vmul.f32 %v2097_v0, %v2082_v56  ;;  %v2087_v57 = vmul.f32 %v2086_v59, %v2082_v56 }
0x1532   :  { %v2099_v63 = vadd.f32 0.112945676, %v2098_v10  ;;  %v2088_v12 = vadd.f32 0.05243302, %v2087_v57 }
0x1534   :  { %v2100_v2 = vmul.f32 %v2099_v63, %v2082_v56  ;;  %v2089_v14 = vmul.f32 %v2088_v12, %v2082_v56 }
0x1536   :  { %v2101_v47 = vadd.f32 0.4994258, %v2100_v2  ;;  %v2090_v15 = vadd.f32 0.18741608, %v2089_v14 }
0x1538   :  { %v2102_v62 = vmul.f32 %v2101_v47, %v2082_v56  ;;  %v2091_v51 = vmul.f32 %v2090_v15, %v2082_v56 }
0x153a   :  { %v2103_v30 = vadd.f32 1.0, %v2102_v62  ;;  %v2092_v7 = vadd.f32 1.1283791, %v2091_v51 }
0x153c   :  { %2433 = vrcp.f32 %v2103_v30  ;;  %v2115_v21 = vand.u32 2147483648, %v2103_v30  ;;  %v2113_v9 = vand.u32 2147483647, %v2103_v30  ;;  %vm2109_vm5 = vweird.f32 %v2103_v30 }
0x153d   :  { %v2093_v39 = vmul.f32 %v2092_v7, %v2080_v53 }
0x153e   :  { %v2116_v23 = vor.u32 1.1754944e-38, %v2115_v21  ;;  %vm2114_vm6 = vcmp.eq.f32.partialorder %v2113_v9, 8.507059e+37 }
0x1542   :  { %v2434_v17 = vpop.eup %2433 }
0x1543   :  { %v2105_v18 = vmul.f32 %v2434_v17, %v2103_v30  ;;  %vm2110_vm4 = vweird.f32 %v2434_v17 }
0x1544   :  { %vm2111_vm0 = vmor %vm2109_vm5, %vm2110_vm4 }
0x1545   :  { %v2106_v45 = vsub.f32 1.0, %v2105_v18 }
0x1547   :  { %v2107_v22 = vmul.f32 %v2434_v17, %v2106_v45 }
0x1549   :  { %v2108_v19 = vadd.f32 %v2434_v17, %v2107_v22 }
0x154b   :  { %v2112_v25 = vsel %vm2111_vm0, %v2434_v17, %v2108_v19 }
0x154c   :  { %v2117_v11 = vsel %vm2114_vm6, %v2116_v23, %v2112_v25 }
0x154d   :  { %v2118_v28 = vmul.f32 %v2117_v11, %v2093_v39 }
0x154f   :  { %v2275_v58 = vclamps-f32 %v2118_v28, 1.0 }
0x1551   :  { %v2121_v44 = vadd.f32 1.0, %v2275_v58 }
0x1553   :  { %v2122_v61 = vmul.f32 %v2121_v44, %v2079_v43 }
0x1555   :  { %v2125_v32 = vpack.c.bf16 %v2122_v61, %v2122_v61 }
0x1557   :  { %2276 = vmatmul.msk.bf16.vlgmr.msra.gmra.mxu1 %vm2130_vm7, %v2125_v32 }
0x15d4   :  { %v2147_v35 = vpop.f32.mrf.mxu1 }
0x15d5   :  { %v2148_v36 = vadd.f32 %v2352_v34, %v2147_v35 }
0x15d7   :  { %v2152_v40 = vsel %vm2151_vm11, %v2148_v36, -inf }
0x15d8   :  { %2153 = vmax.xlane.f32.xlu1 %v2152_v40 }
0x15dc   :  { %v2149_v27 = vpop.f32.mrf.mxu1 }
0x164b   :  { %v2154_v41 = vpop.xlane.xlu1 %2153 }
0x164c   :  { %v2155_v4 = vsub.f32 %v2148_v36, %v2154_v41 }
0x164e   :  { %v2156_v42 = vmul.f32 1.442695, %v2155_v4 }
0x1650   :  { %2435 = vpow2.f32 %v2156_v42 }
0x1656   :  { %v2436_v5 = vpop.eup %2435 }
0x1657   :  { %v2158_v16 = vsel %vm2151_vm11, %v2436_v5, 0.0 }
0x1658   :  { %2159 = vadd.xlane.f32.xlu2 %v2158_v16 }
0x16cb   :  { %v2160_v46 = vpop.xlane.xlu2 %2159 }
0x16cc   :  { %2437 = vrcp.f32 %v2160_v46  ;;  %v2172_v52 = vand.u32 2147483648, %v2160_v46  ;;  %v2170_v55 = vand.u32 2147483647, %v2160_v46  ;;  %vm2166_vm12 = vweird.f32 %v2160_v46 }
0x16ce   :  { %v2173_v50 = vor.u32 1.1754944e-38, %v2172_v52  ;;  %vm2171_vm14 = vcmp.eq.f32.partialorder %v2170_v55, 8.507059e+37 }
0x16d2   :  { %v2438_v38 = vpop.eup %2437 }
0x16d3   :  { %v2162_v48 = vmul.f32 %v2438_v38, %v2160_v46  ;;  %vm2167_vm9 = vweird.f32 %v2438_v38 }
0x16d4   :  { %vm2168_vm13 = vmor %vm2166_vm12, %vm2167_vm9 }
0x16d5   :  { %v2163_v8 = vsub.f32 1.0, %v2162_v48 }
0x16d7   :  { %v2164_v13 = vmul.f32 %v2438_v38, %v2163_v8 }
0x16d9   :  { %v2165_v49 = vadd.f32 %v2438_v38, %v2164_v13 }
0x16db   :  { %v2169_v31 = vsel %vm2168_vm13, %v2438_v38, %v2165_v49 }
0x16dc   :  { %v2174_v53 = vsel %vm2171_vm14, %v2173_v50, %v2169_v31 }
0x16dd   :  { %v2175_v24 = vmul.f32 %v2436_v5, %v2174_v53 }
0x16df   :  { %2176 = vst.msk [vmem:[#allocation2] sm:$0x3] %vm2151_vm11, %v2175_v24 }
0x16e0   :  { %2462 = shalt.err (!%p2459_p4)
}
0x16e1   :  { %2187 = dma.vmem_to_hbm [thread:$0]  %s2183_s20, 32, %s2185_s4, [#allocation3]  }
0x16e2   :  { %2463 = dma.done.wait [#allocation3], 32  }
0x16e3   :  { %2464 = vsyncadd [#allocation3], 4294967264 }
0x16e4   :  { %2192 = vsyncpa [#allocation3], 1 }

</bundles_post_ra>
